<compile_context>
chip_gen: v5e
topology: v5e:2x2
jax: 0.10.0
libtpu: 0.0.40
codegen_flags: <defaults>
</compile_context>

<pallas_src>
import jax
import jax.numpy as jnp
from jax.experimental import pallas as pl
from jax.experimental.pallas import tpu as pltpu

_NC_PAD = 128  # lane-dense padded classifier width (real n_classes = 2)


def _fused_forward_kernel(x_ref, w1_ref, b1_ref, w2_ref, b2_ref,
                          wc_ref, bc_ref, o_ref):
    # encoder_q: Linear(d_in, d_hidden) -> ReLU -> Linear(d_hidden, 2048)
    # bf16 operands, f32 accumulation; elementwise (bias, ReLU) kept in f32.
    h = jnp.dot(x_ref[...], w1_ref[...],
                preferred_element_type=jnp.float32) + b1_ref[...]
    h = jnp.maximum(h, 0.0)
    feat = jnp.dot(h.astype(jnp.bfloat16), w2_ref[...],
                   preferred_element_type=jnp.float32) + b2_ref[...]
    # classifier: Linear(2048, 2) padded to Linear(2048, 128) lane-dense.
    logits = jnp.dot(feat.astype(jnp.bfloat16), wc_ref[...],
                     preferred_element_type=jnp.float32) + bc_ref[...]
    o_ref[...] = logits.astype(o_ref.dtype)


def _round_up(n, m):
    return ((n + m - 1) // m) * m


def bal_sup_moco_forward(x_nchw, params):
    """Forward pass: classifier(encoder_q(im_q)).  x_nchw: [B, C, H, W] float32."""
    B = x_nchw.shape[0]
    x = x_nchw.reshape(B, -1)                      # glue: flatten NCHW -> [B, D_in]
    d_in = x.shape[1]

    # batch tiling: sublane-aligned tile, padded batch, batch grid axis.
    tb = min(128, _round_up(B, 8))
    b_pad = _round_up(B, tb)
    n_tiles = b_pad // tb
    if b_pad != B:
        x = jnp.pad(x, ((0, b_pad - B), (0, 0)))

    # bf16 operands (weights + activations); biases stay f32.
    x_bf16 = x.astype(jnp.bfloat16)
    w1 = params["w1"].astype(jnp.bfloat16)
    w2 = params["w2"].astype(jnp.bfloat16)
    b1 = params["b1"].astype(jnp.float32)
    b2 = params["b2"].astype(jnp.float32)

    # lane-dense classifier: zero-pad (2048, 2) -> (2048, 128).
    n_classes = params["wc"].shape[1]
    wc = jnp.pad(params["wc"], ((0, 0), (0, _NC_PAD - n_classes))).astype(jnp.bfloat16)
    bc = jnp.pad(params["bc"], ((0, 0), (0, _NC_PAD - n_classes))).astype(jnp.float32)

    d_hidden = w1.shape[1]
    d_feat = w2.shape[1]

    def const_spec(shape):
        # whole-array block, same block every grid step -> stays VMEM-resident.
        return pl.BlockSpec(shape, lambda i: tuple(0 for _ in shape))

    flops = 2 * b_pad * (d_in * d_hidden + d_hidden * d_feat + d_feat * _NC_PAD)
    bytes_accessed = (x_bf16.size * 2 + w1.size * 2 + w2.size * 2 + wc.size * 2
                      + b1.size * 4 + b2.size * 4 + bc.size * 4
                      + b_pad * _NC_PAD * 4)

    out = pl.pallas_call(
        _fused_forward_kernel,
        out_shape=jax.ShapeDtypeStruct((b_pad, _NC_PAD), jnp.float32),
        grid=(n_tiles,),
        in_specs=[
            pl.BlockSpec((tb, d_in), lambda i: (i, 0)),   # x: tiled over batch
            const_spec(w1.shape), const_spec(b1.shape),
            const_spec(w2.shape), const_spec(b2.shape),
            const_spec(wc.shape), const_spec(bc.shape),
        ],
        out_specs=pl.BlockSpec((tb, _NC_PAD), lambda i: (i, 0)),
        compiler_params=pltpu.CompilerParams(
            dimension_semantics=("parallel",),
            vmem_limit_bytes=32 << 20,
        ),
        cost_estimate=pl.CostEstimate(
            flops=flops, transcendentals=0, bytes_accessed=bytes_accessed),
    )(x_bf16, w1, b1, w2, b2, wc, bc)

    return out[:B, :n_classes]


def init_params(key, d_in, d_hidden, d_feat=2048, n_classes=2):
    """Deterministic parameter init (PyTorch-Linear-like uniform fan-in scaling)."""
    ks = jax.random.split(key, 6)

    def lin(kw, kb, fan_in, fan_out):
        bound = 1.0 / jnp.sqrt(fan_in)
        w = jax.random.uniform(kw, (fan_in, fan_out), jnp.float32, -bound, bound)
        b = jax.random.uniform(kb, (1, fan_out), jnp.float32, -bound, bound)
        return w, b

    w1, b1 = lin(ks[0], ks[1], d_in, d_hidden)
    w2, b2 = lin(ks[2], ks[3], d_hidden, d_feat)
    wc, bc = lin(ks[4], ks[5], d_feat, n_classes)
    return {"w1": w1, "b1": b1, "w2": w2, "b2": b2, "wc": wc, "bc": bc}


if __name__ == "__main__":
    key = jax.random.PRNGKey(0)
    k_x, k_p = jax.random.split(key)

    # small shapes: batch=2, channels=4, spatial=16x16  -> D_in = 1024
    B, C, H, W = 2, 4, 16, 16
    x = jax.random.normal(k_x, (B, C, H, W), dtype=jnp.float32)

    d_in = C * H * W
    d_hidden = 256
    params = init_params(k_p, d_in, d_hidden, d_feat=2048, n_classes=2)

    logits = bal_sup_moco_forward(x, params)
    jax.block_until_ready(logits)

    # sanity check against plain-JAX reference using the same bf16-operand /
    # f32-accumulation recipe.
    xf = x.reshape(B, -1).astype(jnp.bfloat16)
    w1b = params["w1"].astype(jnp.bfloat16)
    w2b = params["w2"].astype(jnp.bfloat16)
    wcb = params["wc"].astype(jnp.bfloat16)
    h = jnp.maximum(
        jnp.dot(xf, w1b, preferred_element_type=jnp.float32) + params["b1"], 0.0)
    feat = jnp.dot(h.astype(jnp.bfloat16), w2b,
                   preferred_element_type=jnp.float32) + params["b2"]
    ref = jnp.dot(feat.astype(jnp.bfloat16), wcb,
                  preferred_element_type=jnp.float32) + params["bc"]

    assert logits.shape == (B, 2)
    assert jnp.allclose(logits, ref, atol=1e-2, rtol=1e-2)

    print("KERNEL_OK")
</pallas_src>

<mosaic_0001>
module attributes {stable_mosaic.version = 11 : i64} {
  func.func @_fused_forward_kernel(%arg0: i32, %arg1: memref<8x1024xbf16, #tpu.memory_space<vmem>>, %arg2: memref<1024x256xbf16, #tpu.memory_space<vmem>>, %arg3: memref<1x256xf32, #tpu.memory_space<vmem>>, %arg4: memref<256x2048xbf16, #tpu.memory_space<vmem>>, %arg5: memref<1x2048xf32, #tpu.memory_space<vmem>>, %arg6: memref<2048x128xbf16, #tpu.memory_space<vmem>>, %arg7: memref<1x128xf32, #tpu.memory_space<vmem>>, %arg8: memref<8x128xf32, #tpu.memory_space<vmem>>) attributes {dimension_semantics = [#tpu.dimension_semantics<parallel>], iteration_bounds = array<i64: 1>, scalar_prefetch = 0 : i64, scratch_operands = 0 : i64, tpu.core_type = #tpu.core_type<tc>, window_params = [{transform_indices = @transform_0, window_bounds = array<i64: 8, 1024>}, {pipeline_mode = #tpu.pipeline_mode<synchronous>, transform_indices = @transform_1, window_bounds = array<i64: 1024, 256>}, {pipeline_mode = #tpu.pipeline_mode<synchronous>, transform_indices = @transform_2, window_bounds = array<i64: 1, 256>}, {pipeline_mode = #tpu.pipeline_mode<synchronous>, transform_indices = @transform_3, window_bounds = array<i64: 256, 2048>}, {pipeline_mode = #tpu.pipeline_mode<synchronous>, transform_indices = @transform_4, window_bounds = array<i64: 1, 2048>}, {pipeline_mode = #tpu.pipeline_mode<synchronous>, transform_indices = @transform_5, window_bounds = array<i64: 2048, 128>}, {pipeline_mode = #tpu.pipeline_mode<synchronous>, transform_indices = @transform_6, window_bounds = array<i64: 1, 128>}, {transform_indices = @transform_7, window_bounds = array<i64: 8, 128>}]} {
    %c0 = arith.constant 0 : index
    %c0_0 = arith.constant 0 : index
    %0 = vector.load %arg1[%c0, %c0_0] : memref<8x1024xbf16, #tpu.memory_space<vmem>>, vector<8x1024xbf16>
    %c0_1 = arith.constant 0 : index
    %c0_2 = arith.constant 0 : index
    %1 = vector.load %arg2[%c0_1, %c0_2] : memref<1024x256xbf16, #tpu.memory_space<vmem>>, vector<1024x256xbf16>
    %cst = arith.constant dense<0.000000e+00> : vector<8x256xf32>
    %2 = tpu.matmul %0, %1, %cst {dimension_numbers = #tpu.dot_dimension_numbers<[1], [0], [0], [1], [0, 0, 1, 1], [], []>} : vector<8x1024xbf16>, vector<1024x256xbf16>, vector<8x256xf32> -> vector<8x256xf32>
    %c0_3 = arith.constant 0 : index
    %c0_4 = arith.constant 0 : index
    %3 = vector.load %arg3[%c0_3, %c0_4] : memref<1x256xf32, #tpu.memory_space<vmem>>, vector<1x256xf32>
    %4 = vector.broadcast %3 : vector<1x256xf32> to vector<8x256xf32>
    %5 = arith.addf %2, %4 : vector<8x256xf32>
    %cst_5 = arith.constant 0.000000e+00 : f32
    %6 = vector.broadcast %cst_5 : f32 to vector<8x256xf32>
    %7 = arith.maximumf %5, %6 : vector<8x256xf32>
    %8 = arith.truncf %7 : vector<8x256xf32> to vector<8x256xbf16>
    %c0_6 = arith.constant 0 : index
    %c0_7 = arith.constant 0 : index
    %9 = vector.load %arg4[%c0_6, %c0_7] : memref<256x2048xbf16, #tpu.memory_space<vmem>>, vector<256x2048xbf16>
    %cst_8 = arith.constant dense<0.000000e+00> : vector<8x2048xf32>
    %10 = tpu.matmul %8, %9, %cst_8 {dimension_numbers = #tpu.dot_dimension_numbers<[1], [0], [0], [1], [0, 0, 1, 1], [], []>} : vector<8x256xbf16>, vector<256x2048xbf16>, vector<8x2048xf32> -> vector<8x2048xf32>
    %c0_9 = arith.constant 0 : index
    %c0_10 = arith.constant 0 : index
    %11 = vector.load %arg5[%c0_9, %c0_10] : memref<1x2048xf32, #tpu.memory_space<vmem>>, vector<1x2048xf32>
    %12 = vector.broadcast %11 : vector<1x2048xf32> to vector<8x2048xf32>
    %13 = arith.addf %10, %12 : vector<8x2048xf32>
    %14 = arith.truncf %13 : vector<8x2048xf32> to vector<8x2048xbf16>
    %c0_11 = arith.constant 0 : index
    %c0_12 = arith.constant 0 : index
    %15 = vector.load %arg6[%c0_11, %c0_12] : memref<2048x128xbf16, #tpu.memory_space<vmem>>, vector<2048x128xbf16>
    %cst_13 = arith.constant dense<0.000000e+00> : vector<8x128xf32>
    %16 = tpu.matmul %14, %15, %cst_13 {dimension_numbers = #tpu.dot_dimension_numbers<[1], [0], [0], [1], [0, 0, 1, 1], [], []>} : vector<8x2048xbf16>, vector<2048x128xbf16>, vector<8x128xf32> -> vector<8x128xf32>
    %c0_14 = arith.constant 0 : index
    %c0_15 = arith.constant 0 : index
    %17 = vector.load %arg7[%c0_14, %c0_15] : memref<1x128xf32, #tpu.memory_space<vmem>>, vector<1x128xf32>
    %18 = vector.broadcast %17 : vector<1x128xf32> to vector<8x128xf32>
    %19 = arith.addf %16, %18 : vector<8x128xf32>
    %c0_16 = arith.constant 0 : index
    %c0_17 = arith.constant 0 : index
    %20 = vector.load %arg8[%c0_16, %c0_17] : memref<8x128xf32, #tpu.memory_space<vmem>>, vector<8x128xf32>
    tpu.vector_store %arg8[%c0_16, %c0_17], %19 {strides = array<i32>} : memref<8x128xf32, #tpu.memory_space<vmem>>, vector<8x128xf32>,
    return
  }
  func.func @transform_0(%arg0: i32) -> (i32, i32) {
    %c0_i32 = arith.constant 0 : i32
    %c0_i32_0 = arith.constant 0 : i32
    return %arg0, %c0_i32 : i32, i32
  }
  func.func @transform_1(%arg0: i32) -> (i32, i32) {
    %c0_i32 = arith.constant 0 : i32
    %c0_i32_0 = arith.constant 0 : i32
    %c0_i32_1 = arith.constant 0 : i32
    return %c0_i32, %c0_i32_0 : i32, i32
  }
  func.func @transform_2(%arg0: i32) -> (i32, i32) {
    %c0_i32 = arith.constant 0 : i32
    %c0_i32_0 = arith.constant 0 : i32
    %c0_i32_1 = arith.constant 0 : i32
    return %c0_i32, %c0_i32_0 : i32, i32
  }
  func.func @transform_3(%arg0: i32) -> (i32, i32) {
    %c0_i32 = arith.constant 0 : i32
    %c0_i32_0 = arith.constant 0 : i32
    %c0_i32_1 = arith.constant 0 : i32
    return %c0_i32, %c0_i32_0 : i32, i32
  }
  func.func @transform_4(%arg0: i32) -> (i32, i32) {
    %c0_i32 = arith.constant 0 : i32
    %c0_i32_0 = arith.constant 0 : i32
    %c0_i32_1 = arith.constant 0 : i32
    return %c0_i32, %c0_i32_0 : i32, i32
  }
  func.func @transform_5(%arg0: i32) -> (i32, i32) {
    %c0_i32 = arith.constant 0 : i32
    %c0_i32_0 = arith.constant 0 : i32
    %c0_i32_1 = arith.constant 0 : i32
    return %c0_i32, %c0_i32_0 : i32, i32
  }
  func.func @transform_6(%arg0: i32) -> (i32, i32) {
    %c0_i32 = arith.constant 0 : i32
    %c0_i32_0 = arith.constant 0 : i32
    %c0_i32_1 = arith.constant 0 : i32
    return %c0_i32, %c0_i32_0 : i32, i32
  }
  func.func @transform_7(%arg0: i32) -> (i32, i32) {
    %c0_i32 = arith.constant 0 : i32
    %c0_i32_0 = arith.constant 0 : i32
    return %arg0, %c0_i32 : i32, i32
  }
}

</mosaic_0001>

<bundles_post_ra>
// kernel: tpu_custom_call.1
= control target key start
LH: loop header
LB: loop body
LE: loop exit
PB: predicated region body
PF: predicated region fallthrough
CT: control target
= control target key end

     0   :  { %12 = vsyncpa [#allocation3], 0  ;;  %s7396_s0 = inlined_call_operand.hbm [shape: bf16[8,1024], index: 0, kind: input, shape index: {}]   ;;  %s7397_s1 = inlined_call_operand.hbm [shape: bf16[1024,256], index: 1, kind: input, shape index: {}]   ;;  %s7398_s2 = inlined_call_operand.hbm [shape: f32[1,256], index: 2, kind: input, shape index: {}]   ;;  %s7399_s3 = inlined_call_operand.hbm [shape: bf16[256,2048], index: 3, kind: input, shape index: {}]   ;;  %s7400_s4 = inlined_call_operand.hbm [shape: f32[1,2048], index: 4, kind: input, shape index: {}]   ;;  %s7401_s5 = inlined_call_operand.hbm [shape: bf16[2048,128], index: 5, kind: input, shape index: {}]   ;;  %s7402_s6 = inlined_call_operand.vmem [shape: f32[1,128], index: 6, kind: input, shape index: {}]   ;;  %s7403_s7 = inlined_call_operand.hbm [shape: f32[8,128], index: 7, kind: output, shape index: {}]  }
   0x1   :  { %13 = vsyncpa [#allocation6], 0 }
   0x2   :  { %14 = vsyncpa [#allocation9], 0 }
   0x3   :  { %15 = vsyncpa [#allocation12], 0  ;;  %s32_s26 = sshll.u32 %s7397_s1, 4  ;;  %s33_s26 = int_to_ptr.hbm [resolvable:$true] %s32_s26 }
   0x4   :  { %16 = vsyncpa [#allocation4], 0  ;;  %s7145_s27 = smov [#allocation5]   ;;  %s56_s8 = sshll.u32 %s7399_s3, 4  ;;  %s57_s8 = int_to_ptr.hbm [resolvable:$true] %s56_s8 }
   0x5   :  { %s34_s28 = sshll.u32 %s7145_s27, 4  ;;  %s7146_s9 = smov 128   ;;  %s35_s28 = int_to_ptr.vmem [resolvable:$true] %s34_s28 }
   0x6   :  { %s7147_s10 = smov 8   ;;  %s7148_s11 = smov [#allocation8]  }
   0x7   :  { %40 = dma.hbm_to_vmem [thread:$0]  %s33_s26, 16384, %s35_s28, [#allocation6], %s7146_s9, %s7146_s9, %s7147_s10  }
   0x8   :  { %s58_s12 = sshll.u32 %s7148_s11, 4  ;;  %s7149_s13 = smov 1024   ;;  %s59_s12 = int_to_ptr.vmem [resolvable:$true] %s58_s12 }
   0x9   :  { %s7150_s14 = smov 64   ;;  %s22_s16 = sshll.u32 %s7396_s0, 4  ;;  %s23_s16 = int_to_ptr.hbm [resolvable:$true] %s22_s16 }
   0xa   :  { %64 = dma.hbm_to_vmem [thread:$0]  %s57_s8, 32768, %s59_s12, [#allocation9], %s7149_s13, %s7149_s13, %s7150_s14  }
   0xb   :  { %s7151_s17 = smov [#allocation2]   ;;  %s46_s20 = sshll.u32 %s7398_s2, 4  ;;  %s47_s20 = int_to_ptr.hbm [resolvable:$true] %s46_s20 }
   0xc   :  { %s24_s18 = sshll.u32 %s7151_s17, 4  ;;  %s7152_s21 = smov [#allocation7]   ;;  %s25_s18 = int_to_ptr.vmem [resolvable:$true] %s24_s18 }
   0xd   :  { %27 = dma.hbm_to_vmem [thread:$0]  %s23_s16, 512, %s25_s18, [#allocation3]  }
   0xe   :  { %s48_s22 = sshll.u32 %s7152_s21, 4  ;;  %s70_s25 = sshll.u32 %s7400_s4, 4  ;;  %s49_s22 = int_to_ptr.vmem [resolvable:$true] %s48_s22  ;;  %s71_s25 = int_to_ptr.hbm [resolvable:$true] %s70_s25 }
   0xf   :  { %51 = dma.hbm_to_vmem [thread:$0]  %s47_s20, 32, %s49_s22, [#allocation6]  }
  0x10   :  { %s80_s27 = sshll.u32 %s7401_s5, 4  ;;  %s7153_s28 = smov [#allocation10]   ;;  %s81_s27 = int_to_ptr.hbm [resolvable:$true] %s80_s27 }
  0x11   :  { %s72_s29 = sshll.u32 %s7153_s28, 4  ;;  %s7154_s2 = smov [#allocation11]   ;;  %s73_s29 = int_to_ptr.vmem [resolvable:$true] %s72_s29 }
  0x12   :  { %75 = dma.hbm_to_vmem [thread:$0]  %s71_s25, 256, %s73_s29, [#allocation9]  }
  0x13   :  { %s82_s30 = sshll.u32 %s7154_s2, 4  ;;  %s7155_s8 = smov 4   ;;  %s83_s30 = int_to_ptr.vmem [resolvable:$true] %s82_s30 }
  0x14   :  { %88 = dma.hbm_to_vmem [thread:$0]  %s81_s27, 16384, %s83_s30, [#allocation12], %s7150_s14, %s7150_s14, %s7155_s8  }
  0x15   :  { %7135 = dma.done.wait [#allocation3], 512  }
  0x16   :  { %7136 = vsyncadd [#allocation3], 4294966784 }
  0x17   :  { %7137 = dma.done.wait [#allocation6], 16416  }
  0x18   :  { %7138 = vsyncadd [#allocation6], 4294950880 }
  0x19   :  { %7139 = dma.done.wait [#allocation9], 33024  }
  0x1a   :  { %7140 = vsyncadd [#allocation9], 4294934272 }
  0x1b   :  { %7141 = dma.done.wait [#allocation12], 16384  }
  0x1c   :  { %7142 = vsyncadd [#allocation12], 4294950912  ;;  %v4452_v0 = vld [vmem:[#allocation5 + $0x70] sm:$0xf]  ;;  %v6457_v1 = vld [vmem:[#allocation5 + $0x74] sm:$0xf0] }
  0x1d   :  { %v4516_v2 = vld [vmem:[#allocation5 + $0xf0] sm:$0xf]  ;;  %v4453_v3 = vor.u32 %v6457_v1, %v4452_v0  ;;  %v6473_v4 = vld [vmem:[#allocation5 + $0xf4] sm:$0xf0]  ;;  %v4444_v11 = vld [vmem:[#allocation5 + $0x60] sm:$0xf] }
  0x1e   :  { %v4580_v5 = vld [vmem:[#allocation5 + $0x170] sm:$0xf]  ;;  %v6489_v6 = vld [vmem:[#allocation5 + $0x174] sm:$0xf0]  ;;  %v4517_v7 = vor.u32 %v6473_v4, %v4516_v2  ;;  %v6455_v13 = vld [vmem:[#allocation5 + $0x64] sm:$0xf0] }
  0x1f   :  { %v4581_v8 = vor.u32 %v6489_v6, %v4580_v5  ;;  %v4644_v9 = vld [vmem:[#allocation5 + $0x1f0] sm:$0xf]  ;;  %v6505_v10 = vld [vmem:[#allocation5 + $0x1f4] sm:$0xf0]  ;;  %921 = vmatpush.bf16.msra.mxu0 %v4453_v3  ;;  %v4508_v14 = vld [vmem:[#allocation5 + $0xe0] sm:$0xf]  ;;  %v4445_v16 = vor.u32 %v6455_v13, %v4444_v11 }
  0x20   :  { %v4645_v12 = vor.u32 %v6505_v10, %v4644_v9  ;;  %v6471_v15 = vld [vmem:[#allocation5 + $0xe4] sm:$0xf0]  ;;  %934 = vmatpush.bf16.msra.mxu1 %v4517_v7  ;;  %v4572_v18 = vld [vmem:[#allocation5 + $0x160] sm:$0xf]  ;;  %v4436_v23 = vld [vmem:[#allocation5 + $0x50] sm:$0xf] }
  0x21   :  { %947 = vmatpush.bf16.msra.mxu2 %v4581_v8  ;;  %v4509_v17 = vor.u32 %v6471_v15, %v4508_v14  ;;  %v6487_v19 = vld [vmem:[#allocation5 + $0x164] sm:$0xf0]  ;;  %v4636_v20 = vld [vmem:[#allocation5 + $0x1e0] sm:$0xf]  ;;  %v6453_v24 = vld [vmem:[#allocation5 + $0x54] sm:$0xf0] }
  0x22   :  { %960 = vmatpush.bf16.msra.mxu3 %v4645_v12  ;;  %v4573_v21 = vor.u32 %v6487_v19, %v4572_v18  ;;  %v6503_v22 = vld [vmem:[#allocation5 + $0x1e4] sm:$0xf0]  ;;  %v4500_v26 = vld [vmem:[#allocation5 + $0xd0] sm:$0xf]  ;;  %v6469_v27 = vld [vmem:[#allocation5 + $0xd4] sm:$0xf0]  ;;  %v4437_v29 = vor.u32 %v6453_v24, %v4436_v23 }
  0x23   :  { %v4637_v25 = vor.u32 %v6503_v22, %v4636_v20  ;;  %v4564_v28 = vld [vmem:[#allocation5 + $0x150] sm:$0xf]  ;;  %922 = vmatpush.bf16.msra.mxu0 %v4445_v16  ;;  %v6485_v30 = vld [vmem:[#allocation5 + $0x154] sm:$0xf0]  ;;  %v4501_v33 = vor.u32 %v6469_v27, %v4500_v26  ;;  %v4428_v35 = vld [vmem:[#allocation5 + $0x40] sm:$0xf] }
  0x24   :  { %v4628_v31 = vld [vmem:[#allocation5 + $0x1d0] sm:$0xf]  ;;  %v6501_v32 = vld [vmem:[#allocation5 + $0x1d4] sm:$0xf0]  ;;  %935 = vmatpush.bf16.msra.mxu1 %v4509_v17  ;;  %v4565_v34 = vor.u32 %v6485_v30, %v4564_v28  ;;  %v6451_v36 = vld [vmem:[#allocation5 + $0x44] sm:$0xf0] }
  0x25   :  { %948 = vmatpush.bf16.msra.mxu2 %v4573_v21  ;;  %v4492_v37 = vld [vmem:[#allocation5 + $0xc0] sm:$0xf]  ;;  %v4629_v38 = vor.u32 %v6501_v32, %v4628_v31  ;;  %v6467_v39 = vld [vmem:[#allocation5 + $0xc4] sm:$0xf0]  ;;  %v4429_v44 = vor.u32 %v6451_v36, %v4428_v35  ;;  %v4420_v47 = vld [vmem:[#allocation5 + $0x30] sm:$0xf] }
  0x26   :  { %961 = vmatpush.bf16.msra.mxu3 %v4637_v25  ;;  %v4556_v40 = vld [vmem:[#allocation5 + $0x140] sm:$0xf]  ;;  %v6483_v41 = vld [vmem:[#allocation5 + $0x144] sm:$0xf0]  ;;  %v4493_v45 = vor.u32 %v6467_v39, %v4492_v37  ;;  %v6449_v48 = vld [vmem:[#allocation5 + $0x34] sm:$0xf0] }
  0x27   :  { %v4620_v42 = vld [vmem:[#allocation5 + $0x1c0] sm:$0xf]  ;;  %v6499_v43 = vld [vmem:[#allocation5 + $0x1c4] sm:$0xf0]  ;;  %923 = vmatpush.bf16.msra.mxu0 %v4437_v29  ;;  %v4557_v46 = vor.u32 %v6483_v41, %v4556_v40  ;;  %v4484_v49 = vld [vmem:[#allocation5 + $0xb0] sm:$0xf]  ;;  %v4421_v56 = vor.u32 %v6449_v48, %v4420_v47 }
  0x28   :  { %936 = vmatpush.bf16.msra.mxu1 %v4501_v33  ;;  %v4621_v50 = vor.u32 %v6499_v43, %v4620_v42  ;;  %v6465_v51 = vld [vmem:[#allocation5 + $0xb4] sm:$0xf0]  ;;  %v4548_v52 = vld [vmem:[#allocation5 + $0x130] sm:$0xf]  ;;  %v4412_v59 = vld [vmem:[#allocation5 + $0x20] sm:$0xf] }
  0x29   :  { %949 = vmatpush.bf16.msra.mxu2 %v4565_v34  ;;  %v6481_v53 = vld [vmem:[#allocation5 + $0x134] sm:$0xf0]  ;;  %v4612_v54 = vld [vmem:[#allocation5 + $0x1b0] sm:$0xf]  ;;  %v4485_v57 = vor.u32 %v6465_v51, %v4484_v49  ;;  %v6447_v60 = vld [vmem:[#allocation5 + $0x24] sm:$0xf0] }
  0x2a   :  { %962 = vmatpush.bf16.msra.mxu3 %v4629_v38  ;;  %v6497_v55 = vld [vmem:[#allocation5 + $0x1b4] sm:$0xf0]  ;;  %v4549_v58 = vor.u32 %v6481_v53, %v4548_v52  ;;  %v4476_v61 = vld [vmem:[#allocation5 + $0xa0] sm:$0xf]  ;;  %v6463_v63 = vld [vmem:[#allocation5 + $0xa4] sm:$0xf0]  ;;  %v4413_v4 = vor.u32 %v6447_v60, %v4412_v59 }
  0x2b   :  { %924 = vmatpush.bf16.msra.mxu0 %v4429_v44  ;;  %v4613_v62 = vor.u32 %v6497_v55, %v4612_v54  ;;  %v4540_v0 = vld [vmem:[#allocation5 + $0x120] sm:$0xf]  ;;  %v6479_v1 = vld [vmem:[#allocation5 + $0x124] sm:$0xf0]  ;;  %v4477_v5 = vor.u32 %v6463_v63, %v4476_v61  ;;  %v4404_v7 = vld [vmem:[#allocation5 + $0x10] sm:$0xf] }
  0x2c   :  { %937 = vmatpush.bf16.msra.mxu1 %v4493_v45  ;;  %v4604_v2 = vld [vmem:[#allocation5 + $0x1a0] sm:$0xf]  ;;  %v6495_v3 = vld [vmem:[#allocation5 + $0x1a4] sm:$0xf0]  ;;  %v4541_v6 = vor.u32 %v6479_v1, %v4540_v0  ;;  %v6445_v8 = vld [vmem:[#allocation5 + $0x14] sm:$0xf0] }
  0x2d   :  { %950 = vmatpush.bf16.msra.mxu2 %v4557_v46  ;;  %v4468_v9 = vld [vmem:[#allocation5 + $0x90] sm:$0xf]  ;;  %v4605_v10 = vor.u32 %v6495_v3, %v4604_v2  ;;  %v6461_v11 = vld [vmem:[#allocation5 + $0x94] sm:$0xf0]  ;;  %v4405_v16 = vor.u32 %v6445_v8, %v4404_v7  ;;  %v4396_v17 = vld [vmem:[#allocation5] sm:$0xf] }
  0x2e   :  { %963 = vmatpush.bf16.msra.mxu3 %v4621_v50  ;;  %v4532_v12 = vld [vmem:[#allocation5 + $0x110] sm:$0xf]  ;;  %v6477_v13 = vld [vmem:[#allocation5 + $0x114] sm:$0xf0]  ;;  %v6443_v18 = vld [vmem:[#allocation5 + $0x4] sm:$0xf0]  ;;  %v4469_v19 = vor.u32 %v6461_v11, %v4468_v9 }
  0x2f   :  { %925 = vmatpush.bf16.msra.mxu0 %v4421_v56  ;;  %v4596_v14 = vld [vmem:[#allocation5 + $0x190] sm:$0xf]  ;;  %v6493_v15 = vld [vmem:[#allocation5 + $0x194] sm:$0xf0]  ;;  %v4533_v20 = vor.u32 %v6477_v13, %v4532_v12  ;;  %v4460_v21 = vld [vmem:[#allocation5 + $0x80] sm:$0xf]  ;;  %v4397_v31 = vor.u32 %v6443_v18, %v4396_v17 }
  0x30   :  { %938 = vmatpush.bf16.msra.mxu1 %v4485_v57  ;;  %v6459_v22 = vld [vmem:[#allocation5 + $0x84] sm:$0xf0]  ;;  %v4524_v23 = vld [vmem:[#allocation5 + $0x100] sm:$0xf]  ;;  %v4597_v24 = vor.u32 %v6493_v15, %v4596_v14  ;;  %v4708_v28 = vld [vmem:[#allocation5 + $0x270] sm:$0xf] }
  0x31   :  { %951 = vmatpush.bf16.msra.mxu2 %v4549_v58  ;;  %v6475_v25 = vld [vmem:[#allocation5 + $0x104] sm:$0xf0]  ;;  %v4588_v26 = vld [vmem:[#allocation5 + $0x180] sm:$0xf]  ;;  %v6521_v29 = vld [vmem:[#allocation5 + $0x274] sm:$0xf0]  ;;  %v4461_v35 = vor.u32 %v6459_v22, %v4460_v21 }
  0x32   :  { %964 = vmatpush.bf16.msra.mxu3 %v4613_v62  ;;  %v6491_v27 = vld [vmem:[#allocation5 + $0x184] sm:$0xf0]  ;;  %v4772_v30 = vld [vmem:[#allocation5 + $0x2f0] sm:$0xf]  ;;  %v6537_v32 = vld [vmem:[#allocation5 + $0x2f4] sm:$0xf0]  ;;  %v4525_v36 = vor.u32 %v6475_v25, %v4524_v23  ;;  %v4709_v40 = vor.u32 %v6521_v29, %v4708_v28 }
  0x33   :  { %926 = vmatpush.bf16.msra.mxu0 %v4413_v4  ;;  %v4836_v33 = vld [vmem:[#allocation5 + $0x370] sm:$0xf]  ;;  %v6553_v34 = vld [vmem:[#allocation5 + $0x374] sm:$0xf0]  ;;  %v4589_v39 = vor.u32 %v6491_v27, %v4588_v26  ;;  %v4773_v41 = vor.u32 %v6537_v32, %v4772_v30  ;;  %v4700_v43 = vld [vmem:[#allocation5 + $0x260] sm:$0xf] }
  0x34   :  { %939 = vmatpush.bf16.msra.mxu1 %v4477_v5  ;;  %v4900_v37 = vld [vmem:[#allocation5 + $0x3f0] sm:$0xf]  ;;  %v6569_v38 = vld [vmem:[#allocation5 + $0x3f4] sm:$0xf0]  ;;  %v4837_v42 = vor.u32 %v6553_v34, %v4836_v33  ;;  %v6519_v44 = vld [vmem:[#allocation5 + $0x264] sm:$0xf0] }
  0x35   :  { %952 = vmatpush.bf16.msra.mxu2 %v4541_v6  ;;  %v4764_v45 = vld [vmem:[#allocation5 + $0x2e0] sm:$0xf]  ;;  %v4901_v46 = vor.u32 %v6569_v38, %v4900_v37  ;;  %v6535_v47 = vld [vmem:[#allocation5 + $0x2e4] sm:$0xf0]  ;;  %v4701_v53 = vor.u32 %v6519_v44, %v4700_v43  ;;  %v4692_v54 = vld [vmem:[#allocation5 + $0x250] sm:$0xf] }
  0x36   :  { %965 = vmatpush.bf16.msra.mxu3 %v4605_v10  ;;  %v4828_v48 = vld [vmem:[#allocation5 + $0x360] sm:$0xf]  ;;  %v6551_v49 = vld [vmem:[#allocation5 + $0x364] sm:$0xf0]  ;;  %v4765_v57 = vor.u32 %v6535_v47, %v4764_v45  ;;  %v6517_v59 = vld [vmem:[#allocation5 + $0x254] sm:$0xf0] }
  0x37   :  { %927 = vmatpush.bf16.msra.mxu0 %v4405_v16  ;;  %v4892_v50 = vld [vmem:[#allocation5 + $0x3e0] sm:$0xf]  ;;  %v6567_v51 = vld [vmem:[#allocation5 + $0x3e4] sm:$0xf0]  ;;  %v4829_v58 = vor.u32 %v6551_v49, %v4828_v48  ;;  %v4756_v60 = vld [vmem:[#allocation5 + $0x2d0] sm:$0xf]  ;;  %v4693_v8 = vor.u32 %v6517_v59, %v4692_v54 }
  0x38   :  { %940 = vmatpush.bf16.msra.mxu1 %v4469_v19  ;;  %v116_v52 = vld [vmem:[#allocation2 + $0x8] sm:$0xff]  ;;  %v6533_v61 = vld [vmem:[#allocation5 + $0x2d4] sm:$0xf0]  ;;  %v4893_v62 = vor.u32 %v6567_v51, %v4892_v50  ;;  %v4820_v63 = vld [vmem:[#allocation5 + $0x350] sm:$0xf]  ;;  %s4381_s12 = sshll.u32 %s7403_s7, 4  ;;  %s4382_s12 = int_to_ptr.hbm [resolvable:$true] %s4381_s12 }
  0x39   :  { %953 = vmatpush.bf16.msra.mxu2 %v4533_v20  ;;  %v259_v55 = vunpack.c.l.b16 %v116_v52  ;;  %v260_v56 = vunpack.c.h.b16 %v116_v52  ;;  %v6549_v0 = vld [vmem:[#allocation5 + $0x354] sm:$0xf0]  ;;  %v115_v2 = vld [vmem:[#allocation2] sm:$0xff]  ;;  %v4884_v3 = vld [vmem:[#allocation5 + $0x3d0] sm:$0xf]  ;;  %v4757_v9 = vor.u32 %v6533_v61, %v4756_v60 }
  0x3a   :  { %966 = vmatpush.bf16.msra.mxu3 %v4597_v24  ;;  %v6565_v4 = vld [vmem:[#allocation5 + $0x3d4] sm:$0xf0]  ;;  %v257_v5 = vunpack.c.l.b16 %v115_v2  ;;  %v258_v7 = vunpack.c.h.b16 %v115_v2  ;;  %v4821_v10 = vor.u32 %v6549_v0, %v4820_v63  ;;  %v4684_v11 = vld [vmem:[#allocation5 + $0x240] sm:$0xf]  ;;  %v6515_v12 = vld [vmem:[#allocation5 + $0x244] sm:$0xf0] }
  0x3b   :  { %928 = vmatpush.bf16.msra.mxu0 %v4397_v31  ;;  %v7215_v1 = vpack.c.b16 %v259_v55, %v259_v55  ;;  %v7217_v6 = vpack.c.b16 %v260_v56, %v260_v56  ;;  %v4748_v13 = vld [vmem:[#allocation5 + $0x2c0] sm:$0xf]  ;;  %v4885_v16 = vor.u32 %v6565_v4, %v4884_v3  ;;  %v6531_v17 = vld [vmem:[#allocation5 + $0x2c4] sm:$0xf0]  ;;  %v4685_v22 = vor.u32 %v6515_v12, %v4684_v11  ;;  %v4676_v25 = vld [vmem:[#allocation5 + $0x230] sm:$0xf] }
  0x3c   :  { %941 = vmatpush.bf16.msra.mxu1 %v4461_v35  ;;  %v7220_v14 = vpack.c.b16 %v257_v5, %v257_v5  ;;  %v7222_v15 = vpack.c.b16 %v258_v7, %v258_v7  ;;  %v4812_v18 = vld [vmem:[#allocation5 + $0x340] sm:$0xf]  ;;  %v6547_v19 = vld [vmem:[#allocation5 + $0x344] sm:$0xf0]  ;;  %v4749_v23 = vor.u32 %v6531_v17, %v4748_v13  ;;  %v6513_v26 = vld [vmem:[#allocation5 + $0x234] sm:$0xf0] }
  0x3d   :  { %954 = vmatpush.bf16.msra.mxu2 %v4525_v36  ;;  %v4876_v20 = vld [vmem:[#allocation5 + $0x3c0] sm:$0xf]  ;;  %v6563_v21 = vld [vmem:[#allocation5 + $0x3c4] sm:$0xf0]  ;;  %v4813_v24 = vor.u32 %v6547_v19, %v4812_v18  ;;  %v4740_v27 = vld [vmem:[#allocation5 + $0x2b0] sm:$0xf]  ;;  %v4677_v34 = vor.u32 %v6513_v26, %v4676_v25 }
  0x3e   :  { %967 = vmatpush.bf16.msra.mxu3 %v4589_v39  ;;  %929 = vmatmul.bf16.vlgmr.msra.gmra.mxu0 %v7220_v14  ;;  %v4877_v28 = vor.u32 %v6563_v21, %v4876_v20  ;;  %v6529_v29 = vld [vmem:[#allocation5 + $0x2b4] sm:$0xf0]  ;;  %v4804_v30 = vld [vmem:[#allocation5 + $0x330] sm:$0xf]  ;;  %v4668_v37 = vld [vmem:[#allocation5 + $0x220] sm:$0xf] }
  0x3f   :  { %973 = vmatpush.bf16.msrb.mxu0 %v4709_v40  ;;  %942 = vmatmul.bf16.vlgmr.msra.gmra.mxu1 %v7222_v15  ;;  %v6545_v31 = vld [vmem:[#allocation5 + $0x334] sm:$0xf0]  ;;  %v4868_v32 = vld [vmem:[#allocation5 + $0x3b0] sm:$0xf]  ;;  %v4741_v35 = vor.u32 %v6529_v29, %v4740_v27  ;;  %v6511_v38 = vld [vmem:[#allocation5 + $0x224] sm:$0xf0] }
  0x40   :  { %986 = vmatpush.bf16.msrb.mxu1 %v4773_v41  ;;  %955 = vmatmul.bf16.vlgmr.msra.gmra.mxu2 %v7215_v1  ;;  %v6561_v33 = vld [vmem:[#allocation5 + $0x3b4] sm:$0xf0]  ;;  %v4805_v36 = vor.u32 %v6545_v31, %v4804_v30  ;;  %v4732_v39 = vld [vmem:[#allocation5 + $0x2a0] sm:$0xf]  ;;  %v6527_v41 = vld [vmem:[#allocation5 + $0x2a4] sm:$0xf0] }
  0x41   :  { %999 = vmatpush.bf16.msrb.mxu2 %v4837_v42  ;;  %968 = vmatmul.bf16.vlgmr.msra.gmra.mxu3 %v7217_v6  ;;  %v4869_v40 = vor.u32 %v6561_v33, %v4868_v32  ;;  %v4796_v42 = vld [vmem:[#allocation5 + $0x320] sm:$0xf]  ;;  %v6543_v43 = vld [vmem:[#allocation5 + $0x324] sm:$0xf0]  ;;  %v4733_v47 = vor.u32 %v6527_v41, %v4732_v39  ;;  %v4660_v49 = vld [vmem:[#allocation5 + $0x210] sm:$0xf] }
  0x42   :  { %1012 = vmatpush.bf16.msrb.mxu3 %v4901_v46  ;;  %v4860_v44 = vld [vmem:[#allocation5 + $0x3a0] sm:$0xf]  ;;  %v6559_v45 = vld [vmem:[#allocation5 + $0x3a4] sm:$0xf0]  ;;  %v4669_v46 = vor.u32 %v6511_v38, %v4668_v37  ;;  %v4797_v48 = vor.u32 %v6543_v43, %v4796_v42  ;;  %v6509_v50 = vld [vmem:[#allocation5 + $0x214] sm:$0xf0] }
  0x43   :  { %974 = vmatpush.bf16.msrb.mxu0 %v4701_v53  ;;  %v4724_v51 = vld [vmem:[#allocation5 + $0x290] sm:$0xf]  ;;  %v4861_v52 = vor.u32 %v6559_v45, %v4860_v44  ;;  %v6525_v53 = vld [vmem:[#allocation5 + $0x294] sm:$0xf0]  ;;  %v4661_v59 = vor.u32 %v6509_v50, %v4660_v49  ;;  %v6507_v60 = vld [vmem:[#allocation5 + $0x204] sm:$0xf0] }
  0x44   :  { %987 = vmatpush.bf16.msrb.mxu1 %v4765_v57  ;;  %v4788_v54 = vld [vmem:[#allocation5 + $0x310] sm:$0xf]  ;;  %v6541_v55 = vld [vmem:[#allocation5 + $0x314] sm:$0xf0]  ;;  %v4716_v61 = vld [vmem:[#allocation5 + $0x280] sm:$0xf]  ;;  %v4725_v63 = vor.u32 %v6525_v53, %v4724_v51 }
  0x45   :  { %1000 = vmatpush.bf16.msrb.mxu2 %v4829_v58  ;;  %v4852_v56 = vld [vmem:[#allocation5 + $0x390] sm:$0xf]  ;;  %v6557_v57 = vld [vmem:[#allocation5 + $0x394] sm:$0xf0]  ;;  %v4652_v58 = vld [vmem:[#allocation5 + $0x200] sm:$0xf]  ;;  %v4789_v0 = vor.u32 %v6541_v55, %v4788_v54 }
  0x46   :  { %1013 = vmatpush.bf16.msrb.mxu3 %v4893_v62  ;;  %v6523_v62 = vld [vmem:[#allocation5 + $0x284] sm:$0xf0]  ;;  %v4780_v2 = vld [vmem:[#allocation5 + $0x300] sm:$0xf]  ;;  %v118_v4 = vld [vmem:[#allocation2 + $0x18] sm:$0xff]  ;;  %v4853_v5 = vor.u32 %v6557_v57, %v4852_v56  ;;  %v4653_v13 = vor.u32 %v6507_v60, %v4652_v58 }
  0x47   :  { %975 = vmatpush.bf16.msrb.mxu0 %v4693_v8  ;;  %v6539_v3 = vld [vmem:[#allocation5 + $0x304] sm:$0xf0]  ;;  %v4844_v7 = vld [vmem:[#allocation5 + $0x380] sm:$0xf]  ;;  %v4454_v11 = vld [vmem:[#allocation5 + $0x78] sm:$0xf0]  ;;  %v263_v19 = vunpack.c.l.b16 %v118_v4  ;;  %v4717_v20 = vor.u32 %v6523_v62, %v4716_v61  ;;  %v264_v25 = vunpack.c.h.b16 %v118_v4 }
  0x48   :  { %988 = vmatpush.bf16.msrb.mxu1 %v4757_v9  ;;  %v6555_v8 = vld [vmem:[#allocation5 + $0x384] sm:$0xf0]  ;;  %v117_v9 = vld [vmem:[#allocation2 + $0x10] sm:$0xff]  ;;  %v4582_v18 = vld [vmem:[#allocation5 + $0x178] sm:$0xf0]  ;;  %v4781_v21 = vor.u32 %v6539_v3, %v4780_v2 }
  0x49   :  { %1001 = vmatpush.bf16.msrb.mxu2 %v4821_v10  ;;  %v6456_v10 = vld [vmem:[#allocation5 + $0x74] sm:$0xf]  ;;  %v4845_v26 = vor.u32 %v6555_v8, %v4844_v7  ;;  %v6454_v31 = vld [vmem:[#allocation5 + $0x64] sm:$0xf]  ;;  %v4446_v32 = vld [vmem:[#allocation5 + $0x68] sm:$0xf0] }
  0x4a   :  { %1014 = vmatpush.bf16.msrb.mxu3 %v4885_v16  ;;  %v6472_v12 = vld [vmem:[#allocation5 + $0xf4] sm:$0xf]  ;;  %v4518_v16 = vld [vmem:[#allocation5 + $0xf8] sm:$0xf0]  ;;  %v4457_v27 = vor.u32 %v6456_v10, %v4454_v11  ;;  %v6470_v33 = vld [vmem:[#allocation5 + $0xe4] sm:$0xf]  ;;  %v4449_v43 = vor.u32 %v6454_v31, %v4446_v32 }
  0x4b   :  { %976 = vmatpush.bf16.msrb.mxu0 %v4685_v22  ;;  %v6488_v17 = vld [vmem:[#allocation5 + $0x174] sm:$0xf]  ;;  %v4521_v29 = vor.u32 %v6472_v12, %v4518_v16  ;;  %v6486_v37 = vld [vmem:[#allocation5 + $0x164] sm:$0xf]  ;;  %v4574_v38 = vld [vmem:[#allocation5 + $0x168] sm:$0xf0] }
  0x4c   :  { %989 = vmatpush.bf16.msrb.mxu1 %v4749_v23  ;;  %v6504_v22 = vld [vmem:[#allocation5 + $0x1f4] sm:$0xf]  ;;  %v4646_v23 = vld [vmem:[#allocation5 + $0x1f8] sm:$0xf0]  ;;  %v4585_v30 = vor.u32 %v6488_v17, %v4582_v18  ;;  %v6502_v41 = vld [vmem:[#allocation5 + $0x1e4] sm:$0xf] }
  0x4d   :  { %1002 = vmatpush.bf16.msrb.mxu2 %v4813_v24  ;;  %v261_v24 = vunpack.c.l.b16 %v117_v9  ;;  %v4638_v42 = vld [vmem:[#allocation5 + $0x1e8] sm:$0xf0]  ;;  %v6468_v49 = vld [vmem:[#allocation5 + $0xd4] sm:$0xf]  ;;  %v4502_v51 = vld [vmem:[#allocation5 + $0xd8] sm:$0xf0] }
  0x4e   :  { %1015 = vmatpush.bf16.msrb.mxu3 %v4877_v28  ;;  %v262_v28 = vunpack.c.h.b16 %v117_v9  ;;  %v4641_v50 = vor.u32 %v6502_v41, %v4638_v42  ;;  %v4566_v53 = vld [vmem:[#allocation5 + $0x158] sm:$0xf0]  ;;  %v6500_v54 = vld [vmem:[#allocation5 + $0x1d4] sm:$0xf]  ;;  %v4505_v57 = vor.u32 %v6468_v49, %v4502_v51  ;;  %v4430_v60 = vld [vmem:[#allocation5 + $0x48] sm:$0xf0] }
  0x4f   :  { %977 = vmatpush.bf16.msrb.mxu0 %v4677_v34  ;;  %v4649_v34 = vor.u32 %v6504_v22, %v4646_v23  ;;  %v7229_v39 = vpack.c.b16 %v261_v24, %v261_v24  ;;  %v4630_v55 = vld [vmem:[#allocation5 + $0x1d8] sm:$0xf0]  ;;  %v6466_v61 = vld [vmem:[#allocation5 + $0xc4] sm:$0xf]  ;;  %v4558_v2 = vld [vmem:[#allocation5 + $0x148] sm:$0xf0] }
  0x50   :  { %990 = vmatpush.bf16.msrb.mxu1 %v4741_v35  ;;  %v7227_v35 = vpack.c.b16 %v263_v19, %v263_v19  ;;  %v7233_v44 = vpack.c.b16 %v262_v28, %v262_v28  ;;  %v4633_v62 = vor.u32 %v6500_v54, %v4630_v55  ;;  %v6498_v3 = vld [vmem:[#allocation5 + $0x1c4] sm:$0xf]  ;;  %v4622_v4 = vld [vmem:[#allocation5 + $0x1c8] sm:$0xf0]  ;;  %v6448_v9 = vld [vmem:[#allocation5 + $0x34] sm:$0xf] }
  0x51   :  { %1003 = vmatpush.bf16.msrb.mxu2 %v4805_v36  ;;  %v4510_v36 = vld [vmem:[#allocation5 + $0xe8] sm:$0xf0]  ;;  %v4422_v10 = vld [vmem:[#allocation5 + $0x38] sm:$0xf0]  ;;  %v6464_v11 = vld [vmem:[#allocation5 + $0xb4] sm:$0xf]  ;;  %v4625_v12 = vor.u32 %v6498_v3, %v4622_v4 }
  0x52   :  { %1016 = vmatpush.bf16.msrb.mxu3 %v4869_v40  ;;  %v7231_v40 = vpack.c.b16 %v264_v25, %v264_v25  ;;  %v4513_v45 = vor.u32 %v6470_v33, %v4510_v36  ;;  %v6480_v16 = vld [vmem:[#allocation5 + $0x134] sm:$0xf]  ;;  %v4550_v17 = vld [vmem:[#allocation5 + $0x138] sm:$0xf0]  ;;  %v6446_v23 = vld [vmem:[#allocation5 + $0x24] sm:$0xf] }
  0x53   :  { %978 = vmatpush.bf16.msrb.mxu0 %v4669_v46  ;;  %v4577_v46 = vor.u32 %v6486_v37, %v4574_v38  ;;  %v6496_v18 = vld [vmem:[#allocation5 + $0x1b4] sm:$0xf]  ;;  %v4614_v19 = vld [vmem:[#allocation5 + $0x1b8] sm:$0xf0]  ;;  %v4553_v22 = vor.u32 %v6480_v16, %v4550_v17  ;;  %v4414_v24 = vld [vmem:[#allocation5 + $0x28] sm:$0xf0] }
  0x54   :  { %991 = vmatpush.bf16.msrb.mxu1 %v4733_v47  ;;  %v6452_v47 = vld [vmem:[#allocation5 + $0x54] sm:$0xf]  ;;  %v6462_v25 = vld [vmem:[#allocation5 + $0xa4] sm:$0xf]  ;;  %v4606_v31 = vld [vmem:[#allocation5 + $0x1a8] sm:$0xf0]  ;;  %v4417_v32 = vor.u32 %v6446_v23, %v4414_v24 }
  0x55   :  { %1004 = vmatpush.bf16.msrb.mxu2 %v4797_v48  ;;  %v4438_v48 = vld [vmem:[#allocation5 + $0x58] sm:$0xf0]  ;;  %v6478_v28 = vld [vmem:[#allocation5 + $0x124] sm:$0xf]  ;;  %v6444_v36 = vld [vmem:[#allocation5 + $0x14] sm:$0xf] }
  0x56   :  { %1017 = vmatpush.bf16.msrb.mxu3 %v4861_v52  ;;  %v6484_v52 = vld [vmem:[#allocation5 + $0x154] sm:$0xf]  ;;  %v4441_v56 = vor.u32 %v6452_v47, %v4438_v48  ;;  %v4406_v37 = vld [vmem:[#allocation5 + $0x18] sm:$0xf0]  ;;  %v6442_v49 = vld [vmem:[#allocation5 + $0x4] sm:$0xf] }
  0x57   :  { %979 = vmatpush.bf16.msrb.mxu0 %v4661_v59  ;;  %v4569_v58 = vor.u32 %v6484_v52, %v4566_v53  ;;  %v6450_v59 = vld [vmem:[#allocation5 + $0x44] sm:$0xf]  ;;  %v6460_v38 = vld [vmem:[#allocation5 + $0x94] sm:$0xf]  ;;  %v4470_v42 = vld [vmem:[#allocation5 + $0x98] sm:$0xf0]  ;;  %v4409_v48 = vor.u32 %v6444_v36, %v4406_v37 }
  0x58   :  { %992 = vmatpush.bf16.msrb.mxu1 %v4725_v63  ;;  %v4494_v63 = vld [vmem:[#allocation5 + $0xc8] sm:$0xf0]  ;;  %v4598_v47 = vld [vmem:[#allocation5 + $0x198] sm:$0xf0]  ;;  %v4473_v51 = vor.u32 %v6460_v38, %v4470_v42  ;;  %v6458_v53 = vld [vmem:[#allocation5 + $0x84] sm:$0xf] }
  0x59   :  { %1005 = vmatpush.bf16.msrb.mxu2 %v4789_v0  ;;  %v6482_v0 = vld [vmem:[#allocation5 + $0x144] sm:$0xf]  ;;  %v4497_v7 = vor.u32 %v6466_v61, %v4494_v63  ;;  %v4462_v54 = vld [vmem:[#allocation5 + $0x88] sm:$0xf0]  ;;  %v4710_v61 = vld [vmem:[#allocation5 + $0x278] sm:$0xf0] }
  0x5a   :  { %1018 = vmatpush.bf16.msrb.mxu3 %v4853_v5  ;;  %v4433_v5 = vor.u32 %v6450_v59, %v4430_v60  ;;  %v4561_v8 = vor.u32 %v6482_v0, %v4558_v2  ;;  %v6474_v55 = vld [vmem:[#allocation5 + $0x104] sm:$0xf]  ;;  %v4590_v59 = vld [vmem:[#allocation5 + $0x188] sm:$0xf0]  ;;  %v6520_v60 = vld [vmem:[#allocation5 + $0x274] sm:$0xf]  ;;  %v4465_v4 = vor.u32 %v6458_v53, %v4462_v54 }
  0x5b   :  { %980 = vmatpush.bf16.msrb.mxu0 %v4653_v13  ;;  %v4486_v13 = vld [vmem:[#allocation5 + $0xb8] sm:$0xf0]  ;;  %v6552_v2 = vld [vmem:[#allocation5 + $0x374] sm:$0xf]  ;;  %v4702_v16 = vld [vmem:[#allocation5 + $0x268] sm:$0xf0] }
  0x5c   :  { %993 = vmatpush.bf16.msrb.mxu1 %v4717_v20  ;;  %v4425_v20 = vor.u32 %v6448_v9, %v4422_v10  ;;  %v4774_v0 = vld [vmem:[#allocation5 + $0x2f8] sm:$0xf0]  ;;  %v4713_v10 = vor.u32 %v6520_v60, %v4710_v61  ;;  %v6534_v17 = vld [vmem:[#allocation5 + $0x2e4] sm:$0xf]  ;;  %v4894_v23 = vld [vmem:[#allocation5 + $0x3e8] sm:$0xf0] }
  0x5d   :  { %1006 = vmatpush.bf16.msrb.mxu2 %v4781_v21  ;;  %v4489_v21 = vor.u32 %v6464_v11, %v4486_v13  ;;  %v4838_v3 = vld [vmem:[#allocation5 + $0x378] sm:$0xf0]  ;;  %v6518_v13 = vld [vmem:[#allocation5 + $0x264] sm:$0xf]  ;;  %v6528_v53 = vld [vmem:[#allocation5 + $0x2b4] sm:$0xf] }
  0x5e   :  { %1019 = vmatpush.bf16.msrb.mxu3 %v4845_v26  ;;  %981 = vmatmul.bf16.vlgmr.msrb.gmra.mxu0 %v7229_v39  ;;  %v4617_v26 = vor.u32 %v6496_v18, %v4614_v19  ;;  %v4766_v19 = vld [vmem:[#allocation5 + $0x2e8] sm:$0xf0]  ;;  %v4705_v24 = vor.u32 %v6518_v13, %v4702_v16  ;;  %v4886_v36 = vld [vmem:[#allocation5 + $0x3d8] sm:$0xf0]  ;;  %v6514_v42 = vld [vmem:[#allocation5 + $0x244] sm:$0xf] }
  0x5f   :  { %1025 = vmatpush.bf16.msra.mxu0 %v4457_v27  ;;  %994 = vmatmul.bf16.vlgmr.msrb.gmra.mxu1 %v7233_v44  ;;  %v4478_v27 = vld [vmem:[#allocation5 + $0xa8] sm:$0xf0]  ;;  %v6508_v13 = vld [vmem:[#allocation5 + $0x214] sm:$0xf]  ;;  %v4662_v16 = vld [vmem:[#allocation5 + $0x218] sm:$0xf0] }
  0x60   :  { %1038 = vmatpush.bf16.msra.mxu1 %v4521_v29  ;;  %1007 = vmatmul.bf16.vlgmr.msrb.gmra.mxu2 %v7227_v35  ;;  %v4542_v29 = vld [vmem:[#allocation5 + $0x128] sm:$0xf0]  ;;  %v4481_v33 = vor.u32 %v6462_v25, %v4478_v27  ;;  %v4769_v25 = vor.u32 %v6534_v17, %v4766_v19  ;;  %v6516_v27 = vld [vmem:[#allocation5 + $0x254] sm:$0xf]  ;;  %v4726_v19 = vld [vmem:[#allocation5 + $0x298] sm:$0xf0] }
  0x61   :  { %1051 = vmatpush.bf16.msra.mxu2 %v4585_v30  ;;  %1020 = vmatmul.bf16.vlgmr.msrb.gmra.mxu3 %v7231_v40  ;;  %v6494_v30 = vld [vmem:[#allocation5 + $0x1a4] sm:$0xf]  ;;  %v6524_v17 = vld [vmem:[#allocation5 + $0x294] sm:$0xf] }
  0x62   :  { %1064 = vmatpush.bf16.msra.mxu3 %v4649_v34  ;;  %v4545_v34 = vor.u32 %v6478_v28, %v4542_v29  ;;  %v4609_v41 = vor.u32 %v6494_v30, %v4606_v31  ;;  %v4694_v28 = vld [vmem:[#allocation5 + $0x258] sm:$0xf0]  ;;  %v6532_v29 = vld [vmem:[#allocation5 + $0x2d4] sm:$0xf] }
  0x63   :  { %1026 = vmatpush.bf16.msra.mxu0 %v4449_v43  ;;  %v6476_v43 = vld [vmem:[#allocation5 + $0x114] sm:$0xf]  ;;  %v4758_v31 = vld [vmem:[#allocation5 + $0x2d8] sm:$0xf0]  ;;  %v4697_v37 = vor.u32 %v6516_v27, %v4694_v28  ;;  %v4654_v28 = vld [vmem:[#allocation5 + $0x208] sm:$0xf0] }
  0x64   :  { %1039 = vmatpush.bf16.msra.mxu1 %v4513_v45  ;;  %v4534_v45 = vld [vmem:[#allocation5 + $0x118] sm:$0xf0]  ;;  %v4761_v38 = vor.u32 %v6532_v29, %v4758_v31  ;;  %v6522_v29 = vld [vmem:[#allocation5 + $0x284] sm:$0xf] }
  0x65   :  { %1052 = vmatpush.bf16.msra.mxu2 %v4577_v46  ;;  %v6492_v46 = vld [vmem:[#allocation5 + $0x194] sm:$0xf]  ;;  %v4537_v52 = vor.u32 %v6476_v43, %v4534_v45  ;;  %v4686_v43 = vld [vmem:[#allocation5 + $0x248] sm:$0xf0] }
  0x66   :  { %1065 = vmatpush.bf16.msra.mxu3 %v4641_v50  ;;  %v4398_v50 = vld [vmem:[#allocation5 + $0x8] sm:$0xf0] }
  0x67   :  { %1027 = vmatpush.bf16.msra.mxu0 %v4441_v56  ;;  %v4601_v56 = vor.u32 %v6492_v46, %v4598_v47  ;;  %v4401_v63 = vor.u32 %v6442_v49, %v4398_v50  ;;  %v4750_v46 = vld [vmem:[#allocation5 + $0x2c8] sm:$0xf0]  ;;  %v6546_v47 = vld [vmem:[#allocation5 + $0x344] sm:$0xf] }
  0x68   :  { %1040 = vmatpush.bf16.msra.mxu1 %v4505_v57  ;;  %v4526_v57 = vld [vmem:[#allocation5 + $0x108] sm:$0xf0]  ;;  %v6562_v49 = vld [vmem:[#allocation5 + $0x3c4] sm:$0xf] }
  0x69   :  { %1053 = vmatpush.bf16.msra.mxu2 %v4569_v58  ;;  %v6490_v58 = vld [vmem:[#allocation5 + $0x184] sm:$0xf] }
  0x6a   :  { %1066 = vmatpush.bf16.msra.mxu3 %v4633_v62  ;;  %v6536_v62 = vld [vmem:[#allocation5 + $0x2f4] sm:$0xf]  ;;  %v4593_v9 = vor.u32 %v6490_v58, %v4590_v59  ;;  %v4870_v59 = vld [vmem:[#allocation5 + $0x3b8] sm:$0xf0] }
  0x6b   :  { %1028 = vmatpush.bf16.msra.mxu0 %v4433_v5  ;;  %v4529_v5 = vor.u32 %v6474_v55, %v4526_v57  ;;  %v4777_v11 = vor.u32 %v6536_v62, %v4774_v0  ;;  %v4742_v55 = vld [vmem:[#allocation5 + $0x2b8] sm:$0xf0]  ;;  %v6560_v58 = vld [vmem:[#allocation5 + $0x3b4] sm:$0xf]  ;;  %v4670_v0 = vld [vmem:[#allocation5 + $0x228] sm:$0xf0] }
  0x6c   :  { %1041 = vmatpush.bf16.msra.mxu1 %v4497_v7  ;;  %v6568_v7 = vld [vmem:[#allocation5 + $0x3f4] sm:$0xf]  ;;  %v4806_v57 = vld [vmem:[#allocation5 + $0x338] sm:$0xf0]  ;;  %v4745_v61 = vor.u32 %v6528_v53, %v4742_v55  ;;  %v6658_v53 = vld [vmem:[#allocation8 + $0x2bc] sm:$0xf0] }
  0x6d   :  { %1054 = vmatpush.bf16.msra.mxu2 %v4561_v8  ;;  %v4902_v8 = vld [vmem:[#allocation5 + $0x3f8] sm:$0xf0]  ;;  %v5230_v55 = vld [vmem:[#allocation8 + $0x2c0] sm:$0xf0] }
  0x6e   :  { %1067 = vmatpush.bf16.msra.mxu3 %v4625_v12  ;;  %v4841_v12 = vor.u32 %v6552_v2, %v4838_v3  ;;  %v4905_v18 = vor.u32 %v6568_v7, %v4902_v8  ;;  %v6526_v2 = vld [vmem:[#allocation5 + $0x2a4] sm:$0xf]  ;;  %v4873_v3 = vor.u32 %v6560_v58, %v4870_v59  ;;  %v4798_v7 = vld [vmem:[#allocation5 + $0x328] sm:$0xf0] }
  0x6f   :  { %1029 = vmatpush.bf16.msra.mxu0 %v4425_v20  ;;  %v6550_v20 = vld [vmem:[#allocation5 + $0x364] sm:$0xf] }
  0x70   :  { %1042 = vmatpush.bf16.msra.mxu1 %v4489_v21  ;;  %v4830_v21 = vld [vmem:[#allocation5 + $0x368] sm:$0xf0]  ;;  %v6558_v8 = vld [vmem:[#allocation5 + $0x3a4] sm:$0xf] }
  0x71   :  { %1055 = vmatpush.bf16.msra.mxu2 %v4553_v22  ;;  %v6566_v22 = vld [vmem:[#allocation5 + $0x3e4] sm:$0xf] }
  0x72   :  { %1068 = vmatpush.bf16.msra.mxu3 %v4617_v26  ;;  %v4833_v26 = vor.u32 %v6550_v20, %v4830_v21  ;;  %v4897_v30 = vor.u32 %v6566_v22, %v4894_v23  ;;  %v6540_v20 = vld [vmem:[#allocation5 + $0x314] sm:$0xf]  ;;  %v4790_v21 = vld [vmem:[#allocation5 + $0x318] sm:$0xf0]  ;;  %v5164_v58 = vld [vmem:[#allocation8 + $0x200] sm:$0xf] }
  0x73   :  { %1030 = vmatpush.bf16.msra.mxu0 %v4417_v32  ;;  %v6548_v32 = vld [vmem:[#allocation5 + $0x354] sm:$0xf]  ;;  %v4854_v23 = vld [vmem:[#allocation5 + $0x398] sm:$0xf0]  ;;  %v4793_v27 = vor.u32 %v6540_v20, %v4790_v21  ;;  %v6642_v59 = vld [vmem:[#allocation8 + $0x23c] sm:$0xf0] }
  0x74   :  { %1043 = vmatpush.bf16.msra.mxu1 %v4481_v33  ;;  %v4822_v33 = vld [vmem:[#allocation5 + $0x358] sm:$0xf0]  ;;  %v6556_v22 = vld [vmem:[#allocation5 + $0x394] sm:$0xf]  ;;  %v6570_v20 = vld [vmem:[#allocation8 + $0x4] sm:$0xf] }
  0x75   :  { %1056 = vmatpush.bf16.msra.mxu2 %v4545_v34  ;;  %v6564_v34 = vld [vmem:[#allocation5 + $0x3d4] sm:$0xf]  ;;  %v4857_v31 = vor.u32 %v6556_v22, %v4854_v23  ;;  %v4910_v21 = vld [vmem:[#allocation8 + $0x40] sm:$0xf0]  ;;  %v5364_v22 = vld [vmem:[#allocation8 + $0x388] sm:$0xf] }
  0x76   :  { %1069 = vmatpush.bf16.msra.mxu3 %v4609_v41  ;;  %v4825_v41 = vor.u32 %v6548_v32, %v4822_v33  ;;  %v4889_v45 = vor.u32 %v6564_v34, %v4886_v36  ;;  %v6538_v32 = vld [vmem:[#allocation5 + $0x304] sm:$0xf]  ;;  %v4782_v33 = vld [vmem:[#allocation5 + $0x308] sm:$0xf0] }
  0x77   :  { %1031 = vmatpush.bf16.msra.mxu0 %v4409_v48  ;;  %v4814_v48 = vld [vmem:[#allocation5 + $0x348] sm:$0xf0]  ;;  %v6554_v34 = vld [vmem:[#allocation5 + $0x384] sm:$0xf] }
  0x78   :  { %1044 = vmatpush.bf16.msra.mxu1 %v4473_v51  ;;  %v6512_v51 = vld [vmem:[#allocation5 + $0x234] sm:$0xf]  ;;  %v4846_v36 = vld [vmem:[#allocation5 + $0x388] sm:$0xf0] }
  0x79   :  { %1057 = vmatpush.bf16.msra.mxu2 %v4537_v52  ;;  %v4678_v52 = vld [vmem:[#allocation5 + $0x238] sm:$0xf0]  ;;  %v6691_v23 = vld [vmem:[#allocation8 + $0x3c4] sm:$0xf0] }
  0x7a   :  { %1070 = vmatpush.bf16.msra.mxu3 %v4601_v56  ;;  %v6544_v56 = vld [vmem:[#allocation5 + $0x334] sm:$0xf]  ;;  %v4681_v60 = vor.u32 %v6512_v51, %v4678_v52  ;;  %v5228_v52 = vld [vmem:[#allocation8 + $0x280] sm:$0xf] }
  0x7b   :  { %1032 = vmatpush.bf16.msra.mxu0 %v4401_v63  ;;  %v4809_v62 = vor.u32 %v6544_v56, %v4806_v57  ;;  %v6510_v63 = vld [vmem:[#allocation5 + $0x224] sm:$0xf]  ;;  %v5229_v56 = vor.u32 %v6658_v53, %v5228_v52 }
  0x7c   :  { %1045 = vmatpush.bf16.msra.mxu1 %v4465_v4  ;;  %v4734_v4 = vld [vmem:[#allocation5 + $0x2a8] sm:$0xf0] }
  0x7d   :  { %1058 = vmatpush.bf16.msra.mxu2 %v4529_v5  ;;  %v6542_v5 = vld [vmem:[#allocation5 + $0x324] sm:$0xf] }
  0x7e   :  { %1071 = vmatpush.bf16.msra.mxu3 %v4593_v9  ;;  %1033 = vmatmul.bf16.vlgmr.msra.gmra.mxu0 %v7220_v14  ;;  %v4878_v14 = vld [vmem:[#allocation5 + $0x3c8] sm:$0xf0] }
  0x7f   :  { %1077 = vmatpush.bf16.msrb.mxu0 %v4713_v10  ;;  %1046 = vmatmul.bf16.vlgmr.msra.gmra.mxu1 %v7222_v15  ;;  %v4817_v15 = vor.u32 %v6546_v47, %v4814_v48  ;;  %v4881_v54 = vor.u32 %v6562_v49, %v4878_v14  ;;  %v4862_v9 = vld [vmem:[#allocation5 + $0x3a8] sm:$0xf0]  ;;  %v4673_v10 = vor.u32 %v6510_v63, %v4670_v0  ;;  %v5292_v49 = vld [vmem:[#allocation8 + $0x300] sm:$0xf]  ;;  %v6618_v0 = vld [vmem:[#allocation8 + $0x184] sm:$0xf] }
  0x80   :  { %1090 = vmatpush.bf16.msrb.mxu1 %v4777_v11  ;;  %1059 = vmatmul.bf16.vlgmr.msra.gmra.mxu2 %v7215_v1  ;;  %v6530_v1 = vld [vmem:[#allocation5 + $0x2c4] sm:$0xf]  ;;  %v4737_v11 = vor.u32 %v6526_v2, %v4734_v4 }
  0x81   :  { %1103 = vmatpush.bf16.msrb.mxu2 %v4841_v12  ;;  %1072 = vmatmul.bf16.vlgmr.msra.gmra.mxu3 %v7217_v6  ;;  %v4689_v6 = vor.u32 %v6514_v42, %v4686_v43  ;;  %v4753_v50 = vor.u32 %v6530_v1, %v4750_v46  ;;  %v4801_v12 = vor.u32 %v6542_v5, %v4798_v7  ;;  %v6682_v42 = vld [vmem:[#allocation8 + $0x384] sm:$0xf]  ;;  %v6674_v14 = vld [vmem:[#allocation8 + $0x33c] sm:$0xf0] }
  0x82   :  { %1116 = vmatpush.bf16.msrb.mxu3 %v4905_v18  ;;  %v4865_v18 = vor.u32 %v6558_v8, %v4862_v9  ;;  %v5358_v43 = vld [vmem:[#allocation8 + $0x3c0] sm:$0xf0]  ;;  %v4849_v46 = vor.u32 %v6554_v34, %v4846_v36  ;;  %v5100_v63 = vld [vmem:[#allocation8 + $0x180] sm:$0xf] }
  0x83   :  { %1078 = vmatpush.bf16.msrb.mxu0 %v4705_v24  ;;  %v4665_v24 = vor.u32 %v6508_v13, %v4662_v16  ;;  %v5361_v48 = vor.u32 %v6682_v42, %v5358_v43  ;;  %v6610_v4 = vld [vmem:[#allocation8 + $0x13c] sm:$0xf0]  ;;  %v6602_v5 = vld [vmem:[#allocation8 + $0x104] sm:$0xf]  ;;  %v5238_v42 = vld [vmem:[#allocation8 + $0x2c8] sm:$0xf0] }
  0x84   :  { %1091 = vmatpush.bf16.msrb.mxu1 %v4769_v25  ;;  %v6506_v25 = vld [vmem:[#allocation5 + $0x204] sm:$0xf] }
  0x85   :  { %1104 = vmatpush.bf16.msrb.mxu2 %v4833_v26  ;;  %v4729_v26 = vor.u32 %v6524_v17, %v4726_v19  ;;  %v5038_v7 = vld [vmem:[#allocation8 + $0x140] sm:$0xf0]  ;;  %v6578_v19 = vld [vmem:[#allocation8 + $0x3c] sm:$0xf0] }
  0x86   :  { %1117 = vmatpush.bf16.msrb.mxu3 %v4897_v30  ;;  %v4718_v30 = vld [vmem:[#allocation5 + $0x288] sm:$0xf0]  ;;  %v5041_v9 = vor.u32 %v6602_v5, %v5038_v7  ;;  %v4974_v13 = vld [vmem:[#allocation8 + $0xc0] sm:$0xf0] }
  0x87   :  { %1079 = vmatpush.bf16.msrb.mxu0 %v4697_v37  ;;  %v5356_v37 = vld [vmem:[#allocation8 + $0x380] sm:$0xf]  ;;  %v4721_v1 = vor.u32 %v6522_v29, %v4718_v30  ;;  %v5300_v30 = vld [vmem:[#allocation8 + $0x308] sm:$0xf] }
  0x88   :  { %1092 = vmatpush.bf16.msrb.mxu1 %v4761_v38  ;;  %v6690_v38 = vld [vmem:[#allocation8 + $0x3bc] sm:$0xf0]  ;;  %v6579_v5 = vld [vmem:[#allocation8 + $0x44] sm:$0xf0] }
  0x89   :  { %1105 = vmatpush.bf16.msrb.mxu2 %v4825_v41  ;;  %v4657_v41 = vor.u32 %v6506_v25, %v4654_v28  ;;  %v5357_v47 = vor.u32 %v6690_v38, %v5356_v37  ;;  %v5366_v25 = vld [vmem:[#allocation8 + $0x3c8] sm:$0xf0]  ;;  %v5365_v28 = vor.u32 %v6691_v23, %v5364_v22  ;;  %v5236_v37 = vld [vmem:[#allocation8 + $0x288] sm:$0xf] }
  0x8a   :  { %1118 = vmatpush.bf16.msrb.mxu3 %v4889_v45  ;;  %v4785_v45 = vor.u32 %v6538_v32, %v4782_v33  ;;  %v6667_v32 = vld [vmem:[#allocation8 + $0x30c] sm:$0xf]  ;;  %v6659_v38 = vld [vmem:[#allocation8 + $0x2c4] sm:$0xf0] }
  0x8b   :  { %1080 = vmatpush.bf16.msrb.mxu0 %v4689_v6  ;;  %v6666_v6 = vld [vmem:[#allocation8 + $0x304] sm:$0xf]  ;;  %v5302_v33 = vld [vmem:[#allocation8 + $0x348] sm:$0xf0]  ;;  %v5237_v43 = vor.u32 %v6659_v38, %v5236_v37 }
  0x8c   :  { %1093 = vmatpush.bf16.msrb.mxu1 %v4753_v50  ;;  %v5294_v50 = vld [vmem:[#allocation8 + $0x340] sm:$0xf0]  ;;  %v5305_v36 = vor.u32 %v6667_v32, %v5302_v33 }
  0x8d   :  { %1106 = vmatpush.bf16.msrb.mxu2 %v4817_v15  ;;  %v5293_v15 = vor.u32 %v6674_v14, %v5292_v49  ;;  %v5297_v51 = vor.u32 %v6666_v6, %v5294_v50  ;;  %v5108_v6 = vld [vmem:[#allocation8 + $0x188] sm:$0xf]  ;;  %v6778_v33 = vld [vmem:[#allocation8 + $0x684] sm:$0xf] }
  0x8e   :  { %1119 = vmatpush.bf16.msrb.mxu3 %v4881_v54  ;;  %v6650_v54 = vld [vmem:[#allocation8 + $0x284] sm:$0xf]  ;;  %v6627_v50 = vld [vmem:[#allocation8 + $0x1c4] sm:$0xf0] }
  0x8f   :  { %1081 = vmatpush.bf16.msrb.mxu0 %v4681_v60  ;;  %v5233_v57 = vor.u32 %v6650_v54, %v5230_v55  ;;  %v6634_v60 = vld [vmem:[#allocation8 + $0x204] sm:$0xf]  ;;  %v5109_v52 = vor.u32 %v6627_v50, %v5108_v6  ;;  %v5044_v55 = vld [vmem:[#allocation8 + $0x108] sm:$0xf] }
  0x90   :  { %1094 = vmatpush.bf16.msrb.mxu1 %v4745_v61  ;;  %v5165_v61 = vor.u32 %v6642_v59, %v5164_v58  ;;  %v6603_v58 = vld [vmem:[#allocation8 + $0x10c] sm:$0xf]  ;;  %v5614_v6 = vld [vmem:[#allocation8 + $0x5c0] sm:$0xf0] }
  0x91   :  { %1107 = vmatpush.bf16.msrb.mxu2 %v4809_v62  ;;  %v5046_v59 = vld [vmem:[#allocation8 + $0x148] sm:$0xf0] }
  0x92   :  { %1120 = vmatpush.bf16.msrb.mxu3 %v4873_v3  ;;  %v5036_v3 = vld [vmem:[#allocation8 + $0x100] sm:$0xf] }
  0x93   :  { %1082 = vmatpush.bf16.msrb.mxu0 %v4673_v10  ;;  %v5037_v8 = vor.u32 %v6610_v4, %v5036_v3  ;;  %v4972_v10 = vld [vmem:[#allocation8 + $0x80] sm:$0xf]  ;;  %v4916_v4 = vld [vmem:[#allocation8 + $0x8] sm:$0xf] }
  0x94   :  { %1095 = vmatpush.bf16.msrb.mxu1 %v4737_v11  ;;  %v6594_v11 = vld [vmem:[#allocation8 + $0xbc] sm:$0xf0]  ;;  %v4917_v23 = vor.u32 %v6579_v5, %v4916_v4  ;;  %v5372_v5 = vld [vmem:[#allocation8 + $0x390] sm:$0xf] }
  0x95   :  { %1108 = vmatpush.bf16.msrb.mxu2 %v4801_v12  ;;  %v6586_v12 = vld [vmem:[#allocation8 + $0x84] sm:$0xf]  ;;  %v4973_v16 = vor.u32 %v6594_v11, %v4972_v10  ;;  %v6818_v10 = vld [vmem:[#allocation8 + $0x7bc] sm:$0xf0] }
  0x96   :  { %1121 = vmatpush.bf16.msrb.mxu3 %v4865_v18  ;;  %v4977_v17 = vor.u32 %v6586_v12, %v4974_v13  ;;  %v4908_v18 = vld [vmem:[#allocation8] sm:$0xf]  ;;  %v6810_v11 = vld [vmem:[#allocation8 + $0x784] sm:$0xf]  ;;  %v6571_v13 = vld [vmem:[#allocation8 + $0xc] sm:$0xf] }
  0x97   :  { %1083 = vmatpush.bf16.msrb.mxu0 %v4665_v24  ;;  %v6683_v24 = vld [vmem:[#allocation8 + $0x38c] sm:$0xf] }
  0x98   :  { %1096 = vmatpush.bf16.msrb.mxu1 %v4729_v26  ;;  %v4909_v26 = vor.u32 %v6578_v19, %v4908_v18  ;;  %v5369_v29 = vor.u32 %v6683_v24, %v5366_v25  ;;  %v5870_v18 = vld [vmem:[#allocation8 + $0x7c0] sm:$0xf0]  ;;  %v6802_v24 = vld [vmem:[#allocation8 + $0x73c] sm:$0xf0] }
  0x99   :  { %1109 = vmatpush.bf16.msrb.mxu2 %v4793_v27  ;;  %v4913_v27 = vor.u32 %v6570_v20, %v4910_v21  ;;  %v5873_v19 = vor.u32 %v6810_v11, %v5870_v18  ;;  %v5804_v20 = vld [vmem:[#allocation8 + $0x700] sm:$0xf]  ;;  %v6794_v25 = vld [vmem:[#allocation8 + $0x704] sm:$0xf]  ;;  %v6684_v11 = vld [vmem:[#allocation8 + $0x394] sm:$0xf] }
  0x9a   :  { %1122 = vmatpush.bf16.msrb.mxu3 %v4857_v31  ;;  %v6675_v31 = vld [vmem:[#allocation8 + $0x344] sm:$0xf0]  ;;  %v6698_v18 = vld [vmem:[#allocation8 + $0x404] sm:$0xf] }
  0x9b   :  { %1084 = vmatpush.bf16.msrb.mxu0 %v4657_v41  ;;  %v5301_v34 = vor.u32 %v6675_v31, %v5300_v30  ;;  %v6651_v41 = vld [vmem:[#allocation8 + $0x28c] sm:$0xf]  ;;  %v5740_v30 = vld [vmem:[#allocation8 + $0x680] sm:$0xf] }
  0x9c   :  { %1097 = vmatpush.bf16.msrb.mxu1 %v4721_v1  ;;  %v5241_v1 = vor.u32 %v6651_v41, %v5238_v42  ;;  %v6786_v31 = vld [vmem:[#allocation8 + $0x6bc] sm:$0xf0] }
  0x9d   :  { %1110 = vmatpush.bf16.msrb.mxu2 %v4785_v45  ;;  %v5172_v45 = vld [vmem:[#allocation8 + $0x208] sm:$0xf]  ;;  %v5741_v37 = vor.u32 %v6786_v31, %v5740_v30  ;;  %v5676_v41 = vld [vmem:[#allocation8 + $0x600] sm:$0xf]  ;;  %v5310_v30 = vld [vmem:[#allocation8 + $0x350] sm:$0xf0] }
  0x9e   :  { %1123 = vmatpush.bf16.msrb.mxu3 %v4849_v46  ;;  %1085 = vmatmul.bf16.vlgmr.msrb.gmra.mxu0 %v7229_v39  ;;  %v5166_v39 = vld [vmem:[#allocation8 + $0x240] sm:$0xf0]  ;;  %v6643_v46 = vld [vmem:[#allocation8 + $0x244] sm:$0xf0]  ;;  %v6770_v42 = vld [vmem:[#allocation8 + $0x63c] sm:$0xf0] }
  0x9f   :  { %2705 = vmatpush.bf16.msra.mxu0 %v5357_v47  ;;  %1098 = vmatmul.bf16.vlgmr.msrb.gmra.mxu1 %v7233_v44  ;;  %v5169_v62 = vor.u32 %v6634_v60, %v5166_v39  ;;  %v6626_v44 = vld [vmem:[#allocation8 + $0x1bc] sm:$0xf0]  ;;  %v6635_v47 = vld [vmem:[#allocation8 + $0x20c] sm:$0xf]  ;;  %v5173_v49 = vor.u32 %v6643_v46, %v5172_v45  ;;  %v5677_v46 = vor.u32 %v6770_v42, %v5676_v41  ;;  %v6803_v41 = vld [vmem:[#allocation8 + $0x744] sm:$0xf0] }
  0xa0   :  { %1111 = vmatmul.bf16.vlgmr.msrb.gmra.mxu2 %v7227_v35  ;;  %v5102_v35 = vld [vmem:[#allocation8 + $0x1c0] sm:$0xf0]  ;;  %v5101_v2 = vor.u32 %v6626_v44, %v5100_v63  ;;  %v4980_v63 = vld [vmem:[#allocation8 + $0x88] sm:$0xf]  ;;  %v6795_v42 = vld [vmem:[#allocation8 + $0x70c] sm:$0xf] }
  0xa1   :  { %2731 = vmatpush.bf16.msra.mxu2 %v5361_v48  ;;  %1124 = vmatmul.bf16.vlgmr.msrb.gmra.mxu3 %v7231_v40  ;;  %v5105_v40 = vor.u32 %v6618_v0, %v5102_v35  ;;  %v5174_v48 = vld [vmem:[#allocation8 + $0x248] sm:$0xf0]  ;;  %v6595_v44 = vld [vmem:[#allocation8 + $0xc4] sm:$0xf0] }
  0xa2   :  { %v5177_v14 = vor.u32 %v6635_v47, %v5174_v48  ;;  %v6587_v0 = vld [vmem:[#allocation8 + $0x8c] sm:$0xf]  ;;  %v4981_v3 = vor.u32 %v6595_v44, %v4980_v63  ;;  %2744 = vmatpush.bf16.msra.mxu3 %v5873_v19  ;;  %v5612_v48 = vld [vmem:[#allocation8 + $0x580] sm:$0xf]  ;;  %v6714_v44 = vld [vmem:[#allocation8 + $0x484] sm:$0xf] }
  0xa3   :  { %2706 = vmatpush.bf16.msra.mxu0 %v5293_v15  ;;  %v6619_v15 = vld [vmem:[#allocation8 + $0x18c] sm:$0xf]  ;;  %v6722_v63 = vld [vmem:[#allocation8 + $0x4bc] sm:$0xf0]  ;;  %v5422_v19 = vld [vmem:[#allocation8 + $0x440] sm:$0xf0] }
  0xa4   :  { %v4982_v35 = vld [vmem:[#allocation8 + $0xc8] sm:$0xf0]  ;;  %v5425_v31 = vor.u32 %v6698_v18, %v5422_v19  ;;  %v5054_v18 = vld [vmem:[#allocation8 + $0x150] sm:$0xf0] }
  0xa5   :  { %2732 = vmatpush.bf16.msra.mxu2 %v5297_v51  ;;  %v5110_v51 = vld [vmem:[#allocation8 + $0x1c8] sm:$0xf0] }
  0xa6   :  { %v5113_v54 = vor.u32 %v6619_v15, %v5110_v51 }
  0xa7   :  { %2707 = vmatpush.bf16.msra.mxu0 %v5229_v56  ;;  %v6611_v56 = vld [vmem:[#allocation8 + $0x144] sm:$0xf0] }
  0xa8   :  { %v5045_v39 = vor.u32 %v6611_v56, %v5044_v55  ;;  %v6730_v55 = vld [vmem:[#allocation8 + $0x504] sm:$0xf] }
  0xa9   :  { %2733 = vmatpush.bf16.msra.mxu2 %v5233_v57  ;;  %v5550_v56 = vld [vmem:[#allocation8 + $0x540] sm:$0xf0] }
  0xab   :  { %2708 = vmatpush.bf16.msra.mxu0 %v5165_v61  ;;  %v7247_v61 = vld [vmem:[#allocation7] sm:$0x3] }
  0xad   :  { %2734 = vmatpush.bf16.msra.mxu2 %v5169_v62  ;;  %v5049_v62 = vor.u32 %v6603_v58, %v5046_v59 }
  0xaf   :  { %2709 = vmatpush.bf16.msra.mxu0 %v5101_v2 }
  0xb1   :  { %2735 = vmatpush.bf16.msra.mxu2 %v5105_v40  ;;  %v249_v40 = vperm.slane %v7247_v61, 0 }
  0xb3   :  { %2710 = vmatpush.bf16.msra.mxu0 %v5037_v8  ;;  %v4985_v8 = vor.u32 %v6587_v0, %v4982_v35  ;;  %v5486_v0 = vld [vmem:[#allocation8 + $0x4c0] sm:$0xf0] }
  0xb4   :  { %v5489_v4 = vor.u32 %v6714_v44, %v5486_v0  ;;  %v5686_v44 = vld [vmem:[#allocation8 + $0x648] sm:$0xf0] }
  0xb5   :  { %2736 = vmatpush.bf16.msra.mxu2 %v5041_v9  ;;  %v5868_v9 = vld [vmem:[#allocation8 + $0x780] sm:$0xf] }
  0xb7   :  { %2711 = vmatpush.bf16.msra.mxu0 %v4973_v16  ;;  %v4918_v16 = vld [vmem:[#allocation8 + $0x48] sm:$0xf0] }
  0xb9   :  { %2737 = vmatpush.bf16.msra.mxu2 %v4977_v17  ;;  %v5869_v17 = vor.u32 %v6818_v10, %v5868_v9  ;;  %v6692_v10 = vld [vmem:[#allocation8 + $0x3cc] sm:$0xf0] }
  0xbb   :  { %2712 = vmatpush.bf16.msra.mxu0 %v4909_v26  ;;  %v930_v53 = vpop.f32.mrf.mxu0  ;;  %2718 = vmatpush.bf16.msra.mxu1 %v5869_v17  ;;  %v5806_v26 = vld [vmem:[#allocation8 + $0x740] sm:$0xf0] }
  0xbc   :  { %v943_v57 = vpop.f32.mrf.mxu1  ;;  %v931_v21 = vadd.f32 %v930_v53, %v249_v40  ;;  %v6738_v53 = vld [vmem:[#allocation8 + $0x53c] sm:$0xf0] }
  0xbd   :  { %2738 = vmatpush.bf16.msra.mxu2 %v4913_v27  ;;  %v4921_v27 = vor.u32 %v6571_v13, %v4918_v16 }
  0xbf   :  { %2757 = vmatpush.bf16.msrb.mxu0 %v5365_v28  ;;  %v5805_v28 = vor.u32 %v6802_v24, %v5804_v20 }
  0xc1   :  { %2783 = vmatpush.bf16.msrb.mxu2 %v5369_v29  ;;  %v5809_v29 = vor.u32 %v6794_v25, %v5806_v26  ;;  %2719 = vmatpush.bf16.msra.mxu1 %v5805_v28  ;;  %v5876_v25 = vld [vmem:[#allocation8 + $0x788] sm:$0xf] }
  0xc2   :  { %v6819_v26 = vld [vmem:[#allocation8 + $0x7c4] sm:$0xf0] }
  0xc3   :  { %2758 = vmatpush.bf16.msrb.mxu0 %v5301_v34  ;;  %v956_v60 = vpop.f32.mrf.mxu2  ;;  %v932_v7 = vpop.f32.mrf.mxu0  ;;  %v5742_v34 = vld [vmem:[#allocation8 + $0x6c0] sm:$0xf0]  ;;  %2745 = vmatpush.bf16.msra.mxu3 %v5809_v29  ;;  %v6668_v29 = vld [vmem:[#allocation8 + $0x314] sm:$0xf] }
  0xc4   :  { %v969_v2 = vpop.f32.mrf.mxu3  ;;  %v945_v12 = vpop.f32.mrf.mxu1  ;;  %v5745_v38 = vor.u32 %v6778_v33, %v5742_v34  ;;  %v5420_v7 = vld [vmem:[#allocation8 + $0x400] sm:$0xf]  ;;  %v5878_v33 = vld [vmem:[#allocation8 + $0x7c8] sm:$0xf0] }
  0xc5   :  { %2784 = vmatpush.bf16.msrb.mxu2 %v5305_v36  ;;  %v944_v36 = vadd.f32 %v943_v57, %v931_v21  ;;  %2720 = vmatpush.bf16.msra.mxu1 %v5741_v37  ;;  %v5374_v12 = vld [vmem:[#allocation8 + $0x3d0] sm:$0xf0]  ;;  %v5308_v21 = vld [vmem:[#allocation8 + $0x310] sm:$0xf] }
  0xc6   :  { %v5377_v24 = vor.u32 %v6684_v11, %v5374_v12  ;;  %v5620_v12 = vld [vmem:[#allocation8 + $0x588] sm:$0xf] }
  0xc7   :  { %2759 = vmatpush.bf16.msrb.mxu0 %v5237_v43  ;;  %v6762_v43 = vld [vmem:[#allocation8 + $0x604] sm:$0xf]  ;;  %v957_v45 = vadd.f32 %v956_v60, %v944_v36  ;;  %2746 = vmatpush.bf16.msra.mxu3 %v5745_v38  ;;  %v5553_v60 = vor.u32 %v6730_v55, %v5550_v56  ;;  %v5812_v38 = vld [vmem:[#allocation8 + $0x708] sm:$0xf]  ;;  %v5180_v55 = vld [vmem:[#allocation8 + $0x210] sm:$0xf] }
  0xc8   :  { %v6644_v56 = vld [vmem:[#allocation8 + $0x24c] sm:$0xf0] }
  0xc9   :  { %2785 = vmatpush.bf16.msrb.mxu2 %v5241_v1  ;;  %v5678_v1 = vld [vmem:[#allocation8 + $0x640] sm:$0xf0]  ;;  %v970_v50 = vadd.f32 %v969_v2, %v957_v45  ;;  %2721 = vmatpush.bf16.msra.mxu1 %v5677_v46  ;;  %v5244_v45 = vld [vmem:[#allocation8 + $0x290] sm:$0xf]  ;;  %v5814_v46 = vld [vmem:[#allocation8 + $0x748] sm:$0xf0]  ;;  %v5181_v0 = vor.u32 %v6644_v56, %v5180_v55 }
  0xca   :  { %v5681_v47 = vor.u32 %v6762_v43, %v5678_v1  ;;  %v5313_v1 = vor.u32 %v6668_v29, %v5310_v30  ;;  %v5556_v29 = vld [vmem:[#allocation8 + $0x508] sm:$0xf] }
  0xcb   :  { %2760 = vmatpush.bf16.msrb.mxu0 %v5173_v49  ;;  %v958_v22 = vpop.f32.mrf.mxu2  ;;  %v6754_v49 = vld [vmem:[#allocation8 + $0x5bc] sm:$0xf0]  ;;  %v6739_v30 = vld [vmem:[#allocation8 + $0x544] sm:$0xf0] }
  0xcc   :  { %v971_v32 = vpop.f32.mrf.mxu3  ;;  %v5613_v15 = vor.u32 %v6754_v49, %v5612_v48  ;;  %2747 = vmatpush.bf16.msra.mxu3 %v5681_v47  ;;  %v6676_v22 = vld [vmem:[#allocation8 + $0x34c] sm:$0xf0]  ;;  %v6652_v48 = vld [vmem:[#allocation8 + $0x294] sm:$0xf] }
  0xcd   :  { %2786 = vmatpush.bf16.msrb.mxu2 %v5177_v14  ;;  %v6746_v14 = vld [vmem:[#allocation8 + $0x584] sm:$0xf]  ;;  %v5877_v32 = vor.u32 %v6819_v26, %v5876_v25  ;;  %v5309_v43 = vor.u32 %v6676_v22, %v5308_v21  ;;  %v6660_v47 = vld [vmem:[#allocation8 + $0x2cc] sm:$0xf0]  ;;  %v5246_v49 = vld [vmem:[#allocation8 + $0x2d0] sm:$0xf0] }
  0xce   :  { %v5617_v51 = vor.u32 %v6746_v14, %v5614_v6  ;;  %2722 = vmatpush.bf16.msra.mxu1 %v5613_v15  ;;  %v5813_v14 = vor.u32 %v6803_v41, %v5812_v38  ;;  %v5817_v6 = vor.u32 %v6795_v42, %v5814_v46  ;;  %v6787_v15 = vld [vmem:[#allocation8 + $0x6c4] sm:$0xf0]  ;;  %v4924_v38 = vld [vmem:[#allocation8 + $0x10] sm:$0xf]  ;;  %v6572_v42 = vld [vmem:[#allocation8 + $0x14] sm:$0xf] }
  0xcf   :  { %2761 = vmatpush.bf16.msrb.mxu0 %v5109_v52  ;;  %v5548_v52 = vld [vmem:[#allocation8 + $0x500] sm:$0xf]  ;;  %v6580_v41 = vld [vmem:[#allocation8 + $0x4c] sm:$0xf0]  ;;  %v5492_v46 = vld [vmem:[#allocation8 + $0x488] sm:$0xf] }
  0xd0   :  { %v5549_v59 = vor.u32 %v6738_v53, %v5548_v52  ;;  %2748 = vmatpush.bf16.msra.mxu3 %v5617_v51  ;;  %v6779_v51 = vld [vmem:[#allocation8 + $0x68c] sm:$0xf]  ;;  %v5245_v53 = vor.u32 %v6660_v47, %v5244_v45  ;;  %v6723_v47 = vld [vmem:[#allocation8 + $0x4c4] sm:$0xf0]  ;;  %v4925_v56 = vor.u32 %v6580_v41, %v4924_v38  ;;  %v6605_v38 = vld [vmem:[#allocation8 + $0x11c] sm:$0xf] }
  0xd1   :  { %2787 = vmatpush.bf16.msrb.mxu2 %v5113_v54  ;;  %v5750_v52 = vld [vmem:[#allocation8 + $0x6c8] sm:$0xf0]  ;;  %v5062_v41 = vld [vmem:[#allocation8 + $0x158] sm:$0xf0] }
  0xd2   :  { %2723 = vmatpush.bf16.msra.mxu1 %v5549_v59 }
  0xd3   :  { %2762 = vmatpush.bf16.msrb.mxu0 %v5045_v39 }
  0xd4   :  { %2749 = vmatpush.bf16.msra.mxu3 %v5553_v60  ;;  %v5753_v60 = vor.u32 %v6779_v51, %v5750_v52  ;;  %v6693_v51 = vld [vmem:[#allocation8 + $0x3d4] sm:$0xf0]  ;;  %v6685_v52 = vld [vmem:[#allocation8 + $0x39c] sm:$0xf] }
  0xd5   :  { %2788 = vmatpush.bf16.msrb.mxu2 %v5049_v62  ;;  %v5484_v62 = vld [vmem:[#allocation8 + $0x480] sm:$0xf] }
  0xd6   :  { %v5485_v2 = vor.u32 %v6722_v63, %v5484_v62  ;;  %v6771_v62 = vld [vmem:[#allocation8 + $0x644] sm:$0xf0]  ;;  %v6763_v63 = vld [vmem:[#allocation8 + $0x60c] sm:$0xf] }
  0xd7   :  { %2763 = vmatpush.bf16.msrb.mxu0 %v4981_v3 }
  0xd8   :  { %2724 = vmatpush.bf16.msra.mxu1 %v5485_v2  ;;  %2750 = vmatpush.bf16.msra.mxu3 %v5489_v4  ;;  %v5116_v2 = vld [vmem:[#allocation8 + $0x190] sm:$0xf]  ;;  %v5118_v4 = vld [vmem:[#allocation8 + $0x1d0] sm:$0xf0] }
  0xd9   :  { %2789 = vmatpush.bf16.msrb.mxu2 %v4985_v8  ;;  %v6706_v8 = vld [vmem:[#allocation8 + $0x43c] sm:$0xf0] }
  0xda   :  { %v5421_v17 = vor.u32 %v6706_v8, %v5420_v7  ;;  %v5689_v7 = vor.u32 %v6763_v63, %v5686_v44  ;;  %v5052_v8 = vld [vmem:[#allocation8 + $0x110] sm:$0xf]  ;;  %v5316_v44 = vld [vmem:[#allocation8 + $0x318] sm:$0xf] }
  0xdb   :  { %2764 = vmatpush.bf16.msrb.mxu0 %v4917_v23  ;;  %v982_v54 = vpop.f32.mrf.mxu0  ;;  %v5373_v23 = vor.u32 %v6692_v10, %v5372_v5 }
  0xdc   :  { %v983_v57 = vadd.f32 %v982_v54, %v970_v50  ;;  %v995_v58 = vpop.f32.mrf.mxu1  ;;  %2725 = vmatpush.bf16.msra.mxu1 %v5421_v17  ;;  %2751 = vmatpush.bf16.msra.mxu3 %v5425_v31  ;;  %v5748_v50 = vld [vmem:[#allocation8 + $0x688] sm:$0xf]  ;;  %v5249_v54 = vor.u32 %v6652_v48, %v5246_v49  ;;  %v6604_v17 = vld [vmem:[#allocation8 + $0x114] sm:$0xf]  ;;  %v6731_v31 = vld [vmem:[#allocation8 + $0x50c] sm:$0xf] }
  0xdd   :  { %2790 = vmatpush.bf16.msrb.mxu2 %v4921_v27  ;;  %v6811_v27 = vld [vmem:[#allocation8 + $0x78c] sm:$0xf]  ;;  %v5749_v59 = vor.u32 %v6787_v15, %v5748_v50  ;;  %v5057_v26 = vor.u32 %v6604_v17, %v5054_v18  ;;  %v5493_v50 = vor.u32 %v6723_v47, %v5492_v46  ;;  %v5065_v47 = vor.u32 %v6605_v38, %v5062_v41 }
  0xde   :  { %v996_v39 = vadd.f32 %v995_v58, %v983_v57  ;;  %v5881_v36 = vor.u32 %v6811_v27, %v5878_v33  ;;  %v6636_v57 = vld [vmem:[#allocation8 + $0x214] sm:$0xf]  ;;  %v6715_v48 = vld [vmem:[#allocation8 + $0x48c] sm:$0xf] }
  0xdf   :  { %v5182_v58 = vld [vmem:[#allocation8 + $0x250] sm:$0xf0]  ;;  %v5494_v15 = vld [vmem:[#allocation8 + $0x4c8] sm:$0xf0] }
  0xe0   :  { %2770 = vmatpush.bf16.msrb.mxu1 %v5877_v32  ;;  %2796 = vmatpush.bf16.msrb.mxu3 %v5881_v36  ;;  %v6588_v32 = vld [vmem:[#allocation8 + $0x94] sm:$0xf]  ;;  %v5558_v36 = vld [vmem:[#allocation8 + $0x548] sm:$0xf0] }
  0xe1   :  { %v4990_v33 = vld [vmem:[#allocation8 + $0xd0] sm:$0xf0] }
  0xe3   :  { %v1008_v35 = vpop.f32.mrf.mxu2  ;;  %v984_v13 = vpop.f32.mrf.mxu0 }
  0xe4   :  { %v1009_v40 = vadd.f32 %v1008_v35, %v996_v39  ;;  %v1021_v3 = vpop.f32.mrf.mxu3  ;;  %v997_v16 = vpop.f32.mrf.mxu1  ;;  %2771 = vmatpush.bf16.msrb.mxu1 %v5813_v14  ;;  %2797 = vmatpush.bf16.msrb.mxu3 %v5817_v6  ;;  %v5684_v39 = vld [vmem:[#allocation8 + $0x608] sm:$0xf]  ;;  %v5185_v35 = vor.u32 %v6636_v57, %v5182_v58  ;;  %v4926_v14 = vld [vmem:[#allocation8 + $0x50] sm:$0xf0]  ;;  %v5380_v6 = vld [vmem:[#allocation8 + $0x398] sm:$0xf] }
  0xe5   :  { %v5685_v5 = vor.u32 %v6771_v62, %v5684_v39  ;;  %v6755_v13 = vld [vmem:[#allocation8 + $0x5c4] sm:$0xf0]  ;;  %v6747_v16 = vld [vmem:[#allocation8 + $0x58c] sm:$0xf]  ;;  %v4929_v57 = vor.u32 %v6572_v42, %v4926_v14  ;;  %v5381_v62 = vor.u32 %v6693_v51, %v5380_v6  ;;  %v6597_v14 = vld [vmem:[#allocation8 + $0xd4] sm:$0xf0] }
  0xe6   :  { %v1022_v9 = vadd.f32 %v1021_v3, %v1009_v40  ;;  %v6628_v40 = vld [vmem:[#allocation8 + $0x1cc] sm:$0xf0]  ;;  %v6620_v3 = vld [vmem:[#allocation8 + $0x194] sm:$0xf]  ;;  %v5621_v19 = vor.u32 %v6755_v13, %v5620_v12  ;;  %v6699_v39 = vld [vmem:[#allocation8 + $0x40c] sm:$0xf] }
  0xe7   :  { %v5117_v10 = vor.u32 %v6628_v40, %v5116_v2  ;;  %v5121_v11 = vor.u32 %v6620_v3, %v5118_v4  ;;  %v6669_v2 = vld [vmem:[#allocation8 + $0x31c] sm:$0xf]  ;;  %v6661_v12 = vld [vmem:[#allocation8 + $0x2d4] sm:$0xf0] }
  0xe8   :  { %v1129_v20 = vmax.f32 %v1022_v9, 0.0  ;;  %2772 = vmatpush.bf16.msrb.mxu1 %v5749_v59  ;;  %2798 = vmatpush.bf16.msrb.mxu3 %v5753_v60  ;;  %v6612_v9 = vld [vmem:[#allocation8 + $0x14c] sm:$0xf0]  ;;  %v5428_v59 = vld [vmem:[#allocation8 + $0x408] sm:$0xf] }
  0xe9   :  { %v5053_v25 = vor.u32 %v6612_v9, %v5052_v8  ;;  %v6707_v60 = vld [vmem:[#allocation8 + $0x444] sm:$0xf0]  ;;  %v5318_v40 = vld [vmem:[#allocation8 + $0x358] sm:$0xf0] }
  0xea   :  { %v7250_v28 = vpack.c.bf16 %v1129_v20, %v1129_v20  ;;  %v5622_v20 = vld [vmem:[#allocation8 + $0x5c8] sm:$0xf0]  ;;  %v5429_v3 = vor.u32 %v6707_v60, %v5428_v59  ;;  %v5321_v9 = vor.u32 %v6669_v2, %v5318_v40  ;;  %v6653_v13 = vld [vmem:[#allocation8 + $0x29c] sm:$0xf]  ;;  %v6694_v60 = vld [vmem:[#allocation8 + $0x3dc] sm:$0xf0] }
  0xeb   :  { %v1010_v34 = vpop.f32.mrf.mxu2  ;;  %v5625_v21 = vor.u32 %v6747_v16, %v5622_v20  ;;  %v5254_v16 = vld [vmem:[#allocation8 + $0x2d8] sm:$0xf0]  ;;  %v6645_v20 = vld [vmem:[#allocation8 + $0x254] sm:$0xf0]  ;;  %v6820_v40 = vld [vmem:[#allocation8 + $0x7cc] sm:$0xf0] }
  0xec   :  { %2713 = vmatmul.bf16.vlgmr.msra.gmra.mxu0 %v7250_v28  ;;  %2739 = vmatmul.bf16.vlgmr.msra.gmra.mxu2 %v7250_v28  ;;  %v1023_v37 = vpop.f32.mrf.mxu3  ;;  %v5557_v34 = vor.u32 %v6739_v30, %v5556_v29  ;;  %v5257_v18 = vor.u32 %v6653_v13, %v5254_v16  ;;  %v5124_v29 = vld [vmem:[#allocation8 + $0x198] sm:$0xf]  ;;  %v6621_v30 = vld [vmem:[#allocation8 + $0x19c] sm:$0xf] }
  0xed   :  { %2809 = vmatpush.bf16.msra.mxu0 %v5373_v23  ;;  %2835 = vmatpush.bf16.msra.mxu2 %v5377_v24  ;;  %v4988_v23 = vld [vmem:[#allocation8 + $0x90] sm:$0xf]  ;;  %v5561_v37 = vor.u32 %v6731_v31, %v5558_v36  ;;  %v5126_v31 = vld [vmem:[#allocation8 + $0x1d8] sm:$0xf0]  ;;  %v5060_v36 = vld [vmem:[#allocation8 + $0x118] sm:$0xf] }
  0xee   :  { %2773 = vmatpush.bf16.msrb.mxu1 %v5685_v5  ;;  %2799 = vmatpush.bf16.msrb.mxu3 %v5689_v7  ;;  %v6596_v24 = vld [vmem:[#allocation8 + $0xcc] sm:$0xf0]  ;;  %v250_v5 = vperm.slane %v7247_v61, 1  ;;  %v4998_v6 = vld [vmem:[#allocation8 + $0xd8] sm:$0xf0] }
  0xf1   :  { %2810 = vmatpush.bf16.msra.mxu0 %v5309_v43  ;;  %2836 = vmatpush.bf16.msra.mxu2 %v5313_v1  ;;  %v4989_v43 = vor.u32 %v6596_v24, %v4988_v23  ;;  %v4993_v1 = vor.u32 %v6588_v32, %v4990_v33  ;;  %v5190_v23 = vld [vmem:[#allocation8 + $0x258] sm:$0xf0] }
  0xf2   :  { %2774 = vmatpush.bf16.msrb.mxu1 %v5621_v19  ;;  %2800 = vmatpush.bf16.msrb.mxu3 %v5625_v21  ;;  %v5188_v19 = vld [vmem:[#allocation8 + $0x218] sm:$0xf]  ;;  %v6637_v21 = vld [vmem:[#allocation8 + $0x21c] sm:$0xf] }
  0xf5   :  { %2811 = vmatpush.bf16.msra.mxu0 %v5245_v53  ;;  %2837 = vmatpush.bf16.msra.mxu2 %v5249_v54  ;;  %v5382_v53 = vld [vmem:[#allocation8 + $0x3d8] sm:$0xf0]  ;;  %v5497_v54 = vor.u32 %v6715_v48, %v5494_v15  ;;  %v4996_v48 = vld [vmem:[#allocation8 + $0x98] sm:$0xf] }
  0xf6   :  { %2775 = vmatpush.bf16.msrb.mxu1 %v5557_v34  ;;  %2801 = vmatpush.bf16.msrb.mxu3 %v5561_v37  ;;  %v5385_v63 = vor.u32 %v6685_v52, %v5382_v53  ;;  %v5129_v34 = vor.u32 %v6621_v30, %v5126_v31  ;;  %v6613_v37 = vld [vmem:[#allocation8 + $0x154] sm:$0xf0]  ;;  %v4997_v15 = vor.u32 %v6597_v14, %v4996_v48  ;;  %v5262_v30 = vld [vmem:[#allocation8 + $0x2e0] sm:$0xf0]  ;;  %v5692_v48 = vld [vmem:[#allocation8 + $0x610] sm:$0xf] }
  0xf7   :  { %v5061_v46 = vor.u32 %v6613_v37, %v5060_v36  ;;  %v4932_v52 = vld [vmem:[#allocation8 + $0x18] sm:$0xf]  ;;  %v6780_v36 = vld [vmem:[#allocation8 + $0x694] sm:$0xf]  ;;  %v6772_v14 = vld [vmem:[#allocation8 + $0x64c] sm:$0xf0] }
  0xf8   :  { %v6581_v53 = vld [vmem:[#allocation8 + $0x54] sm:$0xf0]  ;;  %v5758_v37 = vld [vmem:[#allocation8 + $0x6d0] sm:$0xf0] }
  0xf9   :  { %2812 = vmatpush.bf16.msra.mxu0 %v5181_v0  ;;  %2838 = vmatpush.bf16.msra.mxu2 %v5185_v35  ;;  %v5430_v0 = vld [vmem:[#allocation8 + $0x448] sm:$0xf0]  ;;  %v6677_v35 = vld [vmem:[#allocation8 + $0x354] sm:$0xf0] }
  0xfa   :  { %2776 = vmatpush.bf16.msrb.mxu1 %v5493_v50  ;;  %2802 = vmatpush.bf16.msrb.mxu3 %v5497_v54  ;;  %v5433_v4 = vor.u32 %v6699_v39, %v5430_v0  ;;  %v5317_v8 = vor.u32 %v6677_v35, %v5316_v44  ;;  %v6686_v39 = vld [vmem:[#allocation8 + $0x3a4] sm:$0xf]  ;;  %v5884_v44 = vld [vmem:[#allocation8 + $0x790] sm:$0xf]  ;;  %v4933_v35 = vor.u32 %v6581_v53, %v4932_v52  ;;  %v6630_v52 = vld [vmem:[#allocation8 + $0x1dc] sm:$0xf0] }
  0xfb   :  { %v7256_v22 = vpop.f32.mrf.mxu0  ;;  %v5885_v13 = vor.u32 %v6820_v40, %v5884_v44  ;;  %v6622_v53 = vld [vmem:[#allocation8 + $0x1a4] sm:$0xf]  ;;  %v5564_v40 = vld [vmem:[#allocation8 + $0x510] sm:$0xf] }
  0xfc   :  { %2765 = vmatmul.bf16.vlgmr.msrb.gmra.mxu0 %v7250_v28  ;;  %2791 = vmatmul.bf16.vlgmr.msrb.gmra.mxu2 %v7250_v28  ;;  %v7258_v27 = vpop.f32.mrf.mxu1  ;;  %v1035_v17 = vadd.f32 %v7256_v22, %v250_v5  ;;  %v6629_v22 = vld [vmem:[#allocation8 + $0x1d4] sm:$0xf0]  ;;  %v6606_v44 = vld [vmem:[#allocation8 + $0x124] sm:$0xf] }
  0xfd   :  { %2813 = vmatpush.bf16.msra.mxu0 %v5117_v10  ;;  %2839 = vmatpush.bf16.msra.mxu2 %v5121_v11  ;;  %v5252_v11 = vld [vmem:[#allocation8 + $0x298] sm:$0xf]  ;;  %v5125_v33 = vor.u32 %v6629_v22, %v5124_v29  ;;  %v6662_v29 = vld [vmem:[#allocation8 + $0x2dc] sm:$0xf0]  ;;  %v6654_v22 = vld [vmem:[#allocation8 + $0x2a4] sm:$0xf] }
  0xfe   :  { %2777 = vmatpush.bf16.msrb.mxu1 %v5429_v3  ;;  %2803 = vmatpush.bf16.msrb.mxu3 %v5433_v4  ;;  %v5253_v61 = vor.u32 %v6661_v12, %v5252_v11  ;;  %v1048_v24 = vadd.f32 %v7258_v27, %v1035_v17  ;;  %v6812_v3 = vld [vmem:[#allocation8 + $0x794] sm:$0xf]  ;;  %v6670_v11 = vld [vmem:[#allocation8 + $0x324] sm:$0xf]  ;;  %v5820_v17 = vld [vmem:[#allocation8 + $0x710] sm:$0xf]  ;;  %v5265_v41 = vor.u32 %v6654_v22, %v5262_v30 }
  0xff   :  { %v5886_v4 = vld [vmem:[#allocation8 + $0x7d0] sm:$0xf0]  ;;  %v5326_v12 = vld [vmem:[#allocation8 + $0x360] sm:$0xf0] }
 0x100   :  { %v5889_v16 = vor.u32 %v6812_v3, %v5886_v4  ;;  %v6740_v3 = vld [vmem:[#allocation8 + $0x54c] sm:$0xf0]  ;;  %v6732_v4 = vld [vmem:[#allocation8 + $0x514] sm:$0xf]  ;;  %v6574_v22 = vld [vmem:[#allocation8 + $0x24] sm:$0xf] }
 0x101   :  { %2814 = vmatpush.bf16.msra.mxu0 %v5053_v25  ;;  %2840 = vmatpush.bf16.msra.mxu2 %v5057_v26  ;;  %v5189_v25 = vor.u32 %v6645_v20, %v5188_v19  ;;  %v5193_v26 = vor.u32 %v6637_v21, %v5190_v23  ;;  %v6796_v19 = vld [vmem:[#allocation8 + $0x714] sm:$0xf]  ;;  %v4942_v30 = vld [vmem:[#allocation8 + $0x60] sm:$0xf0] }
 0x102   :  { %v5822_v20 = vld [vmem:[#allocation8 + $0x750] sm:$0xf0] }
 0x103   :  { %v7260_v45 = vpop.f32.mrf.mxu2  ;;  %v1036_v55 = vpop.f32.mrf.mxu0 }
 0x104   :  { %v7262_v49 = vpop.f32.mrf.mxu3  ;;  %v1049_v58 = vpop.f32.mrf.mxu1  ;;  %v1061_v32 = vadd.f32 %v7260_v45, %v1048_v24  ;;  %v6589_v45 = vld [vmem:[#allocation8 + $0x9c] sm:$0xf]  ;;  %v5329_v24 = vor.u32 %v6670_v11, %v5326_v12  ;;  %v6590_v11 = vld [vmem:[#allocation8 + $0xa4] sm:$0xf] }
 0x105   :  { %2815 = vmatpush.bf16.msra.mxu0 %v4989_v43  ;;  %2841 = vmatpush.bf16.msra.mxu2 %v4993_v1  ;;  %v5001_v51 = vor.u32 %v6589_v45, %v4998_v6  ;;  %v4934_v55 = vld [vmem:[#allocation8 + $0x58] sm:$0xf0]  ;;  %v6764_v45 = vld [vmem:[#allocation8 + $0x614] sm:$0xf]  ;;  %v5006_v12 = vld [vmem:[#allocation8 + $0xe0] sm:$0xf0] }
 0x106   :  { %v1074_v27 = vadd.f32 %v7262_v49, %v1061_v32  ;;  %v6573_v49 = vld [vmem:[#allocation8 + $0x1c] sm:$0xf]  ;;  %v5825_v32 = vor.u32 %v6796_v19, %v5822_v20  ;;  %v5694_v6 = vld [vmem:[#allocation8 + $0x650] sm:$0xf0] }
 0x107   :  { %v4937_v2 = vor.u32 %v6573_v49, %v4934_v55  ;;  %v5693_v49 = vor.u32 %v6772_v14, %v5692_v48  ;;  %v5697_v55 = vor.u32 %v6764_v45, %v5694_v6  ;;  %v6716_v19 = vld [vmem:[#allocation8 + $0x494] sm:$0xf] }
 0x108   :  { %v5502_v20 = vld [vmem:[#allocation8 + $0x4d0] sm:$0xf0] }
 0x109   :  { %2816 = vmatpush.bf16.msra.mxu0 %v4925_v56  ;;  %2842 = vmatpush.bf16.msra.mxu2 %v4929_v57  ;;  %v5388_v56 = vld [vmem:[#allocation8 + $0x3a0] sm:$0xf] }
 0x10a   :  { %v5389_v5 = vor.u32 %v6694_v60, %v5388_v56  ;;  %v5628_v56 = vld [vmem:[#allocation8 + $0x590] sm:$0xf] }
 0x10b   :  { %v1062_v7 = vpop.f32.mrf.mxu2 }
 0x10c   :  { %v1075_v10 = vpop.f32.mrf.mxu3  ;;  %2817 = vmatmul.bf16.vlgmr.msra.gmra.mxu0 %v7250_v28  ;;  %2843 = vmatmul.bf16.vlgmr.msra.gmra.mxu2 %v7250_v28 }
 0x10d   :  { %2861 = vmatpush.bf16.msrb.mxu0 %v5381_v62  ;;  %2887 = vmatpush.bf16.msrb.mxu2 %v5385_v63  ;;  %v5390_v62 = vld [vmem:[#allocation8 + $0x3e0] sm:$0xf0] }
 0x10e   :  { %v5393_v7 = vor.u32 %v6686_v39, %v5390_v62  ;;  %v5068_v62 = vld [vmem:[#allocation8 + $0x120] sm:$0xf] }
 0x111   :  { %2862 = vmatpush.bf16.msrb.mxu0 %v5317_v8  ;;  %2888 = vmatpush.bf16.msrb.mxu2 %v5321_v9  ;;  %v5324_v8 = vld [vmem:[#allocation8 + $0x320] sm:$0xf] }
 0x112   :  { %v6678_v9 = vld [vmem:[#allocation8 + $0x35c] sm:$0xf0] }
 0x113   :  { %v5325_v23 = vor.u32 %v6678_v9, %v5324_v8  ;;  %v5004_v9 = vld [vmem:[#allocation8 + $0xa0] sm:$0xf] }
 0x115   :  { %2863 = vmatpush.bf16.msrb.mxu0 %v5253_v61  ;;  %2889 = vmatpush.bf16.msrb.mxu2 %v5257_v18  ;;  %v6804_v18 = vld [vmem:[#allocation8 + $0x74c] sm:$0xf0] }
 0x116   :  { %v5821_v31 = vor.u32 %v6804_v18, %v5820_v17  ;;  %v5500_v17 = vld [vmem:[#allocation8 + $0x490] sm:$0xf] }
 0x117   :  { %v6724_v18 = vld [vmem:[#allocation8 + $0x4cc] sm:$0xf0] }
 0x119   :  { %2864 = vmatpush.bf16.msrb.mxu0 %v5189_v25  ;;  %2890 = vmatpush.bf16.msrb.mxu2 %v5193_v26  ;;  %v5260_v25 = vld [vmem:[#allocation8 + $0x2a0] sm:$0xf] }
 0x11a   :  { %v5261_v38 = vor.u32 %v6662_v29, %v5260_v25  ;;  %v6582_v25 = vld [vmem:[#allocation8 + $0x5c] sm:$0xf0]  ;;  %v6708_v29 = vld [vmem:[#allocation8 + $0x44c] sm:$0xf0] }
 0x11b   :  { %v1086_v42 = vpop.f32.mrf.mxu0 }
 0x11c   :  { %v1099_v43 = vpop.f32.mrf.mxu1  ;;  %v1087_v1 = vadd.f32 %v1086_v42, %v1074_v27  ;;  %v5196_v27 = vld [vmem:[#allocation8 + $0x220] sm:$0xf] }
 0x11d   :  { %2865 = vmatpush.bf16.msrb.mxu0 %v5125_v33  ;;  %2891 = vmatpush.bf16.msrb.mxu2 %v5129_v34  ;;  %v5756_v33 = vld [vmem:[#allocation8 + $0x690] sm:$0xf]  ;;  %v6646_v42 = vld [vmem:[#allocation8 + $0x25c] sm:$0xf0] }
 0x11e   :  { %v1100_v50 = vadd.f32 %v1099_v43, %v1087_v1  ;;  %v6788_v34 = vld [vmem:[#allocation8 + $0x6cc] sm:$0xf0]  ;;  %v6638_v43 = vld [vmem:[#allocation8 + $0x224] sm:$0xf] }
 0x11f   :  { %v5198_v1 = vld [vmem:[#allocation8 + $0x260] sm:$0xf0] }
 0x121   :  { %2866 = vmatpush.bf16.msrb.mxu0 %v5061_v46  ;;  %2892 = vmatpush.bf16.msrb.mxu2 %v5065_v47  ;;  %v5757_v46 = vor.u32 %v6788_v34, %v5756_v33  ;;  %v5761_v47 = vor.u32 %v6780_v36, %v5758_v37  ;;  %v5505_v33 = vor.u32 %v6716_v19, %v5502_v20  ;;  %v6695_v34 = vld [vmem:[#allocation8 + $0x3e4] sm:$0xf0]  ;;  %v6687_v36 = vld [vmem:[#allocation8 + $0x3ac] sm:$0xf] }
 0x122   :  { %v5398_v37 = vld [vmem:[#allocation8 + $0x3e8] sm:$0xf0] }
 0x123   :  { %v1112_v54 = vpop.f32.mrf.mxu2  ;;  %v1088_v59 = vpop.f32.mrf.mxu0  ;;  %v5401_v14 = vor.u32 %v6687_v36, %v5398_v37  ;;  %v5572_v36 = vld [vmem:[#allocation8 + $0x518] sm:$0xf]  ;;  %v5076_v37 = vld [vmem:[#allocation8 + $0x128] sm:$0xf] }
 0x124   :  { %v1113_v57 = vadd.f32 %v1112_v54, %v1100_v50  ;;  %v1125_v58 = vpop.f32.mrf.mxu3  ;;  %v1101_v63 = vpop.f32.mrf.mxu1  ;;  %v5197_v50 = vor.u32 %v6646_v42, %v5196_v27  ;;  %v5134_v54 = vld [vmem:[#allocation8 + $0x1e0] sm:$0xf0]  ;;  %v5630_v59 = vld [vmem:[#allocation8 + $0x5d0] sm:$0xf0]  ;;  %v5892_v27 = vld [vmem:[#allocation8 + $0x798] sm:$0xf] }
 0x125   :  { %2867 = vmatpush.bf16.msrb.mxu0 %v4997_v15  ;;  %2893 = vmatpush.bf16.msrb.mxu2 %v5001_v51  ;;  %v5201_v15 = vor.u32 %v6638_v43, %v5198_v1  ;;  %v5132_v51 = vld [vmem:[#allocation8 + $0x1a0] sm:$0xf]  ;;  %v5137_v39 = vor.u32 %v6622_v53, %v5134_v54  ;;  %v4945_v43 = vor.u32 %v6574_v22, %v4942_v30  ;;  %v6821_v1 = vld [vmem:[#allocation8 + $0x7d4] sm:$0xf0]  ;;  %v6679_v53 = vld [vmem:[#allocation8 + $0x364] sm:$0xf0] }
 0x126   :  { %v1126_v0 = vadd.f32 %v1125_v58, %v1113_v57  ;;  %v6756_v57 = vld [vmem:[#allocation8 + $0x5cc] sm:$0xf0]  ;;  %v6748_v58 = vld [vmem:[#allocation8 + $0x594] sm:$0xf]  ;;  %v5133_v60 = vor.u32 %v6630_v52, %v5132_v51  ;;  %v6614_v63 = vld [vmem:[#allocation8 + $0x15c] sm:$0xf0]  ;;  %v5893_v51 = vor.u32 %v6821_v1, %v5892_v27 }
 0x127   :  { %v6671_v54 = vld [vmem:[#allocation8 + $0x32c] sm:$0xf]  ;;  %v6757_v30 = vld [vmem:[#allocation8 + $0x5d4] sm:$0xf0]  ;;  %v6615_v27 = vld [vmem:[#allocation8 + $0x164] sm:$0xf0] }
 0x128   :  { %v1130_v10 = vmax.f32 %v1126_v0, 0.0  ;;  %v5070_v0 = vld [vmem:[#allocation8 + $0x160] sm:$0xf0]  ;;  %v5142_v22 = vld [vmem:[#allocation8 + $0x1e8] sm:$0xf0] }
 0x129   :  { %2868 = vmatpush.bf16.msrb.mxu0 %v4933_v35  ;;  %2894 = vmatpush.bf16.msrb.mxu2 %v4937_v2  ;;  %v5629_v35 = vor.u32 %v6756_v57, %v5628_v56  ;;  %v5633_v2 = vor.u32 %v6748_v58, %v5630_v59  ;;  %v5073_v8 = vor.u32 %v6606_v44, %v5070_v0  ;;  %v6797_v56 = vld [vmem:[#allocation8 + $0x71c] sm:$0xf]  ;;  %v6663_v44 = vld [vmem:[#allocation8 + $0x2e4] sm:$0xf0]  ;;  %v6655_v0 = vld [vmem:[#allocation8 + $0x2ac] sm:$0xf] }
 0x12a   :  { %v7271_v61 = vpack.c.bf16 %v1130_v10, %v1130_v10  ;;  %v6598_v10 = vld [vmem:[#allocation8 + $0xdc] sm:$0xf0]  ;;  %v5830_v57 = vld [vmem:[#allocation8 + $0x758] sm:$0xf0]  ;;  %v6741_v1 = vld [vmem:[#allocation8 + $0x554] sm:$0xf0] }
 0x12b   :  { %v1114_v21 = vpop.f32.mrf.mxu2 }
 0x12c   :  { %v1127_v26 = vpop.f32.mrf.mxu3  ;;  %2726 = vmatmul.bf16.vlgmr.msra.gmra.mxu1 %v7271_v61  ;;  %2752 = vmatmul.bf16.vlgmr.msra.gmra.mxu3 %v7271_v61  ;;  %v5005_v21 = vor.u32 %v6598_v10, %v5004_v9 }
 0x12d   :  { %2913 = vmatpush.bf16.msra.mxu0 %v5389_v5  ;;  %2939 = vmatpush.bf16.msra.mxu2 %v5393_v7  ;;  %v5566_v5 = vld [vmem:[#allocation8 + $0x550] sm:$0xf0]  ;;  %v5069_v7 = vor.u32 %v6614_v63, %v5068_v62  ;;  %v5436_v26 = vld [vmem:[#allocation8 + $0x410] sm:$0xf]  ;;  %v5833_v63 = vor.u32 %v6797_v56, %v5830_v57 }
 0x12e   :  { %2822 = vmatpush.bf16.msra.mxu1 %v5885_v13  ;;  %2848 = vmatpush.bf16.msra.mxu3 %v5889_v16  ;;  %v5565_v13 = vor.u32 %v6740_v3, %v5564_v40  ;;  %v5569_v16 = vor.u32 %v6732_v4, %v5566_v5  ;;  %v5437_v45 = vor.u32 %v6708_v29, %v5436_v26  ;;  %v6781_v40 = vld [vmem:[#allocation8 + $0x69c] sm:$0xf]  ;;  %v6631_v26 = vld [vmem:[#allocation8 + $0x1e4] sm:$0xf0]  ;;  %v6623_v29 = vld [vmem:[#allocation8 + $0x1ac] sm:$0xf] }
 0x12f   :  { %2869 = vmatmul.bf16.vlgmr.msrb.gmra.mxu0 %v7250_v28  ;;  %2895 = vmatmul.bf16.vlgmr.msrb.gmra.mxu2 %v7250_v28  ;;  %v5766_v3 = vld [vmem:[#allocation8 + $0x6d8] sm:$0xf0] }
 0x130   :  { %v5769_v10 = vor.u32 %v6781_v40, %v5766_v3  ;;  %v5900_v40 = vld [vmem:[#allocation8 + $0x7a0] sm:$0xf] }
 0x131   :  { %2914 = vmatpush.bf16.msra.mxu0 %v5325_v23  ;;  %2940 = vmatpush.bf16.msra.mxu2 %v5329_v24  ;;  %v5009_v23 = vor.u32 %v6590_v11, %v5006_v12  ;;  %v4940_v24 = vld [vmem:[#allocation8 + $0x20] sm:$0xf]  ;;  %v6647_v11 = vld [vmem:[#allocation8 + $0x264] sm:$0xf0]  ;;  %v6639_v12 = vld [vmem:[#allocation8 + $0x22c] sm:$0xf] }
 0x132   :  { %2823 = vmatpush.bf16.msra.mxu1 %v5821_v31  ;;  %2849 = vmatpush.bf16.msra.mxu3 %v5825_v32  ;;  %v5396_v31 = vld [vmem:[#allocation8 + $0x3a8] sm:$0xf]  ;;  %v5501_v32 = vor.u32 %v6724_v18, %v5500_v17  ;;  %v4941_v42 = vor.u32 %v6582_v25, %v4940_v24  ;;  %v6765_v17 = vld [vmem:[#allocation8 + $0x61c] sm:$0xf]  ;;  %v6822_v3 = vld [vmem:[#allocation8 + $0x7dc] sm:$0xf0] }
 0x133   :  { %v5397_v48 = vor.u32 %v6695_v34, %v5396_v31  ;;  %v5702_v18 = vld [vmem:[#allocation8 + $0x658] sm:$0xf0]  ;;  %v5145_v34 = vor.u32 %v6623_v29, %v5142_v22  ;;  %v6680_v29 = vld [vmem:[#allocation8 + $0x36c] sm:$0xf0]  ;;  %v6672_v22 = vld [vmem:[#allocation8 + $0x334] sm:$0xf] }
 0x134   :  { %v5705_v25 = vor.u32 %v6765_v17, %v5702_v18  ;;  %v6749_v31 = vld [vmem:[#allocation8 + $0x59c] sm:$0xf]  ;;  %v5901_v17 = vor.u32 %v6822_v3, %v5900_v40 }
 0x135   :  { %2915 = vmatpush.bf16.msra.mxu0 %v5261_v38  ;;  %2941 = vmatpush.bf16.msra.mxu2 %v5265_v41  ;;  %v6700_v38 = vld [vmem:[#allocation8 + $0x414] sm:$0xf] }
 0x136   :  { %2824 = vmatpush.bf16.msra.mxu1 %v5757_v46  ;;  %2850 = vmatpush.bf16.msra.mxu3 %v5761_v47  ;;  %v5438_v41 = vld [vmem:[#allocation8 + $0x450] sm:$0xf0]  ;;  %v6813_v46 = vld [vmem:[#allocation8 + $0x79c] sm:$0xf] }
 0x137   :  { %v5894_v47 = vld [vmem:[#allocation8 + $0x7d8] sm:$0xf0]  ;;  %v5441_v6 = vor.u32 %v6700_v38, %v5438_v41 }
 0x138   :  { %v5897_v52 = vor.u32 %v6813_v46, %v5894_v47  ;;  %v6733_v46 = vld [vmem:[#allocation8 + $0x51c] sm:$0xf] }
 0x139   :  { %2916 = vmatpush.bf16.msra.mxu0 %v5197_v50  ;;  %2942 = vmatpush.bf16.msra.mxu2 %v5201_v15  ;;  %v5828_v50 = vld [vmem:[#allocation8 + $0x718] sm:$0xf]  ;;  %v5332_v15 = vld [vmem:[#allocation8 + $0x328] sm:$0xf]  ;;  %v5574_v47 = vld [vmem:[#allocation8 + $0x558] sm:$0xf0] }
 0x13a   :  { %2825 = vmatpush.bf16.msra.mxu1 %v5693_v49  ;;  %2851 = vmatpush.bf16.msra.mxu3 %v5697_v55  ;;  %v5334_v49 = vld [vmem:[#allocation8 + $0x368] sm:$0xf0]  ;;  %v6805_v55 = vld [vmem:[#allocation8 + $0x754] sm:$0xf0]  ;;  %v5333_v58 = vor.u32 %v6679_v53, %v5332_v15  ;;  %v5577_v15 = vor.u32 %v6733_v46, %v5574_v47 }
 0x13b   :  { %v5337_v59 = vor.u32 %v6671_v54, %v5334_v49  ;;  %v5829_v62 = vor.u32 %v6805_v55, %v5828_v50  ;;  %v5573_v50 = vor.u32 %v6741_v1, %v5572_v36  ;;  %v5014_v53 = vld [vmem:[#allocation8 + $0xe8] sm:$0xf0]  ;;  %v6725_v54 = vld [vmem:[#allocation8 + $0x4d4] sm:$0xf0]  ;;  %v6717_v49 = vld [vmem:[#allocation8 + $0x49c] sm:$0xf] }
 0x13c   :  { %2778 = vmatmul.bf16.vlgmr.msrb.gmra.mxu1 %v7271_v61  ;;  %2804 = vmatmul.bf16.vlgmr.msrb.gmra.mxu3 %v7271_v61  ;;  %v5510_v55 = vld [vmem:[#allocation8 + $0x4d8] sm:$0xf0]  ;;  %v5278_v1 = vld [vmem:[#allocation8 + $0x2f0] sm:$0xf0] }
 0x13d   :  { %2917 = vmatpush.bf16.msra.mxu0 %v5133_v60  ;;  %2943 = vmatpush.bf16.msra.mxu2 %v5137_v39  ;;  %v5764_v60 = vld [vmem:[#allocation8 + $0x698] sm:$0xf]  ;;  %v5268_v39 = vld [vmem:[#allocation8 + $0x2a8] sm:$0xf] }
 0x13e   :  { %2826 = vmatpush.bf16.msra.mxu1 %v5629_v35  ;;  %2852 = vmatpush.bf16.msra.mxu3 %v5633_v2  ;;  %v5270_v35 = vld [vmem:[#allocation8 + $0x2e8] sm:$0xf0]  ;;  %v6789_v2 = vld [vmem:[#allocation8 + $0x6d4] sm:$0xf0]  ;;  %v5269_v4 = vor.u32 %v6663_v44, %v5268_v39  ;;  %v4948_v39 = vld [vmem:[#allocation8 + $0x28] sm:$0xf] }
 0x13f   :  { %v5273_v5 = vor.u32 %v6655_v0, %v5270_v35  ;;  %v5765_v9 = vor.u32 %v6789_v2, %v5764_v60  ;;  %v6701_v60 = vld [vmem:[#allocation8 + $0x41c] sm:$0xf]  ;;  %v6583_v44 = vld [vmem:[#allocation8 + $0x64] sm:$0xf0]  ;;  %v6575_v0 = vld [vmem:[#allocation8 + $0x2c] sm:$0xf] }
 0x140   :  { %v4950_v35 = vld [vmem:[#allocation8 + $0x68] sm:$0xf0]  ;;  %v5446_v2 = vld [vmem:[#allocation8 + $0x458] sm:$0xf0] }
 0x141   :  { %2918 = vmatpush.bf16.msra.mxu0 %v5069_v7  ;;  %2944 = vmatpush.bf16.msra.mxu2 %v5073_v8  ;;  %v5700_v7 = vld [vmem:[#allocation8 + $0x618] sm:$0xf]  ;;  %v5204_v8 = vld [vmem:[#allocation8 + $0x228] sm:$0xf] }
 0x142   :  { %2827 = vmatpush.bf16.msra.mxu1 %v5565_v13  ;;  %2853 = vmatpush.bf16.msra.mxu3 %v5569_v16  ;;  %v5206_v13 = vld [vmem:[#allocation8 + $0x268] sm:$0xf0]  ;;  %v6773_v16 = vld [vmem:[#allocation8 + $0x654] sm:$0xf0]  ;;  %v5205_v19 = vor.u32 %v6647_v11, %v5204_v8  ;;  %v4949_v8 = vor.u32 %v6583_v44, %v4948_v39  ;;  %v6688_v11 = vld [vmem:[#allocation8 + $0x3b4] sm:$0xf] }
 0x143   :  { %v5209_v20 = vor.u32 %v6639_v12, %v5206_v13  ;;  %v5701_v24 = vor.u32 %v6773_v16, %v5700_v7  ;;  %v5404_v7 = vld [vmem:[#allocation8 + $0x3b0] sm:$0xf]  ;;  %v5406_v12 = vld [vmem:[#allocation8 + $0x3f0] sm:$0xf0]  ;;  %v5449_v16 = vor.u32 %v6701_v60, %v5446_v2  ;;  %v6750_v39 = vld [vmem:[#allocation8 + $0x5a4] sm:$0xf] }
 0x144   :  { %v6632_v44 = vld [vmem:[#allocation8 + $0x1ec] sm:$0xf0] }
 0x145   :  { %2919 = vmatpush.bf16.msra.mxu0 %v5005_v21  ;;  %2945 = vmatpush.bf16.msra.mxu2 %v5009_v23  ;;  %v5636_v21 = vld [vmem:[#allocation8 + $0x598] sm:$0xf]  ;;  %v5140_v23 = vld [vmem:[#allocation8 + $0x1a8] sm:$0xf] }
 0x146   :  { %2828 = vmatpush.bf16.msra.mxu1 %v5501_v32  ;;  %2854 = vmatpush.bf16.msra.mxu3 %v5505_v33  ;;  %v5638_v32 = vld [vmem:[#allocation8 + $0x5d8] sm:$0xf0]  ;;  %v5141_v33 = vor.u32 %v6631_v26, %v5140_v23  ;;  %v5637_v38 = vor.u32 %v6757_v30, %v5636_v21  ;;  %v5409_v23 = vor.u32 %v6688_v11, %v5406_v12  ;;  %v5340_v26 = vld [vmem:[#allocation8 + $0x330] sm:$0xf]  ;;  %v5342_v30 = vld [vmem:[#allocation8 + $0x370] sm:$0xf0] }
 0x147   :  { %v5641_v41 = vor.u32 %v6749_v31, %v5638_v32  ;;  %v5341_v36 = vor.u32 %v6680_v29, %v5340_v26  ;;  %v5084_v11 = vld [vmem:[#allocation8 + $0x130] sm:$0xf]  ;;  %v5518_v26 = vld [vmem:[#allocation8 + $0x4e0] sm:$0xf0] }
 0x148   :  { %v5020_v29 = vld [vmem:[#allocation8 + $0xb0] sm:$0xf] }
 0x149   :  { %2920 = vmatpush.bf16.msra.mxu0 %v4941_v42  ;;  %2946 = vmatpush.bf16.msra.mxu2 %v4945_v43  ;;  %v6607_v42 = vld [vmem:[#allocation8 + $0x12c] sm:$0xf] }
 0x14a   :  { %2829 = vmatpush.bf16.msra.mxu1 %v5437_v45  ;;  %2855 = vmatpush.bf16.msra.mxu3 %v5441_v6  ;;  %v5078_v43 = vld [vmem:[#allocation8 + $0x168] sm:$0xf0]  ;;  %v5508_v45 = vld [vmem:[#allocation8 + $0x498] sm:$0xf]  ;;  %v5012_v6 = vld [vmem:[#allocation8 + $0xa8] sm:$0xf] }
 0x14c   :  { %2921 = vmatmul.bf16.vlgmr.msra.gmra.mxu0 %v7250_v28  ;;  %2947 = vmatmul.bf16.vlgmr.msra.gmra.mxu2 %v7250_v28 }
 0x14d   :  { %2965 = vmatpush.bf16.msrb.mxu0 %v5397_v48  ;;  %2991 = vmatpush.bf16.msrb.mxu2 %v5401_v14  ;;  %v5077_v48 = vor.u32 %v6615_v27, %v5076_v37  ;;  %v5081_v14 = vor.u32 %v6607_v42, %v5078_v43  ;;  %v5345_v37 = vor.u32 %v6672_v22, %v5342_v30  ;;  %v5276_v27 = vld [vmem:[#allocation8 + $0x2b0] sm:$0xf]  ;;  %v6656_v43 = vld [vmem:[#allocation8 + $0x2b4] sm:$0xf] }
 0x14e   :  { %2874 = vmatpush.bf16.msrb.mxu1 %v5893_v51  ;;  %2900 = vmatpush.bf16.msrb.mxu3 %v5897_v52  ;;  %v6599_v51 = vld [vmem:[#allocation8 + $0xe4] sm:$0xf0]  ;;  %v6591_v52 = vld [vmem:[#allocation8 + $0xac] sm:$0xf]  ;;  %v6664_v42 = vld [vmem:[#allocation8 + $0x2ec] sm:$0xf0] }
 0x14f   :  { %2830 = vmatmul.bf16.vlgmr.msra.gmra.mxu1 %v7271_v61  ;;  %2856 = vmatmul.bf16.vlgmr.msra.gmra.mxu3 %v7271_v61  ;;  %v5013_v56 = vor.u32 %v6599_v51, %v5012_v6  ;;  %v5017_v57 = vor.u32 %v6591_v52, %v5014_v53  ;;  %v5281_v6 = vor.u32 %v6656_v43, %v5278_v1  ;;  %v5212_v51 = vld [vmem:[#allocation8 + $0x230] sm:$0xf]  ;;  %v6592_v30 = vld [vmem:[#allocation8 + $0xb4] sm:$0xf] }
 0x150   :  { %v6648_v53 = vld [vmem:[#allocation8 + $0x26c] sm:$0xf0] }
 0x151   :  { %2966 = vmatpush.bf16.msrb.mxu0 %v5333_v58  ;;  %2992 = vmatpush.bf16.msrb.mxu2 %v5337_v59  ;;  %v5444_v58 = vld [vmem:[#allocation8 + $0x418] sm:$0xf]  ;;  %v6600_v22 = vld [vmem:[#allocation8 + $0xec] sm:$0xf0] }
 0x152   :  { %2875 = vmatpush.bf16.msrb.mxu1 %v5829_v62  ;;  %2901 = vmatpush.bf16.msrb.mxu3 %v5833_v63  ;;  %v6709_v59 = vld [vmem:[#allocation8 + $0x454] sm:$0xf0]  ;;  %v5509_v62 = vor.u32 %v6725_v54, %v5508_v45  ;;  %v5513_v63 = vor.u32 %v6717_v49, %v5510_v55  ;;  %v5277_v45 = vor.u32 %v6664_v42, %v5276_v27  ;;  %v6640_v54 = vld [vmem:[#allocation8 + $0x234] sm:$0xf]  ;;  %v4956_v43 = vld [vmem:[#allocation8 + $0x30] sm:$0xf] }
 0x153   :  { %v5445_v13 = vor.u32 %v6709_v59, %v5444_v58  ;;  %v5214_v49 = vld [vmem:[#allocation8 + $0x270] sm:$0xf0]  ;;  %v6758_v58 = vld [vmem:[#allocation8 + $0x5dc] sm:$0xf0]  ;;  %v5213_v59 = vor.u32 %v6648_v53, %v5212_v51  ;;  %v5021_v27 = vor.u32 %v6600_v22, %v5020_v29  ;;  %v6584_v1 = vld [vmem:[#allocation8 + $0x6c] sm:$0xf0] }
 0x154   :  { %v5217_v60 = vor.u32 %v6640_v54, %v5214_v49  ;;  %v6697_v54 = vld [vmem:[#allocation8 + $0x3f4] sm:$0xf0]  ;;  %v6689_v49 = vld [vmem:[#allocation8 + $0x3bc] sm:$0xf] }
 0x155   :  { %2967 = vmatpush.bf16.msrb.mxu0 %v5269_v4  ;;  %2993 = vmatpush.bf16.msrb.mxu2 %v5273_v5  ;;  %v6814_v4 = vld [vmem:[#allocation8 + $0x7a4] sm:$0xf] }
 0x156   :  { %2876 = vmatpush.bf16.msrb.mxu1 %v5765_v9  ;;  %2902 = vmatpush.bf16.msrb.mxu3 %v5769_v10  ;;  %v5902_v5 = vld [vmem:[#allocation8 + $0x7e0] sm:$0xf0]  ;;  %v4953_v9 = vor.u32 %v6575_v0, %v4950_v35  ;;  %v6696_v10 = vld [vmem:[#allocation8 + $0x3ec] sm:$0xf0]  ;;  %v6624_v0 = vld [vmem:[#allocation8 + $0x1b4] sm:$0xf] }
 0x157   :  { %v5905_v18 = vor.u32 %v6814_v4, %v5902_v5  ;;  %v5405_v21 = vor.u32 %v6696_v10, %v5404_v7  ;;  %v5150_v35 = vld [vmem:[#allocation8 + $0x1f0] sm:$0xf0]  ;;  %v5580_v4 = vld [vmem:[#allocation8 + $0x520] sm:$0xf]  ;;  %v5582_v10 = vld [vmem:[#allocation8 + $0x560] sm:$0xf0] }
 0x158   :  { %v6742_v5 = vld [vmem:[#allocation8 + $0x55c] sm:$0xf0] }
 0x159   :  { %2968 = vmatpush.bf16.msrb.mxu0 %v5205_v19  ;;  %2994 = vmatpush.bf16.msrb.mxu2 %v5209_v20  ;;  %v5836_v19 = vld [vmem:[#allocation8 + $0x720] sm:$0xf] }
 0x15a   :  { %2877 = vmatpush.bf16.msrb.mxu1 %v5701_v24  ;;  %2903 = vmatpush.bf16.msrb.mxu3 %v5705_v25  ;;  %v6806_v20 = vld [vmem:[#allocation8 + $0x75c] sm:$0xf0]  ;;  %v6798_v24 = vld [vmem:[#allocation8 + $0x724] sm:$0xf] }
 0x15b   :  { %v5838_v25 = vld [vmem:[#allocation8 + $0x760] sm:$0xf0]  ;;  %v5837_v31 = vor.u32 %v6806_v20, %v5836_v19  ;;  %v5516_v20 = vld [vmem:[#allocation8 + $0x4a0] sm:$0xf] }
 0x15c   :  { %v5841_v32 = vor.u32 %v6798_v24, %v5838_v25  ;;  %v6718_v25 = vld [vmem:[#allocation8 + $0x4a4] sm:$0xf] }
 0x15d   :  { %2969 = vmatpush.bf16.msrb.mxu0 %v5141_v33  ;;  %2995 = vmatpush.bf16.msrb.mxu2 %v5145_v34  ;;  %v5772_v33 = vld [vmem:[#allocation8 + $0x6a0] sm:$0xf] }
 0x15e   :  { %2878 = vmatpush.bf16.msrb.mxu1 %v5637_v38  ;;  %2904 = vmatpush.bf16.msrb.mxu3 %v5641_v41  ;;  %v6790_v34 = vld [vmem:[#allocation8 + $0x6dc] sm:$0xf0]  ;;  %v6782_v38 = vld [vmem:[#allocation8 + $0x6a4] sm:$0xf] }
 0x15f   :  { %v5774_v41 = vld [vmem:[#allocation8 + $0x6e0] sm:$0xf0]  ;;  %v5773_v46 = vor.u32 %v6790_v34, %v5772_v33 }
 0x160   :  { %v5777_v47 = vor.u32 %v6782_v38, %v5774_v41  ;;  %v6702_v38 = vld [vmem:[#allocation8 + $0x424] sm:$0xf] }
 0x161   :  { %2970 = vmatpush.bf16.msrb.mxu0 %v5077_v48  ;;  %2996 = vmatpush.bf16.msrb.mxu2 %v5081_v14  ;;  %v5708_v48 = vld [vmem:[#allocation8 + $0x620] sm:$0xf]  ;;  %v5454_v41 = vld [vmem:[#allocation8 + $0x460] sm:$0xf0] }
 0x162   :  { %2879 = vmatpush.bf16.msrb.mxu1 %v5573_v50  ;;  %2905 = vmatpush.bf16.msrb.mxu3 %v5577_v15  ;;  %v6774_v14 = vld [vmem:[#allocation8 + $0x65c] sm:$0xf0]  ;;  %v6766_v50 = vld [vmem:[#allocation8 + $0x624] sm:$0xf]  ;;  %v5457_v53 = vor.u32 %v6702_v38, %v5454_v41 }
 0x163   :  { %v5710_v15 = vld [vmem:[#allocation8 + $0x660] sm:$0xf0]  ;;  %v5709_v55 = vor.u32 %v6774_v14, %v5708_v48  ;;  %v4958_v48 = vld [vmem:[#allocation8 + $0x70] sm:$0xf0]  ;;  %v5908_v14 = vld [vmem:[#allocation8 + $0x7a8] sm:$0xf] }
 0x165   :  { %2971 = vmatpush.bf16.msrb.mxu0 %v5013_v56  ;;  %2997 = vmatpush.bf16.msrb.mxu2 %v5017_v57  ;;  %v5713_v56 = vor.u32 %v6766_v50, %v5710_v15  ;;  %v5644_v57 = vld [vmem:[#allocation8 + $0x5a0] sm:$0xf]  ;;  %v5910_v50 = vld [vmem:[#allocation8 + $0x7e8] sm:$0xf0]  ;;  %v5412_v15 = vld [vmem:[#allocation8 + $0x3b8] sm:$0xf] }
 0x166   :  { %2880 = vmatpush.bf16.msrb.mxu1 %v5509_v62  ;;  %2906 = vmatpush.bf16.msrb.mxu3 %v5513_v63  ;;  %v5646_v62 = vld [vmem:[#allocation8 + $0x5e0] sm:$0xf0]  ;;  %v5148_v63 = vld [vmem:[#allocation8 + $0x1b0] sm:$0xf]  ;;  %v5645_v40 = vor.u32 %v6758_v58, %v5644_v57 }
 0x167   :  { %v5649_v3 = vor.u32 %v6750_v39, %v5646_v62  ;;  %v5149_v7 = vor.u32 %v6632_v44, %v5148_v63  ;;  %v6807_v39 = vld [vmem:[#allocation8 + $0x764] sm:$0xf0]  ;;  %v5413_v62 = vor.u32 %v6697_v54, %v5412_v15  ;;  %v6799_v44 = vld [vmem:[#allocation8 + $0x72c] sm:$0xf]  ;;  %v5158_v15 = vld [vmem:[#allocation8 + $0x1f8] sm:$0xf0] }
 0x168   :  { %v5588_v54 = vld [vmem:[#allocation8 + $0x528] sm:$0xf] }
 0x169   :  { %2972 = vmatpush.bf16.msrb.mxu0 %v4949_v8  ;;  %2998 = vmatpush.bf16.msrb.mxu2 %v4953_v9  ;;  %v7287_v52 = vpop.f32.mrf.mxu0  ;;  %v5153_v8 = vor.u32 %v6624_v0, %v5150_v35  ;;  %v6734_v9 = vld [vmem:[#allocation8 + $0x524] sm:$0xf]  ;;  %v5846_v0 = vld [vmem:[#allocation8 + $0x768] sm:$0xf0]  ;;  %v5348_v35 = vld [vmem:[#allocation8 + $0x338] sm:$0xf] }
 0x16a   :  { %2881 = vmatpush.bf16.msrb.mxu1 %v5445_v13  ;;  %2907 = vmatpush.bf16.msrb.mxu3 %v5449_v16  ;;  %v6616_v13 = vld [vmem:[#allocation8 + $0x16c] sm:$0xf0]  ;;  %v6608_v16 = vld [vmem:[#allocation8 + $0x134] sm:$0xf]  ;;  %v5585_v19 = vor.u32 %v6734_v9, %v5582_v10  ;;  %v5849_v9 = vor.u32 %v6799_v44, %v5846_v0  ;;  %v5780_v10 = vld [vmem:[#allocation8 + $0x6a8] sm:$0xf] }
 0x16c   :  { %2973 = vmatmul.bf16.vlgmr.msrb.gmra.mxu0 %v7250_v28  ;;  %2999 = vmatmul.bf16.vlgmr.msrb.gmra.mxu2 %v7250_v28 }
 0x16d   :  { %3017 = vmatpush.bf16.msra.mxu0 %v5405_v21  ;;  %3043 = vmatpush.bf16.msra.mxu2 %v5409_v23  ;;  %v6726_v21 = vld [vmem:[#allocation8 + $0x4dc] sm:$0xf0]  ;;  %v5085_v23 = vor.u32 %v6616_v13, %v5084_v11  ;;  %v6791_v11 = vld [vmem:[#allocation8 + $0x6e4] sm:$0xf0] }
 0x16e   :  { %2926 = vmatpush.bf16.msra.mxu1 %v5901_v17  ;;  %2952 = vmatpush.bf16.msra.mxu3 %v5905_v18  ;;  %v5086_v17 = vld [vmem:[#allocation8 + $0x170] sm:$0xf0]  ;;  %v5581_v18 = vor.u32 %v6742_v5, %v5580_v4  ;;  %v5517_v34 = vor.u32 %v6726_v21, %v5516_v20  ;;  %v6673_v4 = vld [vmem:[#allocation8 + $0x33c] sm:$0xf] }
 0x16f   :  { %2882 = vmatmul.bf16.vlgmr.msrb.gmra.mxu1 %v7271_v61  ;;  %2908 = vmatmul.bf16.vlgmr.msrb.gmra.mxu3 %v7271_v61  ;;  %v7289_v2 = vpop.f32.mrf.mxu2  ;;  %v5089_v24 = vor.u32 %v6608_v16, %v5086_v17  ;;  %v5350_v5 = vld [vmem:[#allocation8 + $0x378] sm:$0xf0]  ;;  %v6783_v16 = vld [vmem:[#allocation8 + $0x6ac] sm:$0xf] }
 0x170   :  { %v5353_v13 = vor.u32 %v6673_v4, %v5350_v5  ;;  %v5782_v17 = vld [vmem:[#allocation8 + $0x6e8] sm:$0xf0]  ;;  %v6657_v20 = vld [vmem:[#allocation8 + $0x2bc] sm:$0xf]  ;;  %v6727_v4 = vld [vmem:[#allocation8 + $0x4e4] sm:$0xf0] }
 0x171   :  { %3018 = vmatpush.bf16.msra.mxu0 %v5341_v36  ;;  %3044 = vmatpush.bf16.msra.mxu2 %v5345_v37  ;;  %v2716_v12 = vpop.f32.mrf.mxu0  ;;  %v5521_v36 = vor.u32 %v6718_v25, %v5518_v26  ;;  %v6710_v37 = vld [vmem:[#allocation8 + $0x45c] sm:$0xf0]  ;;  %v5286_v21 = vld [vmem:[#allocation8 + $0x2f8] sm:$0xf0]  ;;  %v5716_v25 = vld [vmem:[#allocation8 + $0x628] sm:$0xf] }
 0x172   :  { %2927 = vmatpush.bf16.msra.mxu1 %v5837_v31  ;;  %2953 = vmatpush.bf16.msra.mxu3 %v5841_v32  ;;  %v5022_v31 = vld [vmem:[#allocation8 + $0xf0] sm:$0xf0]  ;;  %v5452_v32 = vld [vmem:[#allocation8 + $0x420] sm:$0xf]  ;;  %v6775_v26 = vld [vmem:[#allocation8 + $0x664] sm:$0xf0]  ;;  %v5289_v22 = vor.u32 %v6657_v20, %v5286_v21 }
 0x173   :  { %v5025_v42 = vor.u32 %v6592_v30, %v5022_v31  ;;  %v5453_v51 = vor.u32 %v6710_v37, %v5452_v32  ;;  %v6767_v30 = vld [vmem:[#allocation8 + $0x62c] sm:$0xf]  ;;  %v5220_v32 = vld [vmem:[#allocation8 + $0x238] sm:$0xf]  ;;  %v5222_v37 = vld [vmem:[#allocation8 + $0x278] sm:$0xf0]  ;;  %v5717_v41 = vor.u32 %v6775_v26, %v5716_v25 }
 0x174   :  { %v5718_v31 = vld [vmem:[#allocation8 + $0x668] sm:$0xf0]  ;;  %v4964_v25 = vld [vmem:[#allocation8 + $0x38] sm:$0xf] }
 0x175   :  { %3019 = vmatpush.bf16.msra.mxu0 %v5277_v45  ;;  %3045 = vmatpush.bf16.msra.mxu2 %v5281_v6  ;;  %v6823_v45 = vld [vmem:[#allocation8 + $0x7e4] sm:$0xf0]  ;;  %v6815_v6 = vld [vmem:[#allocation8 + $0x7ac] sm:$0xf]  ;;  %v6585_v26 = vld [vmem:[#allocation8 + $0x74] sm:$0xf0] }
 0x176   :  { %2928 = vmatpush.bf16.msra.mxu1 %v5773_v46  ;;  %2954 = vmatpush.bf16.msra.mxu3 %v5777_v47  ;;  %v6576_v46 = vld [vmem:[#allocation8 + $0x34] sm:$0xf]  ;;  %v5909_v58 = vor.u32 %v6823_v45, %v5908_v14  ;;  %v5654_v14 = vld [vmem:[#allocation8 + $0x5e8] sm:$0xf0]  ;;  %v5156_v45 = vld [vmem:[#allocation8 + $0x1b8] sm:$0xf] }
 0x177   :  { %v2742_v33 = vpop.f32.mrf.mxu2  ;;  %v4961_v57 = vor.u32 %v6576_v46, %v4958_v48  ;;  %v6751_v48 = vld [vmem:[#allocation8 + $0x5ac] sm:$0xf] }
 0x178   :  { %v6703_v20 = vld [vmem:[#allocation8 + $0x42c] sm:$0xf] }
 0x179   :  { %3020 = vmatpush.bf16.msra.mxu0 %v5213_v59  ;;  %3046 = vmatpush.bf16.msra.mxu2 %v5217_v60  ;;  %v7291_v47 = vpop.f32.mrf.mxu0  ;;  %v5913_v59 = vor.u32 %v6815_v6, %v5910_v50  ;;  %v5844_v60 = vld [vmem:[#allocation8 + $0x728] sm:$0xf]  ;;  %v6633_v6 = vld [vmem:[#allocation8 + $0x1f4] sm:$0xf0]  ;;  %v6625_v50 = vld [vmem:[#allocation8 + $0x1bc] sm:$0xf] }
 0x17a   :  { %2929 = vmatpush.bf16.msra.mxu1 %v5709_v55  ;;  %2955 = vmatpush.bf16.msra.mxu3 %v5713_v56  ;;  %v5414_v55 = vld [vmem:[#allocation8 + $0x3f8] sm:$0xf0]  ;;  %v4957_v56 = vor.u32 %v6584_v1, %v4956_v43  ;;  %v6759_v43 = vld [vmem:[#allocation8 + $0x5e4] sm:$0xf0] }
 0x17b   :  { %v5417_v63 = vor.u32 %v6689_v49, %v5414_v55  ;;  %v6743_v49 = vld [vmem:[#allocation8 + $0x564] sm:$0xf0]  ;;  %v5157_v55 = vor.u32 %v6633_v6, %v5156_v45  ;;  %v6800_v45 = vld [vmem:[#allocation8 + $0x734] sm:$0xf] }
 0x17c   :  { %v5589_v0 = vor.u32 %v6743_v49, %v5588_v54  ;;  %v5854_v6 = vld [vmem:[#allocation8 + $0x770] sm:$0xf0]  ;;  %v5788_v54 = vld [vmem:[#allocation8 + $0x6b0] sm:$0xf] }
 0x17d   :  { %3021 = vmatpush.bf16.msra.mxu0 %v5149_v7  ;;  %3047 = vmatpush.bf16.msra.mxu2 %v5153_v8  ;;  %v5845_v8 = vor.u32 %v6807_v39, %v5844_v60  ;;  %v6617_v39 = vld [vmem:[#allocation8 + $0x174] sm:$0xf0]  ;;  %v6792_v49 = vld [vmem:[#allocation8 + $0x6ec] sm:$0xf0] }
 0x17e   :  { %2930 = vmatpush.bf16.msra.mxu1 %v5645_v40  ;;  %2956 = vmatpush.bf16.msra.mxu3 %v5649_v3  ;;  %v6681_v3 = vld [vmem:[#allocation8 + $0x374] sm:$0xf0] }
 0x17f   :  { %v7293_v40 = vpop.f32.mrf.mxu2  ;;  %v5349_v12 = vor.u32 %v6681_v3, %v5348_v35  ;;  %v5524_v3 = vld [vmem:[#allocation8 + $0x4a8] sm:$0xf] }
 0x181   :  { %3022 = vmatpush.bf16.msra.mxu0 %v5085_v23  ;;  %3048 = vmatpush.bf16.msra.mxu2 %v5089_v24  ;;  %v2768_v7 = vpop.f32.mrf.mxu0  ;;  %v5781_v23 = vor.u32 %v6791_v11, %v5780_v10  ;;  %v5785_v24 = vor.u32 %v6783_v16, %v5782_v17  ;;  %v5028_v10 = vld [vmem:[#allocation8 + $0xb8] sm:$0xf]  ;;  %v5525_v16 = vor.u32 %v6727_v4, %v5524_v3 }
 0x182   :  { %2931 = vmatpush.bf16.msra.mxu1 %v5581_v18  ;;  %2957 = vmatpush.bf16.msra.mxu3 %v5585_v19  ;;  %v5284_v18 = vld [vmem:[#allocation8 + $0x2b8] sm:$0xf] }
 0x183   :  { %v6665_v19 = vld [vmem:[#allocation8 + $0x2f4] sm:$0xf0] }
 0x184   :  { %v5285_v29 = vor.u32 %v6665_v19, %v5284_v18  ;;  %v6601_v11 = vld [vmem:[#allocation8 + $0xf4] sm:$0xf0]  ;;  %v5460_v18 = vld [vmem:[#allocation8 + $0x428] sm:$0xf] }
 0x185   :  { %3023 = vmatpush.bf16.msra.mxu0 %v5021_v27  ;;  %3049 = vmatpush.bf16.msra.mxu2 %v5025_v42  ;;  %v5721_v27 = vor.u32 %v6767_v30, %v5718_v31  ;;  %v5652_v42 = vld [vmem:[#allocation8 + $0x5a8] sm:$0xf]  ;;  %v5029_v21 = vor.u32 %v6601_v11, %v5028_v10  ;;  %v4966_v30 = vld [vmem:[#allocation8 + $0x78] sm:$0xf0]  ;;  %v5916_v31 = vld [vmem:[#allocation8 + $0x7b0] sm:$0xf] }
 0x186   :  { %2932 = vmatpush.bf16.msra.mxu1 %v5517_v34  ;;  %2958 = vmatpush.bf16.msra.mxu3 %v5521_v36  ;;  %v6649_v34 = vld [vmem:[#allocation8 + $0x274] sm:$0xf0]  ;;  %v6641_v36 = vld [vmem:[#allocation8 + $0x23c] sm:$0xf]  ;;  %v6711_v19 = vld [vmem:[#allocation8 + $0x464] sm:$0xf0] }
 0x187   :  { %v2794_v33 = vpop.f32.mrf.mxu2  ;;  %v5221_v1 = vor.u32 %v6649_v34, %v5220_v32  ;;  %v5225_v46 = vor.u32 %v6641_v36, %v5222_v37  ;;  %v6824_v32 = vld [vmem:[#allocation8 + $0x7ec] sm:$0xf0]  ;;  %v5918_v34 = vld [vmem:[#allocation8 + $0x7f0] sm:$0xf0]  ;;  %v5461_v36 = vor.u32 %v6711_v19, %v5460_v18 }
 0x188   :  { %v6816_v33 = vld [vmem:[#allocation8 + $0x7b4] sm:$0xf]  ;;  %v5660_v10 = vld [vmem:[#allocation8 + $0x5b0] sm:$0xf] }
 0x189   :  { %3024 = vmatpush.bf16.msra.mxu0 %v4957_v56  ;;  %3050 = vmatpush.bf16.msra.mxu2 %v4961_v57  ;;  %v7299_v38 = vpop.f32.mrf.mxu0  ;;  %v5161_v56 = vor.u32 %v6625_v50, %v5158_v15  ;;  %v6735_v57 = vld [vmem:[#allocation8 + $0x52c] sm:$0xf]  ;;  %v5857_v15 = vor.u32 %v6800_v45, %v5854_v6  ;;  %v6760_v11 = vld [vmem:[#allocation8 + $0x5ec] sm:$0xf0]  ;;  %v6843_v45 = vld [vmem:[#allocation11 + $0x88] sm:$0xff] }
 0x18a   :  { %2933 = vmatpush.bf16.msra.mxu1 %v5453_v51  ;;  %2959 = vmatpush.bf16.msra.mxu3 %v5457_v53  ;;  %v5653_v51 = vor.u32 %v6759_v43, %v5652_v42  ;;  %v5657_v53 = vor.u32 %v6751_v48, %v5654_v14  ;;  %v5917_v42 = vor.u32 %v6824_v32, %v5916_v31  ;;  %v5852_v48 = vld [vmem:[#allocation8 + $0x730] sm:$0xf] }
 0x18b   :  { %v5921_v43 = vor.u32 %v6816_v33, %v5918_v34  ;;  %v6808_v14 = vld [vmem:[#allocation8 + $0x76c] sm:$0xf0]  ;;  %v5661_v18 = vor.u32 %v6760_v11, %v5660_v10  ;;  %v6828_v33 = vld [vmem:[#allocation11 + $0x10] sm:$0xff]  ;;  %v6801_v10 = vld [vmem:[#allocation8 + $0x73c] sm:$0xf] }
 0x18c   :  { %3025 = vmatmul.bf16.vlgmr.msra.gmra.mxu0 %v7250_v28  ;;  %3051 = vmatmul.bf16.vlgmr.msra.gmra.mxu2 %v7250_v28  ;;  %v5853_v50 = vor.u32 %v6808_v14, %v5852_v48  ;;  %v6844_v34 = vld [vmem:[#allocation11 + $0x90] sm:$0xff]  ;;  %v6827_v14 = vld [vmem:[#allocation11 + $0x8] sm:$0xff]  ;;  %v5468_v6 = vld [vmem:[#allocation8 + $0x430] sm:$0xf] }
 0x18d   :  { %3069 = vmatpush.bf16.msrb.mxu0 %v5413_v62  ;;  %3095 = vmatpush.bf16.msrb.mxu2 %v5417_v63  ;;  %v6609_v62 = vld [vmem:[#allocation8 + $0x13c] sm:$0xf] }
 0x18e   :  { %2978 = vmatpush.bf16.msrb.mxu1 %v5909_v58  ;;  %3004 = vmatpush.bf16.msrb.mxu3 %v5913_v59  ;;  %v5590_v58 = vld [vmem:[#allocation8 + $0x568] sm:$0xf0]  ;;  %v5092_v59 = vld [vmem:[#allocation8 + $0x138] sm:$0xf]  ;;  %v5094_v63 = vld [vmem:[#allocation8 + $0x178] sm:$0xf0] }
 0x18f   :  { %2934 = vmatmul.bf16.vlgmr.msra.gmra.mxu1 %v7271_v61  ;;  %2960 = vmatmul.bf16.vlgmr.msra.gmra.mxu3 %v7271_v61  ;;  %v7301_v60 = vpop.f32.mrf.mxu2  ;;  %v5593_v35 = vor.u32 %v6735_v57, %v5590_v58  ;;  %v5093_v5 = vor.u32 %v6617_v39, %v5092_v59  ;;  %v5097_v7 = vor.u32 %v6609_v62, %v5094_v63  ;;  %v6831_v59 = vld [vmem:[#allocation11 + $0x28] sm:$0xff]  ;;  %v5724_v62 = vld [vmem:[#allocation8 + $0x630] sm:$0xf] }
 0x190   :  { %v5789_v57 = vor.u32 %v6792_v49, %v5788_v54  ;;  %v6847_v39 = vld [vmem:[#allocation11 + $0xa8] sm:$0xff]  ;;  %v6776_v63 = vld [vmem:[#allocation8 + $0x66c] sm:$0xf0] }
 0x191   :  { %3070 = vmatpush.bf16.msrb.mxu0 %v5349_v12  ;;  %3096 = vmatpush.bf16.msrb.mxu2 %v5353_v13  ;;  %v2820_v44 = vpop.f32.mrf.mxu0  ;;  %v6593_v12 = vld [vmem:[#allocation8 + $0xbc] sm:$0xf]  ;;  %v5924_v49 = vld [vmem:[#allocation8 + $0x7b8] sm:$0xf] }
 0x192   :  { %2979 = vmatpush.bf16.msrb.mxu1 %v5845_v8  ;;  %3005 = vmatpush.bf16.msrb.mxu3 %v5849_v9  ;;  %v6719_v8 = vld [vmem:[#allocation8 + $0x4ac] sm:$0xf]  ;;  %v5030_v13 = vld [vmem:[#allocation8 + $0xf8] sm:$0xf0]  ;;  %v6768_v44 = vld [vmem:[#allocation8 + $0x634] sm:$0xf] }
 0x193   :  { %v5526_v9 = vld [vmem:[#allocation8 + $0x4e8] sm:$0xf0]  ;;  %v5862_v11 = vld [vmem:[#allocation8 + $0x778] sm:$0xf0] }
 0x194   :  { %v5529_v17 = vor.u32 %v6719_v8, %v5526_v9  ;;  %v6830_v8 = vld [vmem:[#allocation11 + $0x20] sm:$0xff] }
 0x195   :  { %3071 = vmatpush.bf16.msrb.mxu0 %v5285_v29  ;;  %3097 = vmatpush.bf16.msrb.mxu2 %v5289_v22  ;;  %v6577_v22 = vld [vmem:[#allocation8 + $0x3c] sm:$0xf]  ;;  %v6846_v9 = vld [vmem:[#allocation11 + $0xa0] sm:$0xff] }
 0x196   :  { %2980 = vmatpush.bf16.msrb.mxu1 %v5781_v23  ;;  %3006 = vmatpush.bf16.msrb.mxu3 %v5785_v24  ;;  %v5033_v23 = vor.u32 %v6593_v12, %v5030_v13  ;;  %v5462_v24 = vld [vmem:[#allocation8 + $0x468] sm:$0xf0]  ;;  %v6752_v12 = vld [vmem:[#allocation8 + $0x5b4] sm:$0xf] }
 0x197   :  { %v2846_v29 = vpop.f32.mrf.mxu2  ;;  %v5465_v37 = vor.u32 %v6703_v20, %v5462_v24  ;;  %v5662_v13 = vld [vmem:[#allocation8 + $0x5f0] sm:$0xf0]  ;;  %v6829_v20 = vld [vmem:[#allocation11 + $0x18] sm:$0xff] }
 0x198   :  { %v5665_v19 = vor.u32 %v6752_v12, %v5662_v13  ;;  %v5598_v29 = vld [vmem:[#allocation8 + $0x570] sm:$0xf0] }
 0x199   :  { %3072 = vmatpush.bf16.msrb.mxu0 %v5221_v1  ;;  %3098 = vmatpush.bf16.msrb.mxu2 %v5225_v46  ;;  %v6833_v1 = vld [vmem:[#allocation11 + $0x38] sm:$0xff] }
 0x19a   :  { %2981 = vmatpush.bf16.msrb.mxu1 %v5717_v41  ;;  %3007 = vmatpush.bf16.msrb.mxu3 %v5721_v27  ;;  %v4965_v41 = vor.u32 %v6585_v26, %v4964_v25  ;;  %v4969_v27 = vor.u32 %v6577_v22, %v4966_v30  ;;  %v6849_v46 = vld [vmem:[#allocation11 + $0xb8] sm:$0xff]  ;;  %v6744_v25 = vld [vmem:[#allocation8 + $0x56c] sm:$0xf0]  ;;  %v6736_v26 = vld [vmem:[#allocation8 + $0x534] sm:$0xf] }
 0x19b   :  { %v5601_v32 = vor.u32 %v6736_v26, %v5598_v29 }
 0x19d   :  { %3073 = vmatpush.bf16.msrb.mxu0 %v5157_v55  ;;  %3099 = vmatpush.bf16.msrb.mxu2 %v5161_v56  ;;  %v6784_v55 = vld [vmem:[#allocation8 + $0x6b4] sm:$0xf] }
 0x19e   :  { %2982 = vmatpush.bf16.msrb.mxu1 %v5653_v51  ;;  %3008 = vmatpush.bf16.msrb.mxu3 %v5657_v53  ;;  %v6832_v51 = vld [vmem:[#allocation11 + $0x30] sm:$0xff]  ;;  %v5790_v56 = vld [vmem:[#allocation8 + $0x6f0] sm:$0xf0] }
 0x19f   :  { %v6848_v53 = vld [vmem:[#allocation11 + $0xb0] sm:$0xff]  ;;  %v5793_v58 = vor.u32 %v6784_v55, %v5790_v56  ;;  %v6825_v56 = vld [vmem:[#allocation8 + $0x7f4] sm:$0xf0] }
 0x1a1   :  { %3074 = vmatpush.bf16.msrb.mxu0 %v5093_v5  ;;  %3100 = vmatpush.bf16.msrb.mxu2 %v5097_v7  ;;  %v5725_v5 = vor.u32 %v6776_v63, %v5724_v62 }
 0x1a2   :  { %2983 = vmatpush.bf16.msrb.mxu1 %v5589_v0  ;;  %3009 = vmatpush.bf16.msrb.mxu3 %v5593_v35  ;;  %v5726_v0 = vld [vmem:[#allocation8 + $0x670] sm:$0xf0]  ;;  %v7307_v35 = vld [vmem:[#allocation10] sm:$0xff] }
 0x1a3   :  { %v1394_v4 = vperm.slane %v7307_v35, 1  ;;  %v5729_v7 = vor.u32 %v6768_v44, %v5726_v0  ;;  %v6826_v44 = vld [vmem:[#allocation11] sm:$0xff] }
 0x1a4   :  { %v6842_v0 = vld [vmem:[#allocation11 + $0x80] sm:$0xff] }
 0x1a5   :  { %3075 = vmatpush.bf16.msrb.mxu0 %v5029_v21  ;;  %3101 = vmatpush.bf16.msrb.mxu2 %v5033_v23  ;;  %v6845_v21 = vld [vmem:[#allocation11 + $0x98] sm:$0xff]  ;;  %v5596_v23 = vld [vmem:[#allocation8 + $0x530] sm:$0xf] }
 0x1a6   :  { %2984 = vmatpush.bf16.msrb.mxu1 %v5525_v16  ;;  %3010 = vmatpush.bf16.msrb.mxu3 %v5529_v17  ;;  %v2741_v16 = vadd.f32 %v7289_v2, %v1394_v4  ;;  %v5597_v31 = vor.u32 %v6744_v25, %v5596_v23  ;;  %v5798_v23 = vld [vmem:[#allocation8 + $0x6f8] sm:$0xf0]  ;;  %v6881_v25 = vld [vmem:[#allocation11 + $0x1b8] sm:$0xff] }
 0x1a9   :  { %3076 = vmatpush.bf16.msrb.mxu0 %v4965_v41  ;;  %3102 = vmatpush.bf16.msrb.mxu2 %v4969_v27  ;;  %v7309_v3 = vpop.f32.mrf.mxu1  ;;  %v6720_v41 = vld [vmem:[#allocation8 + $0x4b4] sm:$0xf] }
 0x1aa   :  { %2985 = vmatpush.bf16.msrb.mxu1 %v5461_v36  ;;  %3011 = vmatpush.bf16.msrb.mxu3 %v5465_v37  ;;  %v5532_v36 = vld [vmem:[#allocation8 + $0x4b0] sm:$0xf]  ;;  %v5534_v27 = vld [vmem:[#allocation8 + $0x4f0] sm:$0xf0] }
 0x1ab   :  { %v6728_v37 = vld [vmem:[#allocation8 + $0x4ec] sm:$0xf0]  ;;  %v5537_v48 = vor.u32 %v6720_v41, %v5534_v27 }
 0x1ac   :  { %3077 = vmatmul.bf16.vlgmr.msrb.gmra.mxu0 %v7250_v28  ;;  %3103 = vmatmul.bf16.vlgmr.msrb.gmra.mxu2 %v7250_v28  ;;  %v7312_v28 = vpop.f32.mrf.mxu0 }
 0x1ad   :  { %4165 = vmatpush.bf16.msra.mxu0 %v6833_v1  ;;  %4191 = vmatpush.bf16.msra.mxu2 %v6849_v46  ;;  %v5533_v46 = vor.u32 %v6728_v37, %v5532_v36 }
 0x1ae   :  { %3030 = vmatpush.bf16.msra.mxu1 %v5917_v42  ;;  %3056 = vmatpush.bf16.msra.mxu3 %v5921_v43  ;;  %v1395_v42 = vperm.slane %v7307_v35, 2  ;;  %v1393_v43 = vperm.slane %v7307_v35, 0 }
 0x1af   :  { %2986 = vmatmul.bf16.vlgmr.msrb.gmra.mxu1 %v7271_v61  ;;  %3012 = vmatmul.bf16.vlgmr.msrb.gmra.mxu3 %v7271_v61  ;;  %v2753_v17 = vpop.f32.mrf.mxu3 }
 0x1b0   :  { %v7315_v24 = vadd.f32 %v2753_v17, %v2741_v16  ;;  %v2767_v55 = vadd.f32 %v7291_v47, %v1395_v42  ;;  %v5860_v47 = vld [vmem:[#allocation8 + $0x738] sm:$0xf] }
 0x1b1   :  { %4166 = vmatpush.bf16.msra.mxu0 %v6832_v51  ;;  %4192 = vmatpush.bf16.msra.mxu2 %v6848_v53  ;;  %v2729_v22 = vpop.f32.mrf.mxu1  ;;  %v5470_v51 = vld [vmem:[#allocation8 + $0x470] sm:$0xf0] }
 0x1b2   :  { %3031 = vmatpush.bf16.msra.mxu1 %v5853_v50  ;;  %3057 = vmatpush.bf16.msra.mxu3 %v5857_v15  ;;  %v7317_v30 = vpop.f32.mrf.mxu2  ;;  %v6712_v50 = vld [vmem:[#allocation8 + $0x46c] sm:$0xf0]  ;;  %v6704_v15 = vld [vmem:[#allocation8 + $0x434] sm:$0xf]  ;;  %v6863_v22 = vld [vmem:[#allocation11 + $0x128] sm:$0xff] }
 0x1b3   :  { %v5473_v62 = vor.u32 %v6704_v15, %v5470_v51  ;;  %v6861_v51 = vld [vmem:[#allocation11 + $0x118] sm:$0xff] }
 0x1b4   :  { %v2872_v2 = vpop.f32.mrf.mxu0 }
 0x1b5   :  { %4167 = vmatpush.bf16.msra.mxu0 %v6831_v59  ;;  %4193 = vmatpush.bf16.msra.mxu2 %v6847_v39  ;;  %v2715_v59 = vadd.f32 %v7287_v52, %v1393_v43  ;;  %v5469_v39 = vor.u32 %v6712_v50, %v5468_v6  ;;  %v5732_v2 = vld [vmem:[#allocation8 + $0x638] sm:$0xf]  ;;  %v6862_v43 = vld [vmem:[#allocation11 + $0x120] sm:$0xff] }
 0x1b6   :  { %3032 = vmatpush.bf16.msra.mxu1 %v5789_v57  ;;  %3058 = vmatpush.bf16.msra.mxu3 %v5793_v58  ;;  %v6817_v57 = vld [vmem:[#allocation8 + $0x7bc] sm:$0xf] }
 0x1b7   :  { %v2755_v1 = vpop.f32.mrf.mxu3  ;;  %v5926_v58 = vld [vmem:[#allocation8 + $0x7f8] sm:$0xf0]  ;;  %v2728_v4 = vadd.f32 %v7309_v3, %v2715_v59  ;;  %v5865_v3 = vor.u32 %v6801_v10, %v5862_v11 }
 0x1b8   :  { %v5668_v1 = vld [vmem:[#allocation8 + $0x5b8] sm:$0xf] }
 0x1b9   :  { %4168 = vmatpush.bf16.msra.mxu0 %v6830_v8  ;;  %4194 = vmatpush.bf16.msra.mxu2 %v6846_v9  ;;  %v2779_v53 = vpop.f32.mrf.mxu1  ;;  %v6865_v8 = vld [vmem:[#allocation11 + $0x138] sm:$0xff]  ;;  %v6809_v9 = vld [vmem:[#allocation8 + $0x774] sm:$0xf0]  ;;  %v3121_v13 = vpack.c.bf16 %v2728_v4, %v2728_v4  ;;  %v6860_v4 = vld [vmem:[#allocation11 + $0x110] sm:$0xff] }
 0x1ba   :  { %3033 = vmatpush.bf16.msra.mxu1 %v5725_v5  ;;  %3059 = vmatpush.bf16.msra.mxu3 %v5729_v7  ;;  %v2898_v54 = vpop.f32.mrf.mxu2  ;;  %v2780_v63 = vadd.f32 %v2779_v53, %v2767_v55  ;;  %v5925_v5 = vor.u32 %v6825_v56, %v5924_v49  ;;  %v5929_v7 = vor.u32 %v6817_v57, %v5926_v58  ;;  %v6879_v6 = vld [vmem:[#allocation11 + $0x1a8] sm:$0xff]  ;;  %v6878_v58 = vld [vmem:[#allocation11 + $0x1a0] sm:$0xff] }
 0x1bb   :  { %v5861_v17 = vor.u32 %v6809_v9, %v5860_v47  ;;  %v5604_v53 = vld [vmem:[#allocation8 + $0x538] sm:$0xf]  ;;  %v6737_v56 = vld [vmem:[#allocation8 + $0x53c] sm:$0xf]  ;;  %v6877_v47 = vld [vmem:[#allocation11 + $0x198] sm:$0xff]  ;;  %v1397_v9 = vperm.slane %v7307_v35, 4 }
 0x1bc   :  { %v3123_v12 = vpack.c.bf16 %v2780_v63, %v2780_v63  ;;  %v6745_v54 = vld [vmem:[#allocation8 + $0x574] sm:$0xf0]  ;;  %v5606_v57 = vld [vmem:[#allocation8 + $0x578] sm:$0xf0] }
 0x1bd   :  { %4169 = vmatpush.bf16.msra.mxu0 %v6829_v20  ;;  %4195 = vmatpush.bf16.msra.mxu2 %v6845_v21  ;;  %v6793_v20 = vld [vmem:[#allocation8 + $0x6f4] sm:$0xf0]  ;;  %v6785_v21 = vld [vmem:[#allocation8 + $0x6bc] sm:$0xf] }
 0x1be   :  { %3034 = vmatpush.bf16.msra.mxu1 %v5661_v18  ;;  %3060 = vmatpush.bf16.msra.mxu3 %v5665_v19  ;;  %v6864_v18 = vld [vmem:[#allocation11 + $0x130] sm:$0xff]  ;;  %v5796_v19 = vld [vmem:[#allocation8 + $0x6b8] sm:$0xf]  ;;  %v5801_v29 = vor.u32 %v6785_v21, %v5798_v23  ;;  %v2819_v21 = vadd.f32 %v7299_v38, %v1397_v9 }
 0x1bf   :  { %v7324_v52 = vpop.f32.mrf.mxu3  ;;  %v5797_v26 = vor.u32 %v6793_v20, %v5796_v19  ;;  %v6876_v19 = vld [vmem:[#allocation11 + $0x190] sm:$0xff] }
 0x1c0   :  { %v6856_v38 = vld [vmem:[#allocation11 + $0xf0] sm:$0xff] }
 0x1c1   :  { %4170 = vmatpush.bf16.msra.mxu0 %v6828_v33  ;;  %4196 = vmatpush.bf16.msra.mxu2 %v6844_v34  ;;  %v2781_v16 = vpop.f32.mrf.mxu1  ;;  %v5734_v33 = vld [vmem:[#allocation8 + $0x678] sm:$0xf0]  ;;  %v6880_v34 = vld [vmem:[#allocation11 + $0x1b0] sm:$0xff] }
 0x1c2   :  { %3035 = vmatpush.bf16.msra.mxu1 %v5597_v31  ;;  %3061 = vmatpush.bf16.msra.mxu3 %v5601_v32  ;;  %v6777_v31 = vld [vmem:[#allocation8 + $0x674] sm:$0xf0]  ;;  %v6769_v32 = vld [vmem:[#allocation8 + $0x63c] sm:$0xf] }
 0x1c3   :  { %v5733_v27 = vor.u32 %v6777_v31, %v5732_v2  ;;  %v5737_v42 = vor.u32 %v6769_v32, %v5734_v33  ;;  %v6713_v16 = vld [vmem:[#allocation8 + $0x474] sm:$0xf0]  ;;  %v6857_v2 = vld [vmem:[#allocation11 + $0xf8] sm:$0xff]  ;;  %v6840_v32 = vld [vmem:[#allocation11 + $0x70] sm:$0xff] }
 0x1c4   :  { %v6875_v31 = vld [vmem:[#allocation11 + $0x188] sm:$0xff]  ;;  %v6897_v33 = vld [vmem:[#allocation11 + $0x238] sm:$0xff] }
 0x1c5   :  { %4171 = vmatpush.bf16.msra.mxu0 %v6827_v14  ;;  %4197 = vmatpush.bf16.msra.mxu2 %v6843_v45  ;;  %v6753_v14 = vld [vmem:[#allocation8 + $0x5bc] sm:$0xf] }
 0x1c6   :  { %3036 = vmatpush.bf16.msra.mxu1 %v5533_v46  ;;  %3062 = vmatpush.bf16.msra.mxu3 %v5537_v48  ;;  %v6761_v46 = vld [vmem:[#allocation8 + $0x5f4] sm:$0xf0]  ;;  %v1398_v48 = vperm.slane %v7307_v35, 5  ;;  %v5670_v45 = vld [vmem:[#allocation8 + $0x5f8] sm:$0xf0] }
 0x1c7   :  { %v2807_v36 = vpop.f32.mrf.mxu3  ;;  %v5669_v50 = vor.u32 %v6761_v46, %v5668_v1  ;;  %v5673_v15 = vor.u32 %v6753_v14, %v5670_v45  ;;  %v6895_v14 = vld [vmem:[#allocation11 + $0x228] sm:$0xff] }
 0x1c8   :  { %v2845_v49 = vadd.f32 %v7301_v60, %v1398_v48  ;;  %v6721_v60 = vld [vmem:[#allocation8 + $0x4bc] sm:$0xf]  ;;  %v6874_v36 = vld [vmem:[#allocation11 + $0x180] sm:$0xff] }
 0x1c9   :  { %4172 = vmatpush.bf16.msra.mxu0 %v6826_v44  ;;  %4198 = vmatpush.bf16.msra.mxu2 %v6842_v0  ;;  %v7328_v37 = vpop.f32.mrf.mxu0  ;;  %v5605_v44 = vor.u32 %v6745_v54, %v5604_v53  ;;  %v5609_v0 = vor.u32 %v6737_v56, %v5606_v57  ;;  %v6838_v48 = vld [vmem:[#allocation11 + $0x60] sm:$0xff]  ;;  %v6853_v54 = vld [vmem:[#allocation11 + $0xd8] sm:$0xff] }
 0x1ca   :  { %3037 = vmatpush.bf16.msra.mxu1 %v5469_v39  ;;  %3063 = vmatpush.bf16.msra.mxu3 %v5473_v62  ;;  %v6894_v53 = vld [vmem:[#allocation11 + $0x220] sm:$0xff] }
 0x1cc   :  { %4173 = vmatmul.bf16.vlgmr.msra.gmra.mxu0 %v3121_v13  ;;  %4199 = vmatmul.bf16.vlgmr.msra.gmra.mxu2 %v3123_v12  ;;  %v7330_v41 = vpop.f32.mrf.mxu1  ;;  %v6859_v12 = vld [vmem:[#allocation11 + $0x108] sm:$0xff] }
 0x1cd   :  { %4217 = vmatpush.bf16.msrb.mxu0 %v6865_v8  ;;  %3038 = vmatmul.bf16.vlgmr.msra.gmra.mxu1 %v7271_v61  ;;  %v5542_v8 = vld [vmem:[#allocation8 + $0x4f8] sm:$0xf0]  ;;  %v5476_v13 = vld [vmem:[#allocation8 + $0x438] sm:$0xf] }
 0x1ce   :  { %3082 = vmatpush.bf16.msrb.mxu1 %v5925_v5  ;;  %3108 = vmatpush.bf16.msrb.mxu3 %v5929_v7  ;;  %v5540_v5 = vld [vmem:[#allocation8 + $0x4b8] sm:$0xf]  ;;  %v5545_v11 = vor.u32 %v6721_v60, %v5542_v8  ;;  %v5477_v23 = vor.u32 %v6713_v16, %v5476_v13  ;;  %v6910_v8 = vld [vmem:[#allocation11 + $0x2a0] sm:$0xff]  ;;  %v6873_v13 = vld [vmem:[#allocation11 + $0x178] sm:$0xff] }
 0x1cf   :  { %3064 = vmatmul.bf16.vlgmr.msra.gmra.mxu3 %v7271_v61  ;;  %4243 = vmatpush.bf16.msrb.mxu2 %v6881_v25  ;;  %v7334_v55 = vpop.f32.mrf.mxu2  ;;  %v6729_v7 = vld [vmem:[#allocation8 + $0x4f4] sm:$0xf0] }
 0x1d0   :  { %v5541_v10 = vor.u32 %v6729_v7, %v5540_v5  ;;  %v6892_v5 = vld [vmem:[#allocation11 + $0x210] sm:$0xff]  ;;  %v6851_v7 = vld [vmem:[#allocation11 + $0xc8] sm:$0xff] }
 0x1d1   :  { %4218 = vmatpush.bf16.msrb.mxu0 %v6864_v18  ;;  %v2924_v62 = vpop.f32.mrf.mxu0  ;;  %v5478_v18 = vld [vmem:[#allocation8 + $0x478] sm:$0xf0] }
 0x1d2   :  { %3083 = vmatpush.bf16.msrb.mxu1 %v5861_v17  ;;  %3109 = vmatpush.bf16.msrb.mxu3 %v5865_v3  ;;  %v2857_v59 = vpop.f32.mrf.mxu3  ;;  %v6705_v3 = vld [vmem:[#allocation8 + $0x43c] sm:$0xf] }
 0x1d3   :  { %4244 = vmatpush.bf16.msrb.mxu2 %v6880_v34  ;;  %v7336_v39 = vadd.f32 %v2857_v59, %v2845_v49  ;;  %v5481_v25 = vor.u32 %v6705_v3, %v5478_v18  ;;  %v6912_v49 = vld [vmem:[#allocation11 + $0x2b0] sm:$0xff]  ;;  %v6893_v59 = vld [vmem:[#allocation11 + $0x218] sm:$0xff]  ;;  %v6890_v18 = vld [vmem:[#allocation11 + $0x200] sm:$0xff] }
 0x1d4   :  { %v2833_v63 = vpop.f32.mrf.mxu1  ;;  %v6909_v3 = vld [vmem:[#allocation11 + $0x298] sm:$0xff] }
 0x1d5   :  { %4219 = vmatpush.bf16.msrb.mxu0 %v6863_v22  ;;  %v2832_v22 = vadd.f32 %v7330_v41, %v2819_v21  ;;  %v6839_v41 = vld [vmem:[#allocation11 + $0x68] sm:$0xff]  ;;  %v6852_v63 = vld [vmem:[#allocation11 + $0xd0] sm:$0xff]  ;;  %v7356_v21 = vld [vmem:[#allocation10 + $0x8] sm:$0xff] }
 0x1d6   :  { %3084 = vmatpush.bf16.msrb.mxu1 %v5797_v26  ;;  %3110 = vmatpush.bf16.msrb.mxu3 %v5801_v29  ;;  %v6858_v26 = vld [vmem:[#allocation11 + $0x100] sm:$0xff]  ;;  %v6841_v29 = vld [vmem:[#allocation11 + $0x78] sm:$0xff] }
 0x1d7   :  { %4245 = vmatpush.bf16.msrb.mxu2 %v6879_v6  ;;  %v2950_v17 = vpop.f32.mrf.mxu2  ;;  %v3125_v34 = vpack.c.bf16 %v2832_v22, %v2832_v22  ;;  %v6854_v6 = vld [vmem:[#allocation11 + $0xe0] sm:$0xff] }
 0x1d8   :  { %v6889_v17 = vld [vmem:[#allocation11 + $0x1f8] sm:$0xff] }
 0x1d9   :  { %4220 = vmatpush.bf16.msrb.mxu0 %v6862_v43  ;;  %v6855_v43 = vld [vmem:[#allocation11 + $0xe8] sm:$0xff] }
 0x1da   :  { %3085 = vmatpush.bf16.msrb.mxu1 %v5733_v27  ;;  %3111 = vmatpush.bf16.msrb.mxu3 %v5737_v42  ;;  %v2859_v20 = vpop.f32.mrf.mxu3  ;;  %v1399_v27 = vperm.slane %v7307_v35, 6  ;;  %v6896_v42 = vld [vmem:[#allocation11 + $0x230] sm:$0xff] }
 0x1db   :  { %4246 = vmatpush.bf16.msrb.mxu2 %v6878_v58  ;;  %v6836_v58 = vld [vmem:[#allocation11 + $0x50] sm:$0xff] }
 0x1dc   :  { %v2871_v1 = vadd.f32 %v7312_v28, %v1399_v27 }
 0x1dd   :  { %4221 = vmatpush.bf16.msrb.mxu0 %v6861_v51  ;;  %v6837_v51 = vld [vmem:[#allocation11 + $0x58] sm:$0xff] }
 0x1de   :  { %3086 = vmatpush.bf16.msrb.mxu1 %v5669_v50  ;;  %3112 = vmatpush.bf16.msrb.mxu3 %v5673_v15  ;;  %v6913_v50 = vld [vmem:[#allocation11 + $0x2b8] sm:$0xff] }
 0x1df   :  { %4247 = vmatpush.bf16.msrb.mxu2 %v6877_v47 }
 0x1e1   :  { %4222 = vmatpush.bf16.msrb.mxu0 %v6860_v4  ;;  %v6835_v4 = vld [vmem:[#allocation11 + $0x48] sm:$0xff] }
 0x1e2   :  { %3087 = vmatpush.bf16.msrb.mxu1 %v5605_v44  ;;  %3113 = vmatpush.bf16.msrb.mxu3 %v5609_v0  ;;  %v6911_v44 = vld [vmem:[#allocation11 + $0x2a8] sm:$0xff]  ;;  %v1396_v0 = vperm.slane %v7307_v35, 3 }
 0x1e3   :  { %4248 = vmatpush.bf16.msrb.mxu2 %v6876_v19  ;;  %v3122_v19 = vpack.c.bf16 %v7315_v24, %v7315_v24  ;;  %v6907_v24 = vld [vmem:[#allocation11 + $0x288] sm:$0xff] }
 0x1e4   :  { %v2793_v9 = vadd.f32 %v7293_v40, %v1396_v0  ;;  %v6872_v40 = vld [vmem:[#allocation11 + $0x170] sm:$0xff]  ;;  %v3126_v0 = vpack.c.bf16 %v7336_v39, %v7336_v39  ;;  %v6902_v39 = vld [vmem:[#allocation11 + $0x260] sm:$0xff] }
 0x1e5   :  { %4223 = vmatpush.bf16.msrb.mxu0 %v6859_v12  ;;  %v6850_v12 = vld [vmem:[#allocation11 + $0xc0] sm:$0xff] }
 0x1e6   :  { %3088 = vmatpush.bf16.msrb.mxu1 %v5541_v10  ;;  %3114 = vmatpush.bf16.msrb.mxu3 %v5545_v11  ;;  %v6834_v10 = vld [vmem:[#allocation11 + $0x40] sm:$0xff]  ;;  %v6891_v11 = vld [vmem:[#allocation11 + $0x208] sm:$0xff]  ;;  %v2806_v16 = vadd.f32 %v7324_v52, %v2793_v9  ;;  %v1401_v52 = vperm.slane %v7356_v21, 0 }
 0x1e7   :  { %4249 = vmatpush.bf16.msrb.mxu2 %v6875_v31 }
 0x1e8   :  { %v3124_v20 = vpack.c.bf16 %v2806_v16, %v2806_v16  ;;  %v2923_v22 = vadd.f32 %v7328_v37, %v1401_v52  ;;  %v6928_v37 = vld [vmem:[#allocation11 + $0x330] sm:$0xff]  ;;  %v6943_v52 = vld [vmem:[#allocation11 + $0x3a8] sm:$0xff] }
 0x1e9   :  { %4224 = vmatpush.bf16.msrb.mxu0 %v6858_v26  ;;  %v6871_v26 = vld [vmem:[#allocation11 + $0x168] sm:$0xff] }
 0x1ea   :  { %3089 = vmatpush.bf16.msrb.mxu1 %v5477_v23  ;;  %3115 = vmatpush.bf16.msrb.mxu3 %v5481_v25  ;;  %v6888_v23 = vld [vmem:[#allocation11 + $0x1f0] sm:$0xff] }
 0x1eb   :  { %4250 = vmatpush.bf16.msrb.mxu2 %v6874_v36  ;;  %v6908_v25 = vld [vmem:[#allocation11 + $0x290] sm:$0xff]  ;;  %v6929_v36 = vld [vmem:[#allocation11 + $0x338] sm:$0xff] }
 0x1ec   :  { %4225 = vmatmul.bf16.vlgmr.msrb.gmra.mxu0 %v3125_v34  ;;  %v2883_v46 = vpop.f32.mrf.mxu1 }
 0x1ed   :  { %3090 = vmatmul.bf16.vlgmr.msrb.gmra.mxu1 %v7271_v61  ;;  %3116 = vmatmul.bf16.vlgmr.msrb.gmra.mxu3 %v7271_v61  ;;  %v2884_v45 = vadd.f32 %v2883_v46, %v2871_v1  ;;  %v7345_v61 = vpop.f32.mrf.mxu0  ;;  %v6868_v46 = vld [vmem:[#allocation11 + $0x150] sm:$0xff] }
 0x1ee   :  { %4178 = vmatpush.bf16.msra.mxu1 %v6841_v29  ;;  %4204 = vmatpush.bf16.msra.mxu3 %v6857_v2  ;;  %v6887_v29 = vld [vmem:[#allocation11 + $0x1e8] sm:$0xff]  ;;  %v6870_v2 = vld [vmem:[#allocation11 + $0x160] sm:$0xff] }
 0x1ef   :  { %4269 = vmatpush.bf16.msra.mxu0 %v6897_v33  ;;  %v3127_v15 = vpack.c.bf16 %v2884_v45, %v2884_v45  ;;  %4295 = vmatpush.bf16.msra.mxu2 %v6913_v50  ;;  %v7349_v56 = vpop.f32.mrf.mxu2  ;;  %v6906_v33 = vld [vmem:[#allocation11 + $0x280] sm:$0xff]  ;;  %v1400_v50 = vperm.slane %v7307_v35, 7  ;;  %v6925_v35 = vld [vmem:[#allocation11 + $0x318] sm:$0xff] }
 0x1f1   :  { %4251 = vmatmul.bf16.vlgmr.msrb.gmra.mxu2 %v3127_v15  ;;  %v6867_v15 = vld [vmem:[#allocation11 + $0x148] sm:$0xff] }
 0x1f2   :  { %4179 = vmatpush.bf16.msra.mxu1 %v6840_v32  ;;  %4205 = vmatpush.bf16.msra.mxu3 %v6856_v38  ;;  %v7347_v28 = vpop.f32.mrf.mxu3  ;;  %v6886_v32 = vld [vmem:[#allocation11 + $0x1e0] sm:$0xff] }
 0x1f3   :  { %4270 = vmatpush.bf16.msra.mxu0 %v6896_v42  ;;  %4296 = vmatpush.bf16.msra.mxu2 %v6912_v49  ;;  %v6885_v42 = vld [vmem:[#allocation11 + $0x1d8] sm:$0xff]  ;;  %v2897_v49 = vadd.f32 %v7317_v30, %v1400_v50 }
 0x1f4   :  { %v2885_v57 = vpop.f32.mrf.mxu1 }
 0x1f5   :  { %v2976_v62 = vpop.f32.mrf.mxu0 }
 0x1f6   :  { %4180 = vmatpush.bf16.msra.mxu1 %v6839_v41  ;;  %4206 = vmatpush.bf16.msra.mxu3 %v6855_v43  ;;  %v6869_v41 = vld [vmem:[#allocation11 + $0x158] sm:$0xff] }
 0x1f7   :  { %4271 = vmatpush.bf16.msra.mxu0 %v6895_v14  ;;  %4297 = vmatpush.bf16.msra.mxu2 %v6911_v44  ;;  %v3002_v47 = vpop.f32.mrf.mxu2  ;;  %v6884_v14 = vld [vmem:[#allocation11 + $0x1d0] sm:$0xff]  ;;  %v6905_v62 = vld [vmem:[#allocation11 + $0x278] sm:$0xff] }
 0x1f8   :  { %v6921_v44 = vld [vmem:[#allocation11 + $0x2f8] sm:$0xff]  ;;  %v6923_v47 = vld [vmem:[#allocation11 + $0x308] sm:$0xff] }
 0x1fa   :  { %4181 = vmatpush.bf16.msra.mxu1 %v6838_v48  ;;  %4207 = vmatpush.bf16.msra.mxu3 %v6854_v6  ;;  %v2911_v60 = vpop.f32.mrf.mxu3  ;;  %v6927_v6 = vld [vmem:[#allocation11 + $0x328] sm:$0xff] }
 0x1fb   :  { %4272 = vmatpush.bf16.msra.mxu0 %v6894_v53  ;;  %4298 = vmatpush.bf16.msra.mxu2 %v6910_v8  ;;  %v6926_v53 = vld [vmem:[#allocation11 + $0x320] sm:$0xff]  ;;  %v6903_v60 = vld [vmem:[#allocation11 + $0x268] sm:$0xff] }
 0x1fc   :  { %v6919_v8 = vld [vmem:[#allocation11 + $0x2e8] sm:$0xff] }
 0x1fe   :  { %4182 = vmatpush.bf16.msra.mxu1 %v6837_v51  ;;  %4208 = vmatpush.bf16.msra.mxu3 %v6853_v54  ;;  %v6883_v51 = vld [vmem:[#allocation11 + $0x1c8] sm:$0xff] }
 0x1ff   :  { %4273 = vmatpush.bf16.msra.mxu0 %v6893_v59  ;;  %4299 = vmatpush.bf16.msra.mxu2 %v6909_v3  ;;  %v6882_v59 = vld [vmem:[#allocation11 + $0x1c0] sm:$0xff]  ;;  %v6901_v3 = vld [vmem:[#allocation11 + $0x258] sm:$0xff] }
 0x202   :  { %4183 = vmatpush.bf16.msra.mxu1 %v6836_v58  ;;  %4209 = vmatpush.bf16.msra.mxu3 %v6852_v63  ;;  %v6866_v58 = vld [vmem:[#allocation11 + $0x140] sm:$0xff]  ;;  %v2910_v63 = vadd.f32 %v7347_v28, %v2897_v49  ;;  %v1403_v28 = vperm.slane %v7356_v21, 2 }
 0x203   :  { %4274 = vmatpush.bf16.msra.mxu0 %v6892_v5  ;;  %4300 = vmatpush.bf16.msra.mxu2 %v6908_v25  ;;  %v6920_v5 = vld [vmem:[#allocation11 + $0x2f0] sm:$0xff]  ;;  %v6934_v49 = vld [vmem:[#allocation11 + $0x360] sm:$0xff] }
 0x204   :  { %v3128_v30 = vpack.c.bf16 %v2910_v63, %v2910_v63  ;;  %v2975_v9 = vadd.f32 %v7345_v61, %v1403_v28  ;;  %v6900_v61 = vld [vmem:[#allocation11 + $0x250] sm:$0xff]  ;;  %v1406_v28 = vperm.slane %v7356_v21, 5 }
 0x205   :  { %v6916_v25 = vld [vmem:[#allocation11 + $0x2d0] sm:$0xff] }
 0x206   :  { %4184 = vmatpush.bf16.msra.mxu1 %v6835_v4  ;;  %4210 = vmatpush.bf16.msra.mxu3 %v6851_v7  ;;  %v6904_v4 = vld [vmem:[#allocation11 + $0x270] sm:$0xff] }
 0x207   :  { %4275 = vmatpush.bf16.msra.mxu0 %v6891_v11  ;;  %4301 = vmatpush.bf16.msra.mxu2 %v6907_v24  ;;  %v6924_v7 = vld [vmem:[#allocation11 + $0x310] sm:$0xff]  ;;  %v6922_v11 = vld [vmem:[#allocation11 + $0x300] sm:$0xff] }
 0x209   :  { %v7360_v38 = vpop.f32.mrf.mxu0 }
 0x20a   :  { %4185 = vmatpush.bf16.msra.mxu1 %v6834_v10  ;;  %4211 = vmatpush.bf16.msra.mxu3 %v6850_v12  ;;  %v6918_v10 = vld [vmem:[#allocation11 + $0x2e0] sm:$0xff] }
 0x20b   :  { %4276 = vmatpush.bf16.msra.mxu0 %v6890_v18  ;;  %4302 = vmatpush.bf16.msra.mxu2 %v6906_v33 }
 0x20c   :  { %v2935_v31 = vpop.f32.mrf.mxu1 }
 0x20d   :  { %4186 = vmatmul.bf16.vlgmr.msra.gmra.mxu1 %v3122_v19  ;;  %4212 = vmatmul.bf16.vlgmr.msra.gmra.mxu3 %v3124_v20  ;;  %v2936_v34 = vadd.f32 %v2935_v31, %v2923_v22  ;;  %v6917_v19 = vld [vmem:[#allocation11 + $0x2d8] sm:$0xff]  ;;  %v1404_v22 = vperm.slane %v7356_v21, 3  ;;  %v6915_v31 = vld [vmem:[#allocation11 + $0x2c8] sm:$0xff] }
 0x20e   :  { %4230 = vmatpush.bf16.msrb.mxu1 %v6873_v13  ;;  %4256 = vmatpush.bf16.msrb.mxu3 %v6889_v17  ;;  %v6945_v13 = vld [vmem:[#allocation11 + $0x3b8] sm:$0xff] }
 0x20f   :  { %v3129_v27 = vpack.c.bf16 %v2936_v34, %v2936_v34  ;;  %4321 = vmatpush.bf16.msrb.mxu0 %v6929_v36  ;;  %v7364_v1 = vpop.f32.mrf.mxu2  ;;  %4347 = vmatpush.bf16.msrb.mxu2 %v6945_v13  ;;  %v3001_v34 = vadd.f32 %v7349_v56, %v1404_v22  ;;  %v6946_v13 = vld [vmem:[#allocation11 + $0x3c0] sm:$0xff] }
 0x211   :  { %4277 = vmatmul.bf16.vlgmr.msra.gmra.mxu0 %v3129_v27  ;;  %v3028_v45 = vpop.f32.mrf.mxu0  ;;  %v6898_v27 = vld [vmem:[#allocation11 + $0x240] sm:$0xff] }
 0x212   :  { %4231 = vmatpush.bf16.msrb.mxu1 %v6872_v40  ;;  %4257 = vmatpush.bf16.msrb.mxu3 %v6888_v23  ;;  %v7362_v43 = vpop.f32.mrf.mxu3  ;;  %v6944_v40 = vld [vmem:[#allocation11 + $0x3b0] sm:$0xff]  ;;  %v6953_v45 = vld [vmem:[#allocation11 + $0x3f8] sm:$0xff] }
 0x213   :  { %4322 = vmatpush.bf16.msrb.mxu0 %v6928_v37  ;;  %4348 = vmatpush.bf16.msrb.mxu2 %v6944_v40  ;;  %v6914_v37 = vld [vmem:[#allocation11 + $0x2c0] sm:$0xff] }
 0x214   :  { %v2937_v48 = vpop.f32.mrf.mxu1 }
 0x215   :  { %v6941_v48 = vld [vmem:[#allocation11 + $0x398] sm:$0xff] }
 0x216   :  { %4232 = vmatpush.bf16.msrb.mxu1 %v6871_v26  ;;  %4258 = vmatpush.bf16.msrb.mxu3 %v6887_v29  ;;  %v1402_v29 = vperm.slane %v7356_v21, 1 }
 0x217   :  { %4323 = vmatpush.bf16.msrb.mxu0 %v6927_v6  ;;  %v3054_v57 = vpop.f32.mrf.mxu2  ;;  %4349 = vmatpush.bf16.msrb.mxu2 %v6943_v52  ;;  %v6940_v6 = vld [vmem:[#allocation11 + $0x390] sm:$0xff] }
 0x218   :  { %v2949_v33 = vadd.f32 %v7334_v55, %v1402_v29  ;;  %v6936_v55 = vld [vmem:[#allocation11 + $0x370] sm:$0xff] }
 0x21a   :  { %4233 = vmatpush.bf16.msrb.mxu1 %v6870_v2  ;;  %4259 = vmatpush.bf16.msrb.mxu3 %v6886_v32  ;;  %v2963_v54 = vpop.f32.mrf.mxu3  ;;  %v6899_v2 = vld [vmem:[#allocation11 + $0x248] sm:$0xff]  ;;  %v6942_v32 = vld [vmem:[#allocation11 + $0x3a0] sm:$0xff] }
 0x21b   :  { %4324 = vmatpush.bf16.msrb.mxu0 %v6926_v53  ;;  %4350 = vmatpush.bf16.msrb.mxu2 %v6942_v32  ;;  %v1405_v53 = vperm.slane %v7356_v21, 4  ;;  %v6951_v54 = vld [vmem:[#allocation11 + $0x3e8] sm:$0xff] }
 0x21d   :  { %v3027_v57 = vadd.f32 %v7360_v38, %v1405_v53 }
 0x21e   :  { %4234 = vmatpush.bf16.msrb.mxu1 %v6869_v41  ;;  %4260 = vmatpush.bf16.msrb.mxu3 %v6885_v42  ;;  %v2962_v41 = vadd.f32 %v7362_v43, %v2949_v33  ;;  %v6939_v43 = vld [vmem:[#allocation11 + $0x388] sm:$0xff] }
 0x21f   :  { %4325 = vmatpush.bf16.msrb.mxu0 %v6925_v35  ;;  %4351 = vmatpush.bf16.msrb.mxu2 %v6941_v48  ;;  %v6933_v35 = vld [vmem:[#allocation11 + $0x358] sm:$0xff] }
 0x220   :  { %v3130_v50 = vpack.c.bf16 %v2962_v41, %v2962_v41 }
 0x222   :  { %4235 = vmatpush.bf16.msrb.mxu1 %v6868_v46  ;;  %4261 = vmatpush.bf16.msrb.mxu3 %v6884_v14  ;;  %v6937_v46 = vld [vmem:[#allocation11 + $0x378] sm:$0xff] }
 0x223   :  { %4326 = vmatpush.bf16.msrb.mxu0 %v6924_v7  ;;  %4352 = vmatpush.bf16.msrb.mxu2 %v6940_v6  ;;  %v6948_v7 = vld [vmem:[#allocation11 + $0x3d0] sm:$0xff] }
 0x226   :  { %4236 = vmatpush.bf16.msrb.mxu1 %v6867_v15  ;;  %4262 = vmatpush.bf16.msrb.mxu3 %v6883_v51  ;;  %v6952_v15 = vld [vmem:[#allocation11 + $0x3f0] sm:$0xff]  ;;  %v6935_v51 = vld [vmem:[#allocation11 + $0x368] sm:$0xff] }
 0x227   :  { %4327 = vmatpush.bf16.msrb.mxu0 %v6923_v47  ;;  %4353 = vmatpush.bf16.msrb.mxu2 %v6939_v43  ;;  %v6931_v47 = vld [vmem:[#allocation11 + $0x348] sm:$0xff] }
 0x229   :  { %v7373_v17 = vpop.f32.mrf.mxu0 }
 0x22a   :  { %4237 = vmatpush.bf16.msrb.mxu1 %v6866_v58  ;;  %4263 = vmatpush.bf16.msrb.mxu3 %v6882_v59  ;;  %v6950_v58 = vld [vmem:[#allocation11 + $0x3e0] sm:$0xff] }
 0x22b   :  { %4328 = vmatpush.bf16.msrb.mxu0 %v6922_v11  ;;  %v6938_v59 = vld [vmem:[#allocation11 + $0x380] sm:$0xff] }
 0x22c   :  { %v2987_v12 = vpop.f32.mrf.mxu1  ;;  %4354 = vmatpush.bf16.msrb.mxu2 %v6938_v59 }
 0x22d   :  { %4238 = vmatmul.bf16.vlgmr.msrb.gmra.mxu1 %v3126_v0  ;;  %4264 = vmatmul.bf16.vlgmr.msrb.gmra.mxu3 %v3128_v30  ;;  %v2988_v16 = vadd.f32 %v2987_v12, %v2975_v9  ;;  %v6932_v30 = vld [vmem:[#allocation11 + $0x350] sm:$0xff]  ;;  %v3053_v9 = vadd.f32 %v7364_v1, %v1406_v28 }
 0x22e   :  { %4282 = vmatpush.bf16.msra.mxu1 %v6905_v62  ;;  %4308 = vmatpush.bf16.msra.mxu3 %v6921_v44 }
 0x22f   :  { %v3131_v18 = vpack.c.bf16 %v2988_v16, %v2988_v16  ;;  %v7375_v23 = vpop.f32.mrf.mxu2 }
 0x231   :  { %4303 = vmatmul.bf16.vlgmr.msra.gmra.mxu2 %v3131_v18  ;;  %v3080_v24 = vpop.f32.mrf.mxu0  ;;  %v1407_v18 = vperm.slane %v7356_v21, 6 }
 0x232   :  { %4283 = vmatpush.bf16.msra.mxu1 %v6904_v4  ;;  %4309 = vmatpush.bf16.msra.mxu3 %v6920_v5  ;;  %v3013_v20 = vpop.f32.mrf.mxu3  ;;  %v6949_v4 = vld [vmem:[#allocation11 + $0x3d8] sm:$0xff] }
 0x233   :  { %v3014_v14 = vadd.f32 %v3013_v20, %v3001_v34  ;;  %v1408_v20 = vperm.slane %v7356_v21, 7 }
 0x234   :  { %v2989_v26 = vpop.f32.mrf.mxu1 }
 0x235   :  { %v3132_v56 = vpack.c.bf16 %v3014_v14, %v3014_v14  ;;  %v3105_v52 = vadd.f32 %v7375_v23, %v1408_v20 }
 0x236   :  { %4284 = vmatpush.bf16.msra.mxu1 %v6903_v60  ;;  %4310 = vmatpush.bf16.msra.mxu3 %v6919_v8 }
 0x237   :  { %v3106_v42 = vpop.f32.mrf.mxu2 }
 0x23a   :  { %4285 = vmatpush.bf16.msra.mxu1 %v6902_v39  ;;  %4311 = vmatpush.bf16.msra.mxu3 %v6918_v10  ;;  %v3015_v36 = vpop.f32.mrf.mxu3  ;;  %v6947_v39 = vld [vmem:[#allocation11 + $0x3c8] sm:$0xff]  ;;  %v6930_v10 = vld [vmem:[#allocation11 + $0x340] sm:$0xff] }
 0x23e   :  { %4286 = vmatpush.bf16.msra.mxu1 %v6901_v3  ;;  %4312 = vmatpush.bf16.msra.mxu3 %v6917_v19  ;;  %v3079_v19 = vadd.f32 %v7373_v17, %v1407_v18  ;;  %v6966_v17 = vld [vmem:[%s7402_s6] ss:$0 sm:$0xff]  ;;  %s7156_s6 = smov [#allocation13]  }
 0x23f   :  { %s4379_s9 = sshll.u32 %s7156_s6, 4  ;;  %s4380_s9 = int_to_ptr.vmem [resolvable:$true] %s4379_s9 }
 0x242   :  { %4287 = vmatpush.bf16.msra.mxu1 %v6900_v61  ;;  %4313 = vmatpush.bf16.msra.mxu3 %v6916_v25 }
 0x246   :  { %4288 = vmatpush.bf16.msra.mxu1 %v6899_v2  ;;  %4314 = vmatpush.bf16.msra.mxu3 %v6915_v31 }
 0x249   :  { %v4174_v44 = vpop.f32.mrf.mxu0 }
 0x24a   :  { %4289 = vmatpush.bf16.msra.mxu1 %v6898_v27  ;;  %4315 = vmatpush.bf16.msra.mxu3 %v6914_v37  ;;  %v3039_v62 = vpop.f32.mrf.mxu1  ;;  %v4175_v21 = vadd.f32 %v6966_v17, %v4174_v44 }
 0x24b   :  { %v3040_v63 = vadd.f32 %v3039_v62, %v3027_v57 }
 0x24d   :  { %4290 = vmatmul.bf16.vlgmr.msra.gmra.mxu1 %v3130_v50  ;;  %4316 = vmatmul.bf16.vlgmr.msra.gmra.mxu3 %v3132_v56  ;;  %v3133_v0 = vpack.c.bf16 %v3040_v63, %v3040_v63 }
 0x24e   :  { %4334 = vmatpush.bf16.msrb.mxu1 %v6937_v46  ;;  %4360 = vmatpush.bf16.msrb.mxu3 %v6953_v45 }
 0x24f   :  { %4329 = vmatmul.bf16.vlgmr.msrb.gmra.mxu0 %v3133_v0  ;;  %v4200_v60 = vpop.f32.mrf.mxu2 }
 0x251   :  { %v4176_v8 = vpop.f32.mrf.mxu0 }
 0x252   :  { %4335 = vmatpush.bf16.msrb.mxu1 %v6936_v55  ;;  %4361 = vmatpush.bf16.msrb.mxu3 %v6952_v15  ;;  %v3065_v5 = vpop.f32.mrf.mxu3  ;;  %v3041_v38 = vpop.f32.mrf.mxu1 }
 0x253   :  { %v3066_v11 = vadd.f32 %v3065_v5, %v3053_v9 }
 0x255   :  { %v3134_v3 = vpack.c.bf16 %v3066_v11, %v3066_v11 }
 0x256   :  { %4336 = vmatpush.bf16.msrb.mxu1 %v6935_v51  ;;  %4362 = vmatpush.bf16.msrb.mxu3 %v6951_v54 }
 0x257   :  { %v4202_v16 = vpop.f32.mrf.mxu2 }
 0x25a   :  { %4337 = vmatpush.bf16.msrb.mxu1 %v6934_v49  ;;  %4363 = vmatpush.bf16.msrb.mxu3 %v6950_v58  ;;  %v3067_v12 = vpop.f32.mrf.mxu3 }
 0x25e   :  { %4338 = vmatpush.bf16.msrb.mxu1 %v6933_v35  ;;  %4364 = vmatpush.bf16.msrb.mxu3 %v6949_v4 }
 0x262   :  { %4339 = vmatpush.bf16.msrb.mxu1 %v6932_v30  ;;  %4365 = vmatpush.bf16.msrb.mxu3 %v6948_v7 }
 0x266   :  { %4340 = vmatpush.bf16.msrb.mxu1 %v6931_v47  ;;  %4366 = vmatpush.bf16.msrb.mxu3 %v6947_v39 }
 0x269   :  { %v4226_v1 = vpop.f32.mrf.mxu0 }
 0x26a   :  { %4341 = vmatpush.bf16.msrb.mxu1 %v6930_v10  ;;  %4367 = vmatpush.bf16.msrb.mxu3 %v6946_v13  ;;  %v3091_v40 = vpop.f32.mrf.mxu1 }
 0x26b   :  { %v3092_v61 = vadd.f32 %v3091_v40, %v3079_v19 }
 0x26d   :  { %4342 = vmatmul.bf16.vlgmr.msrb.gmra.mxu1 %v3134_v3  ;;  %v3135_v25 = vpack.c.bf16 %v3092_v61, %v3092_v61 }
 0x26f   :  { %4355 = vmatmul.bf16.vlgmr.msrb.gmra.mxu2 %v3135_v25 }
 0x270   :  { %v3117_v26 = vpop.f32.mrf.mxu3 }
 0x271   :  { %v3118_v29 = vadd.f32 %v3117_v26, %v3105_v52  ;;  %v4228_v2 = vpop.f32.mrf.mxu0 }
 0x272   :  { %v3093_v24 = vpop.f32.mrf.mxu1 }
 0x273   :  { %v3136_v22 = vpack.c.bf16 %v3118_v29, %v3118_v29 }
 0x274   :  { %v4252_v32 = vpop.f32.mrf.mxu2 }
 0x275   :  { %4368 = vmatmul.bf16.vlgmr.msrb.gmra.mxu3 %v3136_v22 }
 0x278   :  { %v3119_v31 = vpop.f32.mrf.mxu3 }
 0x27c   :  { %v4254_v33 = vpop.f32.mrf.mxu2 }
 0x28a   :  { %v4187_v34 = vpop.f32.mrf.mxu1 }
 0x28b   :  { %v4188_v36 = vadd.f32 %v4187_v34, %v4175_v21 }
 0x28d   :  { %v4201_v27 = vadd.f32 %v4200_v60, %v4188_v36 }
 0x28e   :  { %v4278_v46 = vpop.f32.mrf.mxu0 }
 0x290   :  { %v4213_v41 = vpop.f32.mrf.mxu3 }
 0x291   :  { %v4214_v23 = vadd.f32 %v4213_v41, %v4201_v27 }
 0x292   :  { %v4189_v42 = vpop.f32.mrf.mxu1 }
 0x293   :  { %v4227_v37 = vadd.f32 %v4226_v1, %v4214_v23 }
 0x296   :  { %v4280_v14 = vpop.f32.mrf.mxu0 }
 0x298   :  { %v4215_v48 = vpop.f32.mrf.mxu3 }
 0x2aa   :  { %v4239_v45 = vpop.f32.mrf.mxu1 }
 0x2ab   :  { %v4240_v6 = vadd.f32 %v4239_v45, %v4227_v37 }
 0x2ad   :  { %v4253_v50 = vadd.f32 %v4252_v32, %v4240_v6 }
 0x2b0   :  { %v4265_v55 = vpop.f32.mrf.mxu3 }
 0x2b1   :  { %v4266_v56 = vadd.f32 %v4265_v55, %v4253_v50 }
 0x2b2   :  { %v4241_v15 = vpop.f32.mrf.mxu1 }
 0x2b3   :  { %v4279_v43 = vadd.f32 %v4278_v46, %v4266_v56 }
 0x2b4   :  { %v4304_v53 = vpop.f32.mrf.mxu2 }
 0x2b8   :  { %v4267_v51 = vpop.f32.mrf.mxu3 }
 0x2bc   :  { %v4306_v54 = vpop.f32.mrf.mxu2 }
 0x2ca   :  { %v4291_v49 = vpop.f32.mrf.mxu1 }
 0x2cb   :  { %v4292_v0 = vadd.f32 %v4291_v49, %v4279_v43 }
 0x2cc   :  { %v4330_v59 = vpop.f32.mrf.mxu0 }
 0x2cd   :  { %v4305_v4 = vadd.f32 %v4304_v53, %v4292_v0 }
 0x2d0   :  { %v4317_v57 = vpop.f32.mrf.mxu3 }
 0x2d1   :  { %v4318_v30 = vadd.f32 %v4317_v57, %v4305_v4 }
 0x2d2   :  { %v4293_v58 = vpop.f32.mrf.mxu1 }
 0x2d3   :  { %v4331_v7 = vadd.f32 %v4330_v59, %v4318_v30 }
 0x2d4   :  { %v4332_v63 = vpop.f32.mrf.mxu0 }
 0x2d8   :  { %v4319_v62 = vpop.f32.mrf.mxu3 }
 0x2ea   :  { %v4343_v44 = vpop.f32.mrf.mxu1 }
 0x2eb   :  { %v4344_v60 = vadd.f32 %v4343_v44, %v4331_v7 }
 0x2f2   :  { %v4345_v35 = vpop.f32.mrf.mxu1  ;;  %v4356_v5 = vpop.f32.mrf.mxu2 }
 0x2f3   :  { %v4357_v38 = vadd.f32 %v4356_v5, %v4344_v60 }
 0x2f8   :  { %v4369_v28 = vpop.f32.mrf.mxu3 }
 0x2f9   :  { %v4370_v8 = vadd.f32 %v4369_v28, %v4357_v38 }
 0x2fa   :  { %v4358_v47 = vpop.f32.mrf.mxu2 }
 0x2fb   :  { %4373 = vst [vmem:[#allocation13] sm:$0xff] %v4370_v8 }
 0x2fc   :  { %4384 = dma.vmem_to_hbm [thread:$0]  %s4380_s9, 128, %s4382_s12, [#allocation4]  }
 0x300   :  { %v4371_v39 = vpop.f32.mrf.mxu3 }
 0x301   :  { %7143 = dma.done.wait [#allocation4], 128  }
 0x302   :  { %7144 = vsyncadd [#allocation4], 4294967168 }
 0x303   :  { %4389 = vsyncpa [#allocation3], 1 }
 0x304   :  { %4390 = vsyncpa [#allocation6], 1 }
 0x305   :  { %4391 = vsyncpa [#allocation9], 1 }
 0x306   :  { %4392 = vsyncpa [#allocation12], 1 }
 0x307   :  { %4393 = vsyncpa [#allocation4], 1 }

</bundles_post_ra>
